<compile_context>
chip_gen: v5e
topology: v5e:2x2
jax: 0.10.0
libtpu: 0.0.40
codegen_flags: <defaults>
</compile_context>

<pallas_src>
import jax
import jax.numpy as jnp
from jax import lax
from jax.experimental import pallas as pl
from jax.experimental.pallas import tpu as pltpu

# ---------------- model hyper-parameters (small, consistent with the module) ----------------
EMBED_DIM = 32        # embedding_dim
ATTN_DIM = 32         # attn_dim
NUM_HEADS = 2
HEAD_DIM = ATTN_DIM // NUM_HEADS
N_LAYERS = 2          # -> 1 encoder layer, 1 decoder layer
NUM_EMBEDDINGS = 64   # per-level sem-id vocab
SEM_ID_DIM = 4
MAX_POS = 64
NUM_USERS = 2000
D_FF = 64             # TODO(synk): TransformerEncoderDecoder internals not given; use 2*attn_dim FFN width
NEG = -1e30
EPS = 1e-6
N_NORMS = 7           # norm, norm_cxt, enc.ln1, enc.ln2, dec.ln1, dec.ln2, dec.ln3

# ---- column offsets inside the packed (32, 640) weight slab ----
_A, _F, _V = ATTN_DIM, D_FF, NUM_EMBEDDINGS
OFF_CTX = 0                       # in_proj_context         (32)
OFF_IN = OFF_CTX + _A             # in_proj                  (32)
OFF_EQKV = OFF_IN + _A            # encoder fused QKV        (96)
OFF_EWO = OFF_EQKV + 3 * _A       # encoder attn out-proj    (32)
OFF_EW1 = OFF_EWO + _A            # encoder FFN up           (64)
OFF_DQKV = OFF_EW1 + _F           # decoder self fused QKV   (96)
OFF_DSO = OFF_DQKV + 3 * _A       # decoder self out-proj    (32)
OFF_DCQ = OFF_DSO + _A            # decoder cross Q          (32)
OFF_DCKV = OFF_DCQ + _A           # decoder cross fused KV   (64)
OFF_DCO = OFF_DCKV + 2 * _A       # decoder cross out-proj   (32)
OFF_DW1 = OFF_DCO + _A            # decoder FFN up           (64)
OFF_OUT = OFF_DW1 + _F            # output head              (64)
W32_COLS = OFF_OUT + _V           # 640 (= 5 * 128, lane-aligned total)


# ---------------------------------- fused Pallas kernel ----------------------------------
def _make_fused_kernel(bt, ne_pad, td_pad):
    """Kernel closure: bt samples per grid step, padded row counts ne_pad / td_pad."""
    A, Dh, V, f32 = ATTN_DIM, HEAD_DIM, NUM_EMBEDDINGS, jnp.float32
    scale = 1.0 / (Dh ** 0.5)

    def kernel(lens_ref, ctx_ref, fut_ref, w32_ref, w64_ref, out_ref):
        b0 = pl.program_id(0) * bt

        def W(off, width):                       # static lane-window into the weight slab
            return w32_ref[:, off:off + width]

        def rms(x):                              # norm weight folded into next matmul host-side
            return x * lax.rsqrt(jnp.mean(x * x, axis=-1, keepdims=True) + EPS)

        def softmax(s):
            m = jnp.max(s, axis=-1, keepdims=True)
            e = jnp.exp(s - m)
            return e / jnp.sum(e, axis=-1, keepdims=True)

        def mm(a, b):
            return jnp.dot(a, b, preferred_element_type=f32)

        # ----- additive biases, built in-kernel -----
        colk = lax.broadcasted_iota(jnp.int32, (1, ne_pad), 1)
        key_bias = [jnp.where(colk < lens_ref[b0 + i], 0.0, NEG) for i in range(bt)]
        row = lax.broadcasted_iota(jnp.int32, (td_pad, td_pad), 0)
        col = lax.broadcasted_iota(jnp.int32, (td_pad, td_pad), 1)
        causal_bias = [jnp.where(row >= col, 0.0, NEG)] * bt

        def mha(q, k, v, biases, wo, tq, tk):
            # q: (bt*tq, A); k, v: (bt*tk, A); per-sample attention, one shared out-proj matmul
            outs = []
            for i in range(bt):                                   # static unroll over samples
                qi = q[i * tq:(i + 1) * tq, :]
                ki = k[i * tk:(i + 1) * tk, :]
                vi = v[i * tk:(i + 1) * tk, :]
                heads = []
                for h in range(NUM_HEADS):                        # static unroll over heads
                    lo, hi = h * Dh, (h + 1) * Dh
                    s = lax.dot_general(qi[:, lo:hi], ki[:, lo:hi],
                                        (((1,), (1,)), ((), ())),
                                        preferred_element_type=f32) * scale + biases[i]
                    heads.append(mm(softmax(s), vi[:, lo:hi]))
                outs.append(jnp.concatenate(heads, axis=-1))      # (tq, A) lane concat
            o = jnp.concatenate(outs, axis=0)                     # (bt*tq, A)
            return mm(o, wo)                                      # single out-proj matmul

        ctx_in = ctx_ref[...].astype(f32)                         # (bt*ne_pad, D)
        fut_in = fut_ref[...].astype(f32)                         # (bt*td_pad, D)

        # ----- input projections (dropout p=0.5 is identity at eval) -----
        ctx = mm(rms(ctx_in), W(OFF_CTX, A))                      # (bt*ne_pad, A)
        x = mm(rms(fut_in), W(OFF_IN, A))                         # (bt*td_pad, A)

        # ----- encoder layer (pre-norm self-attention + FFN) -----
        qkv = mm(rms(ctx), W(OFF_EQKV, 3 * A))
        ctx = ctx + mha(qkv[:, 0:A], qkv[:, A:2 * A], qkv[:, 2 * A:3 * A],
                        key_bias, W(OFF_EWO, A), ne_pad, ne_pad)
        ctx = ctx + mm(jax.nn.gelu(mm(rms(ctx), W(OFF_EW1, D_FF))), w64_ref[:, 0:A])

        # ----- decoder layer (causal self-attn, cross-attn over encoder output, FFN) -----
        qkv = mm(rms(x), W(OFF_DQKV, 3 * A))
        x = x + mha(qkv[:, 0:A], qkv[:, A:2 * A], qkv[:, 2 * A:3 * A],
                    causal_bias, W(OFF_DSO, A), td_pad, td_pad)
        qc = mm(rms(x), W(OFF_DCQ, A))
        kv = mm(ctx, W(OFF_DCKV, 2 * A))
        x = x + mha(qc, kv[:, 0:A], kv[:, A:2 * A],
                    key_bias, W(OFF_DCO, A), td_pad, ne_pad)
        x = x + mm(jax.nn.gelu(mm(rms(x), W(OFF_DW1, D_FF))), w64_ref[:, A:2 * A])

        # ----- output head (pad rows sliced off in the wrapper) -----
        out_ref[...] = mm(x, W(OFF_OUT, V)).astype(out_ref.dtype)

    return kernel


def fused_forward_pallas(lens, ctx_flat, fut_flat, w32, w64, *, batch, ne_pad, td_pad):
    D, V = EMBED_DIM, NUM_EMBEDDINGS
    # >= 2 grid steps keep both v7x TensorCores busy; on v5e/v6e the grid is a cheap serial loop.
    grid_n = 2 if (batch % 2 == 0 and batch >= 2) else 1
    bt = batch // grid_n

    kernel = _make_fused_kernel(bt, ne_pad, td_pad)
    grid_spec = pltpu.PrefetchScalarGridSpec(
        num_scalar_prefetch=1,                                   # lens -> SMEM
        grid=(grid_n,),
        in_specs=[
            pl.BlockSpec((bt * ne_pad, D), lambda b, lens_ref: (b, 0)),
            pl.BlockSpec((bt * td_pad, D), lambda b, lens_ref: (b, 0)),
            pl.BlockSpec(w32.shape, lambda b, lens_ref: (0, 0)),   # weight slab, VMEM-resident
            pl.BlockSpec(w64.shape, lambda b, lens_ref: (0, 0)),   # weight slab, VMEM-resident
        ],
        out_specs=pl.BlockSpec((bt * td_pad, V), lambda b, lens_ref: (b, 0)),
    )
    return pl.pallas_call(
        kernel,
        grid_spec=grid_spec,
        out_shape=jax.ShapeDtypeStruct((batch * td_pad, V), jnp.float32),
        compiler_params=pltpu.CompilerParams(dimension_semantics=("parallel",)),
    )(lens, ctx_flat, fut_flat, w32, w64)


# ---------------------------------- parameter init ----------------------------------
def init_params(key):
    keys = iter(jax.random.split(key, 32))

    def w(shape, scale=0.02):
        return scale * jax.random.normal(next(keys), shape, dtype=jnp.float32)

    A, D, F, V = ATTN_DIM, EMBED_DIM, D_FF, NUM_EMBEDDINGS
    return dict(
        bos_emb=jax.random.uniform(next(keys), (D,), dtype=jnp.float32),
        sem_emb=w((SEM_ID_DIM * V + 1, D)),
        user_emb=w((NUM_USERS, D)),
        wpe=w((MAX_POS, D)),
        tte=w((SEM_ID_DIM, D)),
        tte_fut=w((SEM_ID_DIM, D)),   # present in module; forward uses self.tte
        norms=jnp.ones((N_NORMS, D), jnp.float32),
        in_proj=w((D, A)),
        in_proj_context=w((D, A)),
        enc_wqkv=w((A, 3 * A)), enc_wo=w((A, A)), enc_w1=w((A, F)), enc_w2=w((F, A)),
        dec_wqkv=w((A, 3 * A)), dec_so=w((A, A)),
        dec_cq=w((A, A)), dec_ckv=w((A, 2 * A)), dec_co=w((A, A)),
        dec_w1=w((A, F)), dec_w2=w((F, A)),
        out_proj=w((A, V)),
    )


# ---------------------------------- forward ----------------------------------
@jax.jit
def forward(params, user_ids, sem_ids, sem_ids_fut, seq_mask,
            token_type_ids, token_type_ids_fut):
    B, N = seq_mask.shape
    Sf = sem_ids_fut.shape[1]
    D, V = EMBED_DIM, NUM_EMBEDDINGS
    Ne, Td = N + 1, Sf + 1
    ne_pad = ((Ne + 7) // 8) * 8
    td_pad = ((Td + 7) // 8) * 8

    # ----- _predict embeddings (gathers stay in JAX) -----
    user_emb = params["user_emb"][user_ids % NUM_USERS][:, None, :]             # (B,1,D)
    pad_idx = SEM_ID_DIM * V
    idx = jnp.where(seq_mask, sem_ids + token_type_ids * V, pad_idx)
    sem_ids_emb = params["sem_emb"][idx]                                        # (B,N,D)
    sem_ids_emb_fut = params["sem_emb"][sem_ids_fut + token_type_ids_fut * V]   # (B,Sf,D)

    wpe = params["wpe"][jnp.arange(N)][None]                                    # (1,N,D)
    input_embedding = jnp.concatenate([user_emb, wpe + sem_ids_emb], axis=1)    # (B,Ne,D)
    bos = jnp.broadcast_to(params["bos_emb"], (B, 1, D))
    tte_fut = params["tte"][token_type_ids_fut]                                 # module uses self.tte
    input_embedding_fut = jnp.concatenate([bos, sem_ids_emb_fut + tte_fut], axis=1)  # (B,Td,D)

    # per-sample padding to sublane multiples; flatten to 2-D so all kernel matmuls stay 2-D
    ctx_flat = jnp.pad(input_embedding, ((0, 0), (0, ne_pad - Ne), (0, 0))
                       ).reshape(B * ne_pad, D).astype(jnp.float32)
    fut_flat = jnp.pad(input_embedding_fut, ((0, 0), (0, td_pad - Td), (0, 0))
                       ).reshape(B * td_pad, D).astype(jnp.float32)

    # valid encoder-key count per sample (user token + sequence prefix)
    # TODO(synk): jagged (NestedTensor) path approximated as key-padding-masked dense attention;
    # seq_mask is treated as a prefix/length mask (as in the reference's jagged path).
    lens = (seq_mask.sum(axis=1) + 1).astype(jnp.int32)                         # (B,)

    # ----- weight slabs (RMSNorm weights diag-folded into the following projection; exact) -----
    def fold(nidx, w):
        return params["norms"][nidx][:, None] * w
    w32 = jnp.concatenate([
        fold(0, params["in_proj_context"]), fold(1, params["in_proj"]),
        fold(2, params["enc_wqkv"]), params["enc_wo"], fold(3, params["enc_w1"]),
        fold(4, params["dec_wqkv"]), params["dec_so"], fold(5, params["dec_cq"]),
        params["dec_ckv"], params["dec_co"], fold(6, params["dec_w1"]),
        params["out_proj"]], axis=1).astype(jnp.float32)                        # (32, 640)
    w64 = jnp.concatenate([params["enc_w2"], params["dec_w2"]], axis=1
                          ).astype(jnp.float32)                                 # (64, 64)

    logits_pad = fused_forward_pallas(lens, ctx_flat, fut_flat, w32, w64,
                                      batch=B, ne_pad=ne_pad, td_pad=td_pad)
    logits_bsv = logits_pad.reshape(B, td_pad, V)[:, :Sf, :]                    # (B,Sf,V)

    # ----- cross-entropy (ignore_index = -1) + loss-head reductions (wrapper; logits already out) -----
    tgt = sem_ids_fut.astype(jnp.int32)                                         # (B,Sf)
    lse = jax.nn.logsumexp(logits_bsv, axis=-1)                                 # (B,Sf)
    picked = jnp.take_along_axis(logits_bsv, jnp.clip(tgt, 0, V - 1)[..., None],
                                 axis=-1)[..., 0]
    unred_loss = jnp.where(tgt != -1, lse - picked, 0.0)                        # (B,Sf)
    loss = unred_loss.sum(axis=1).mean()
    loss_d = unred_loss.mean(axis=0)
    logits = logits_bsv.reshape(B * Sf, V)
    return loss, logits, loss_d


# ---------------------------------- main ----------------------------------
if __name__ == "__main__":
    key = jax.random.PRNGKey(0)
    kp, k1, k2 = jax.random.split(key, 3)
    params = init_params(kp)

    B, N = 4, 8  # 2 items * sem_id_dim sem-ids per item; batch of 4 -> 2 grid steps x 2 samples
    user_ids = jnp.arange(B, dtype=jnp.int32)
    sem_ids = jax.random.randint(k1, (B, N), 0, NUM_EMBEDDINGS, dtype=jnp.int32)
    sem_ids_fut = jax.random.randint(k2, (B, SEM_ID_DIM), 0, NUM_EMBEDDINGS, dtype=jnp.int32)
    token_type_ids = jnp.broadcast_to(
        jnp.tile(jnp.arange(SEM_ID_DIM, dtype=jnp.int32), N // SEM_ID_DIM)[None], (B, N))
    token_type_ids_fut = jnp.broadcast_to(
        jnp.arange(SEM_ID_DIM, dtype=jnp.int32)[None], (B, SEM_ID_DIM))
    # sequence lengths [8, 4, 8, 6]
    seq_mask = jnp.arange(N)[None, :] < jnp.array([[8], [4], [8], [6]])

    loss, logits, loss_d = forward(params, user_ids, sem_ids, sem_ids_fut,
                                   seq_mask, token_type_ids, token_type_ids_fut)
    jax.block_until_ready((loss, logits, loss_d))
    assert logits.shape == (B * SEM_ID_DIM, NUM_EMBEDDINGS)
    assert loss_d.shape == (SEM_ID_DIM,)
    assert bool(jnp.isfinite(loss))
    print("KERNEL_OK")
</pallas_src>

<mosaic_0001>
module attributes {stable_mosaic.version = 11 : i64} {
  func.func @kernel(%arg0: i32, %arg1: memref<4xi32, #tpu.memory_space<smem>>, %arg2: memref<32x32xf32, #tpu.memory_space<vmem>>, %arg3: memref<16x32xf32, #tpu.memory_space<vmem>>, %arg4: memref<32x640xf32, #tpu.memory_space<vmem>>, %arg5: memref<64x64xf32, #tpu.memory_space<vmem>>, %arg6: memref<16x64xf32, #tpu.memory_space<vmem>>) attributes {dimension_semantics = [#tpu.dimension_semantics<parallel>], iteration_bounds = array<i64: 2>, scalar_prefetch = 1 : i64, scratch_operands = 0 : i64, tpu.core_type = #tpu.core_type<tc>, window_params = [{transform_indices = @transform_0, window_bounds = array<i64: 32, 32>}, {transform_indices = @transform_1, window_bounds = array<i64: 16, 32>}, {pipeline_mode = #tpu.pipeline_mode<synchronous>, transform_indices = @transform_2, window_bounds = array<i64: 32, 640>}, {pipeline_mode = #tpu.pipeline_mode<synchronous>, transform_indices = @transform_3, window_bounds = array<i64: 64, 64>}, {transform_indices = @transform_4, window_bounds = array<i64: 16, 64>}]} {
    %c2_i32 = arith.constant 2 : i32
    %0 = arith.muli %arg0, %c2_i32 : i32
    %1 = tpu.iota {dimensions = array<i32: 1>} : vector<1x16xi32>
    %c0_i32 = arith.constant 0 : i32
    %2 = arith.addi %0, %c0_i32 : i32
    %3 = arith.index_cast %2 : i32 to index
    %4 = memref.load %arg1[%3] : memref<4xi32, #tpu.memory_space<smem>>
    %5 = vector.broadcast %4 : i32 to vector<1x16xi32>
    %6 = arith.cmpi slt, %1, %5 : vector<1x16xi32>
    %cst = arith.constant 0.000000e+00 : f32
    %cst_0 = arith.constant -1.000000e+30 : f32
    %7 = vector.broadcast %cst : f32 to vector<1x16xf32>
    %8 = vector.broadcast %cst_0 : f32 to vector<1x16xf32>
    %9 = arith.select %6, %7, %8 : vector<1x16xi1>, vector<1x16xf32>
    %c1_i32 = arith.constant 1 : i32
    %10 = arith.addi %0, %c1_i32 : i32
    %11 = arith.index_cast %10 : i32 to index
    %12 = memref.load %arg1[%11] : memref<4xi32, #tpu.memory_space<smem>>
    %13 = vector.broadcast %12 : i32 to vector<1x16xi32>
    %14 = arith.cmpi slt, %1, %13 : vector<1x16xi32>
    %cst_1 = arith.constant 0.000000e+00 : f32
    %cst_2 = arith.constant -1.000000e+30 : f32
    %15 = vector.broadcast %cst_1 : f32 to vector<1x16xf32>
    %16 = vector.broadcast %cst_2 : f32 to vector<1x16xf32>
    %17 = arith.select %14, %15, %16 : vector<1x16xi1>, vector<1x16xf32>
    %18 = tpu.iota {dimensions = array<i32: 0>} : vector<8x8xi32>
    %19 = tpu.iota {dimensions = array<i32: 1>} : vector<8x8xi32>
    %20 = arith.cmpi sge, %18, %19 : vector<8x8xi32>
    %cst_3 = arith.constant 0.000000e+00 : f32
    %cst_4 = arith.constant -1.000000e+30 : f32
    %21 = vector.broadcast %cst_3 : f32 to vector<8x8xf32>
    %22 = vector.broadcast %cst_4 : f32 to vector<8x8xf32>
    %23 = arith.select %20, %21, %22 : vector<8x8xi1>, vector<8x8xf32>
    %c0 = arith.constant 0 : index
    %c0_5 = arith.constant 0 : index
    %24 = vector.load %arg2[%c0, %c0_5] : memref<32x32xf32, #tpu.memory_space<vmem>>, vector<32x32xf32>
    %c0_6 = arith.constant 0 : index
    %c0_7 = arith.constant 0 : index
    %25 = vector.load %arg3[%c0_6, %c0_7] : memref<16x32xf32, #tpu.memory_space<vmem>>, vector<16x32xf32>
    %26 = arith.mulf %24, %24 : vector<32x32xf32>
    %cst_8 = arith.constant dense<0.000000e+00> : vector<32xf32>
    %27 = vector.multi_reduction <add>, %26, %cst_8 [1] : vector<32x32xf32> to vector<32xf32>
    %28 = vector.shape_cast %27 : vector<32xf32> to vector<32x1xf32>
    %cst_9 = arith.constant 3.200000e+01 : f32
    %29 = vector.broadcast %cst_9 : f32 to vector<32x1xf32>
    %30 = arith.divf %28, %29 : vector<32x1xf32>
    %cst_10 = arith.constant 9.99999997E-7 : f32
    %31 = vector.broadcast %cst_10 : f32 to vector<32x1xf32>
    %32 = arith.addf %30, %31 : vector<32x1xf32>
    %33 = math.rsqrt %32 : vector<32x1xf32>
    %34 = vector.broadcast %33 : vector<32x1xf32> to vector<32x32xf32>
    %35 = arith.mulf %24, %34 : vector<32x32xf32>
    %c0_11 = arith.constant 0 : index
    %c0_12 = arith.constant 0 : index
    %36 = vector.load %arg4[%c0_11, %c0_12] : memref<32x640xf32, #tpu.memory_space<vmem>>, vector<32x32xf32>
    %cst_13 = arith.constant dense<0.000000e+00> : vector<32x32xf32>
    %37 = tpu.matmul %35, %36, %cst_13 {dimension_numbers = #tpu.dot_dimension_numbers<[1], [0], [0], [1], [0, 0, 1, 1], [], []>} : vector<32x32xf32>, vector<32x32xf32>, vector<32x32xf32> -> vector<32x32xf32>
    %38 = arith.mulf %25, %25 : vector<16x32xf32>
    %cst_14 = arith.constant dense<0.000000e+00> : vector<16xf32>
    %39 = vector.multi_reduction <add>, %38, %cst_14 [1] : vector<16x32xf32> to vector<16xf32>
    %40 = vector.shape_cast %39 : vector<16xf32> to vector<16x1xf32>
    %cst_15 = arith.constant 3.200000e+01 : f32
    %41 = vector.broadcast %cst_15 : f32 to vector<16x1xf32>
    %42 = arith.divf %40, %41 : vector<16x1xf32>
    %cst_16 = arith.constant 9.99999997E-7 : f32
    %43 = vector.broadcast %cst_16 : f32 to vector<16x1xf32>
    %44 = arith.addf %42, %43 : vector<16x1xf32>
    %45 = math.rsqrt %44 : vector<16x1xf32>
    %46 = vector.broadcast %45 : vector<16x1xf32> to vector<16x32xf32>
    %47 = arith.mulf %25, %46 : vector<16x32xf32>
    %c0_17 = arith.constant 0 : index
    %c32 = arith.constant 32 : index
    %48 = vector.load %arg4[%c0_17, %c32] : memref<32x640xf32, #tpu.memory_space<vmem>>, vector<32x32xf32>
    %cst_18 = arith.constant dense<0.000000e+00> : vector<16x32xf32>
    %49 = tpu.matmul %47, %48, %cst_18 {dimension_numbers = #tpu.dot_dimension_numbers<[1], [0], [0], [1], [0, 0, 1, 1], [], []>} : vector<16x32xf32>, vector<32x32xf32>, vector<16x32xf32> -> vector<16x32xf32>
    %50 = arith.mulf %37, %37 : vector<32x32xf32>
    %cst_19 = arith.constant dense<0.000000e+00> : vector<32xf32>
    %51 = vector.multi_reduction <add>, %50, %cst_19 [1] : vector<32x32xf32> to vector<32xf32>
    %52 = vector.shape_cast %51 : vector<32xf32> to vector<32x1xf32>
    %cst_20 = arith.constant 3.200000e+01 : f32
    %53 = vector.broadcast %cst_20 : f32 to vector<32x1xf32>
    %54 = arith.divf %52, %53 : vector<32x1xf32>
    %cst_21 = arith.constant 9.99999997E-7 : f32
    %55 = vector.broadcast %cst_21 : f32 to vector<32x1xf32>
    %56 = arith.addf %54, %55 : vector<32x1xf32>
    %57 = math.rsqrt %56 : vector<32x1xf32>
    %58 = vector.broadcast %57 : vector<32x1xf32> to vector<32x32xf32>
    %59 = arith.mulf %37, %58 : vector<32x32xf32>
    %c0_22 = arith.constant 0 : index
    %c64 = arith.constant 64 : index
    %60 = vector.load %arg4[%c0_22, %c64] : memref<32x640xf32, #tpu.memory_space<vmem>>, vector<32x96xf32>
    %cst_23 = arith.constant dense<0.000000e+00> : vector<32x96xf32>
    %61 = tpu.matmul %59, %60, %cst_23 {dimension_numbers = #tpu.dot_dimension_numbers<[1], [0], [0], [1], [0, 0, 1, 1], [], []>} : vector<32x32xf32>, vector<32x96xf32>, vector<32x96xf32> -> vector<32x96xf32>
    %62 = vector.extract_strided_slice %61 {offsets = [0, 0], sizes = [32, 32], strides = [1, 1]} : vector<32x96xf32> to vector<32x32xf32>
    %63 = vector.extract_strided_slice %61 {offsets = [0, 32], sizes = [32, 32], strides = [1, 1]} : vector<32x96xf32> to vector<32x32xf32>
    %64 = vector.extract_strided_slice %61 {offsets = [0, 64], sizes = [32, 32], strides = [1, 1]} : vector<32x96xf32> to vector<32x32xf32>
    %c0_24 = arith.constant 0 : index
    %c160 = arith.constant 160 : index
    %65 = vector.load %arg4[%c0_24, %c160] : memref<32x640xf32, #tpu.memory_space<vmem>>, vector<32x32xf32>
    %66 = vector.extract_strided_slice %62 {offsets = [0, 0], sizes = [16, 32], strides = [1, 1]} : vector<32x32xf32> to vector<16x32xf32>
    %67 = vector.extract_strided_slice %63 {offsets = [0, 0], sizes = [16, 32], strides = [1, 1]} : vector<32x32xf32> to vector<16x32xf32>
    %68 = vector.extract_strided_slice %64 {offsets = [0, 0], sizes = [16, 32], strides = [1, 1]} : vector<32x32xf32> to vector<16x32xf32>
    %69 = vector.extract_strided_slice %66 {offsets = [0, 0], sizes = [16, 16], strides = [1, 1]} : vector<16x32xf32> to vector<16x16xf32>
    %70 = vector.extract_strided_slice %67 {offsets = [0, 0], sizes = [16, 16], strides = [1, 1]} : vector<16x32xf32> to vector<16x16xf32>
    %cst_25 = arith.constant dense<0.000000e+00> : vector<16x16xf32>
    %71 = tpu.matmul %69, %70, %cst_25 {dimension_numbers = #tpu.dot_dimension_numbers<[1], [1], [0], [0], [0, 0, 1, 0], [], []>} : vector<16x16xf32>, vector<16x16xf32>, vector<16x16xf32> -> vector<16x16xf32>
    %cst_26 = arith.constant 2.500000e-01 : f32
    %72 = vector.broadcast %cst_26 : f32 to vector<16x16xf32>
    %73 = arith.mulf %71, %72 : vector<16x16xf32>
    %74 = vector.broadcast %9 : vector<1x16xf32> to vector<16x16xf32>
    %75 = arith.addf %73, %74 : vector<16x16xf32>
    %cst_27 = arith.constant dense<0xFF800000> : vector<16xf32>
    %76 = vector.multi_reduction <maximumf>, %75, %cst_27 [1] : vector<16x16xf32> to vector<16xf32>
    %77 = vector.shape_cast %76 : vector<16xf32> to vector<16x1xf32>
    %78 = vector.broadcast %77 : vector<16x1xf32> to vector<16x16xf32>
    %79 = arith.subf %75, %78 : vector<16x16xf32>
    %80 = math.exp %79 : vector<16x16xf32>
    %cst_28 = arith.constant dense<0.000000e+00> : vector<16xf32>
    %81 = vector.multi_reduction <add>, %80, %cst_28 [1] : vector<16x16xf32> to vector<16xf32>
    %82 = vector.shape_cast %81 : vector<16xf32> to vector<16x1xf32>
    %83 = vector.broadcast %82 : vector<16x1xf32> to vector<16x16xf32>
    %84 = arith.divf %80, %83 : vector<16x16xf32>
    %85 = vector.extract_strided_slice %68 {offsets = [0, 0], sizes = [16, 16], strides = [1, 1]} : vector<16x32xf32> to vector<16x16xf32>
    %cst_29 = arith.constant dense<0.000000e+00> : vector<16x16xf32>
    %86 = tpu.matmul %84, %85, %cst_29 {dimension_numbers = #tpu.dot_dimension_numbers<[1], [0], [0], [1], [0, 0, 1, 1], [], []>} : vector<16x16xf32>, vector<16x16xf32>, vector<16x16xf32> -> vector<16x16xf32>
    %87 = vector.extract_strided_slice %66 {offsets = [0, 16], sizes = [16, 16], strides = [1, 1]} : vector<16x32xf32> to vector<16x16xf32>
    %88 = vector.extract_strided_slice %67 {offsets = [0, 16], sizes = [16, 16], strides = [1, 1]} : vector<16x32xf32> to vector<16x16xf32>
    %cst_30 = arith.constant dense<0.000000e+00> : vector<16x16xf32>
    %89 = tpu.matmul %87, %88, %cst_30 {dimension_numbers = #tpu.dot_dimension_numbers<[1], [1], [0], [0], [0, 0, 1, 0], [], []>} : vector<16x16xf32>, vector<16x16xf32>, vector<16x16xf32> -> vector<16x16xf32>
    %cst_31 = arith.constant 2.500000e-01 : f32
    %90 = vector.broadcast %cst_31 : f32 to vector<16x16xf32>
    %91 = arith.mulf %89, %90 : vector<16x16xf32>
    %92 = vector.broadcast %9 : vector<1x16xf32> to vector<16x16xf32>
    %93 = arith.addf %91, %92 : vector<16x16xf32>
    %cst_32 = arith.constant dense<0xFF800000> : vector<16xf32>
    %94 = vector.multi_reduction <maximumf>, %93, %cst_32 [1] : vector<16x16xf32> to vector<16xf32>
    %95 = vector.shape_cast %94 : vector<16xf32> to vector<16x1xf32>
    %96 = vector.broadcast %95 : vector<16x1xf32> to vector<16x16xf32>
    %97 = arith.subf %93, %96 : vector<16x16xf32>
    %98 = math.exp %97 : vector<16x16xf32>
    %cst_33 = arith.constant dense<0.000000e+00> : vector<16xf32>
    %99 = vector.multi_reduction <add>, %98, %cst_33 [1] : vector<16x16xf32> to vector<16xf32>
    %100 = vector.shape_cast %99 : vector<16xf32> to vector<16x1xf32>
    %101 = vector.broadcast %100 : vector<16x1xf32> to vector<16x16xf32>
    %102 = arith.divf %98, %101 : vector<16x16xf32>
    %103 = vector.extract_strided_slice %68 {offsets = [0, 16], sizes = [16, 16], strides = [1, 1]} : vector<16x32xf32> to vector<16x16xf32>
    %cst_34 = arith.constant dense<0.000000e+00> : vector<16x16xf32>
    %104 = tpu.matmul %102, %103, %cst_34 {dimension_numbers = #tpu.dot_dimension_numbers<[1], [0], [0], [1], [0, 0, 1, 1], [], []>} : vector<16x16xf32>, vector<16x16xf32>, vector<16x16xf32> -> vector<16x16xf32>
    %105 = tpu.concatenate %86, %104 in 1 : vector<16x16xf32>, vector<16x16xf32> -> vector<16x32xf32>
    %106 = vector.extract_strided_slice %62 {offsets = [16, 0], sizes = [16, 32], strides = [1, 1]} : vector<32x32xf32> to vector<16x32xf32>
    %107 = vector.extract_strided_slice %63 {offsets = [16, 0], sizes = [16, 32], strides = [1, 1]} : vector<32x32xf32> to vector<16x32xf32>
    %108 = vector.extract_strided_slice %64 {offsets = [16, 0], sizes = [16, 32], strides = [1, 1]} : vector<32x32xf32> to vector<16x32xf32>
    %109 = vector.extract_strided_slice %106 {offsets = [0, 0], sizes = [16, 16], strides = [1, 1]} : vector<16x32xf32> to vector<16x16xf32>
    %110 = vector.extract_strided_slice %107 {offsets = [0, 0], sizes = [16, 16], strides = [1, 1]} : vector<16x32xf32> to vector<16x16xf32>
    %cst_35 = arith.constant dense<0.000000e+00> : vector<16x16xf32>
    %111 = tpu.matmul %109, %110, %cst_35 {dimension_numbers = #tpu.dot_dimension_numbers<[1], [1], [0], [0], [0, 0, 1, 0], [], []>} : vector<16x16xf32>, vector<16x16xf32>, vector<16x16xf32> -> vector<16x16xf32>
    %cst_36 = arith.constant 2.500000e-01 : f32
    %112 = vector.broadcast %cst_36 : f32 to vector<16x16xf32>
    %113 = arith.mulf %111, %112 : vector<16x16xf32>
    %114 = vector.broadcast %17 : vector<1x16xf32> to vector<16x16xf32>
    %115 = arith.addf %113, %114 : vector<16x16xf32>
    %cst_37 = arith.constant dense<0xFF800000> : vector<16xf32>
    %116 = vector.multi_reduction <maximumf>, %115, %cst_37 [1] : vector<16x16xf32> to vector<16xf32>
    %117 = vector.shape_cast %116 : vector<16xf32> to vector<16x1xf32>
    %118 = vector.broadcast %117 : vector<16x1xf32> to vector<16x16xf32>
    %119 = arith.subf %115, %118 : vector<16x16xf32>
    %120 = math.exp %119 : vector<16x16xf32>
    %cst_38 = arith.constant dense<0.000000e+00> : vector<16xf32>
    %121 = vector.multi_reduction <add>, %120, %cst_38 [1] : vector<16x16xf32> to vector<16xf32>
    %122 = vector.shape_cast %121 : vector<16xf32> to vector<16x1xf32>
    %123 = vector.broadcast %122 : vector<16x1xf32> to vector<16x16xf32>
    %124 = arith.divf %120, %123 : vector<16x16xf32>
    %125 = vector.extract_strided_slice %108 {offsets = [0, 0], sizes = [16, 16], strides = [1, 1]} : vector<16x32xf32> to vector<16x16xf32>
    %cst_39 = arith.constant dense<0.000000e+00> : vector<16x16xf32>
    %126 = tpu.matmul %124, %125, %cst_39 {dimension_numbers = #tpu.dot_dimension_numbers<[1], [0], [0], [1], [0, 0, 1, 1], [], []>} : vector<16x16xf32>, vector<16x16xf32>, vector<16x16xf32> -> vector<16x16xf32>
    %127 = vector.extract_strided_slice %106 {offsets = [0, 16], sizes = [16, 16], strides = [1, 1]} : vector<16x32xf32> to vector<16x16xf32>
    %128 = vector.extract_strided_slice %107 {offsets = [0, 16], sizes = [16, 16], strides = [1, 1]} : vector<16x32xf32> to vector<16x16xf32>
    %cst_40 = arith.constant dense<0.000000e+00> : vector<16x16xf32>
    %129 = tpu.matmul %127, %128, %cst_40 {dimension_numbers = #tpu.dot_dimension_numbers<[1], [1], [0], [0], [0, 0, 1, 0], [], []>} : vector<16x16xf32>, vector<16x16xf32>, vector<16x16xf32> -> vector<16x16xf32>
    %cst_41 = arith.constant 2.500000e-01 : f32
    %130 = vector.broadcast %cst_41 : f32 to vector<16x16xf32>
    %131 = arith.mulf %129, %130 : vector<16x16xf32>
    %132 = vector.broadcast %17 : vector<1x16xf32> to vector<16x16xf32>
    %133 = arith.addf %131, %132 : vector<16x16xf32>
    %cst_42 = arith.constant dense<0xFF800000> : vector<16xf32>
    %134 = vector.multi_reduction <maximumf>, %133, %cst_42 [1] : vector<16x16xf32> to vector<16xf32>
    %135 = vector.shape_cast %134 : vector<16xf32> to vector<16x1xf32>
    %136 = vector.broadcast %135 : vector<16x1xf32> to vector<16x16xf32>
    %137 = arith.subf %133, %136 : vector<16x16xf32>
    %138 = math.exp %137 : vector<16x16xf32>
    %cst_43 = arith.constant dense<0.000000e+00> : vector<16xf32>
    %139 = vector.multi_reduction <add>, %138, %cst_43 [1] : vector<16x16xf32> to vector<16xf32>
    %140 = vector.shape_cast %139 : vector<16xf32> to vector<16x1xf32>
    %141 = vector.broadcast %140 : vector<16x1xf32> to vector<16x16xf32>
    %142 = arith.divf %138, %141 : vector<16x16xf32>
    %143 = vector.extract_strided_slice %108 {offsets = [0, 16], sizes = [16, 16], strides = [1, 1]} : vector<16x32xf32> to vector<16x16xf32>
    %cst_44 = arith.constant dense<0.000000e+00> : vector<16x16xf32>
    %144 = tpu.matmul %142, %143, %cst_44 {dimension_numbers = #tpu.dot_dimension_numbers<[1], [0], [0], [1], [0, 0, 1, 1], [], []>} : vector<16x16xf32>, vector<16x16xf32>, vector<16x16xf32> -> vector<16x16xf32>
    %145 = tpu.concatenate %126, %144 in 1 : vector<16x16xf32>, vector<16x16xf32> -> vector<16x32xf32>
    %146 = tpu.concatenate %105, %145 in 0 : vector<16x32xf32>, vector<16x32xf32> -> vector<32x32xf32>
    %cst_45 = arith.constant dense<0.000000e+00> : vector<32x32xf32>
    %147 = tpu.matmul %146, %65, %cst_45 {dimension_numbers = #tpu.dot_dimension_numbers<[1], [0], [0], [1], [0, 0, 1, 1], [], []>} : vector<32x32xf32>, vector<32x32xf32>, vector<32x32xf32> -> vector<32x32xf32>
    %148 = arith.addf %37, %147 : vector<32x32xf32>
    %149 = arith.mulf %148, %148 : vector<32x32xf32>
    %cst_46 = arith.constant dense<0.000000e+00> : vector<32xf32>
    %150 = vector.multi_reduction <add>, %149, %cst_46 [1] : vector<32x32xf32> to vector<32xf32>
    %151 = vector.shape_cast %150 : vector<32xf32> to vector<32x1xf32>
    %cst_47 = arith.constant 3.200000e+01 : f32
    %152 = vector.broadcast %cst_47 : f32 to vector<32x1xf32>
    %153 = arith.divf %151, %152 : vector<32x1xf32>
    %cst_48 = arith.constant 9.99999997E-7 : f32
    %154 = vector.broadcast %cst_48 : f32 to vector<32x1xf32>
    %155 = arith.addf %153, %154 : vector<32x1xf32>
    %156 = math.rsqrt %155 : vector<32x1xf32>
    %157 = vector.broadcast %156 : vector<32x1xf32> to vector<32x32xf32>
    %158 = arith.mulf %148, %157 : vector<32x32xf32>
    %c0_49 = arith.constant 0 : index
    %c192 = arith.constant 192 : index
    %159 = vector.load %arg4[%c0_49, %c192] : memref<32x640xf32, #tpu.memory_space<vmem>>, vector<32x64xf32>
    %cst_50 = arith.constant dense<0.000000e+00> : vector<32x64xf32>
    %160 = tpu.matmul %158, %159, %cst_50 {dimension_numbers = #tpu.dot_dimension_numbers<[1], [0], [0], [1], [0, 0, 1, 1], [], []>} : vector<32x32xf32>, vector<32x64xf32>, vector<32x64xf32> -> vector<32x64xf32>
    %161 = arith.mulf %160, %160 : vector<32x64xf32>
    %162 = arith.mulf %160, %161 : vector<32x64xf32>
    %cst_51 = arith.constant 4.471500e-02 : f32
    %163 = vector.broadcast %cst_51 : f32 to vector<32x64xf32>
    %164 = arith.mulf %163, %162 : vector<32x64xf32>
    %165 = arith.addf %160, %164 : vector<32x64xf32>
    %cst_52 = arith.constant 0.797884583 : f32
    %166 = vector.broadcast %cst_52 : f32 to vector<32x64xf32>
    %167 = arith.mulf %166, %165 : vector<32x64xf32>
    %168 = math.tanh %167 : vector<32x64xf32>
    %cst_53 = arith.constant 1.000000e+00 : f32
    %169 = vector.broadcast %cst_53 : f32 to vector<32x64xf32>
    %170 = arith.addf %169, %168 : vector<32x64xf32>
    %cst_54 = arith.constant 5.000000e-01 : f32
    %171 = vector.broadcast %cst_54 : f32 to vector<32x64xf32>
    %172 = arith.mulf %171, %170 : vector<32x64xf32>
    %173 = arith.mulf %160, %172 : vector<32x64xf32>
    %c0_55 = arith.constant 0 : index
    %c0_56 = arith.constant 0 : index
    %174 = vector.load %arg5[%c0_55, %c0_56] : memref<64x64xf32, #tpu.memory_space<vmem>>, vector<64x32xf32>
    %cst_57 = arith.constant dense<0.000000e+00> : vector<32x32xf32>
    %175 = tpu.matmul %173, %174, %cst_57 {dimension_numbers = #tpu.dot_dimension_numbers<[1], [0], [0], [1], [0, 0, 1, 1], [], []>} : vector<32x64xf32>, vector<64x32xf32>, vector<32x32xf32> -> vector<32x32xf32>
    %176 = arith.addf %148, %175 : vector<32x32xf32>
    %177 = arith.mulf %49, %49 : vector<16x32xf32>
    %cst_58 = arith.constant dense<0.000000e+00> : vector<16xf32>
    %178 = vector.multi_reduction <add>, %177, %cst_58 [1] : vector<16x32xf32> to vector<16xf32>
    %179 = vector.shape_cast %178 : vector<16xf32> to vector<16x1xf32>
    %cst_59 = arith.constant 3.200000e+01 : f32
    %180 = vector.broadcast %cst_59 : f32 to vector<16x1xf32>
    %181 = arith.divf %179, %180 : vector<16x1xf32>
    %cst_60 = arith.constant 9.99999997E-7 : f32
    %182 = vector.broadcast %cst_60 : f32 to vector<16x1xf32>
    %183 = arith.addf %181, %182 : vector<16x1xf32>
    %184 = math.rsqrt %183 : vector<16x1xf32>
    %185 = vector.broadcast %184 : vector<16x1xf32> to vector<16x32xf32>
    %186 = arith.mulf %49, %185 : vector<16x32xf32>
    %c0_61 = arith.constant 0 : index
    %c256 = arith.constant 256 : index
    %187 = vector.load %arg4[%c0_61, %c256] : memref<32x640xf32, #tpu.memory_space<vmem>>, vector<32x96xf32>
    %cst_62 = arith.constant dense<0.000000e+00> : vector<16x96xf32>
    %188 = tpu.matmul %186, %187, %cst_62 {dimension_numbers = #tpu.dot_dimension_numbers<[1], [0], [0], [1], [0, 0, 1, 1], [], []>} : vector<16x32xf32>, vector<32x96xf32>, vector<16x96xf32> -> vector<16x96xf32>
    %189 = vector.extract_strided_slice %188 {offsets = [0, 0], sizes = [16, 32], strides = [1, 1]} : vector<16x96xf32> to vector<16x32xf32>
    %190 = vector.extract_strided_slice %188 {offsets = [0, 32], sizes = [16, 32], strides = [1, 1]} : vector<16x96xf32> to vector<16x32xf32>
    %191 = vector.extract_strided_slice %188 {offsets = [0, 64], sizes = [16, 32], strides = [1, 1]} : vector<16x96xf32> to vector<16x32xf32>
    %c0_63 = arith.constant 0 : index
    %c352 = arith.constant 352 : index
    %192 = vector.load %arg4[%c0_63, %c352] : memref<32x640xf32, #tpu.memory_space<vmem>>, vector<32x32xf32>
    %193 = vector.extract_strided_slice %189 {offsets = [0, 0], sizes = [8, 32], strides = [1, 1]} : vector<16x32xf32> to vector<8x32xf32>
    %194 = vector.extract_strided_slice %190 {offsets = [0, 0], sizes = [8, 32], strides = [1, 1]} : vector<16x32xf32> to vector<8x32xf32>
    %195 = vector.extract_strided_slice %191 {offsets = [0, 0], sizes = [8, 32], strides = [1, 1]} : vector<16x32xf32> to vector<8x32xf32>
    %196 = vector.extract_strided_slice %193 {offsets = [0, 0], sizes = [8, 16], strides = [1, 1]} : vector<8x32xf32> to vector<8x16xf32>
    %197 = vector.extract_strided_slice %194 {offsets = [0, 0], sizes = [8, 16], strides = [1, 1]} : vector<8x32xf32> to vector<8x16xf32>
    %cst_64 = arith.constant dense<0.000000e+00> : vector<8x8xf32>
    %198 = tpu.matmul %196, %197, %cst_64 {dimension_numbers = #tpu.dot_dimension_numbers<[1], [1], [0], [0], [0, 0, 1, 0], [], []>} : vector<8x16xf32>, vector<8x16xf32>, vector<8x8xf32> -> vector<8x8xf32>
    %cst_65 = arith.constant 2.500000e-01 : f32
    %199 = vector.broadcast %cst_65 : f32 to vector<8x8xf32>
    %200 = arith.mulf %198, %199 : vector<8x8xf32>
    %201 = arith.addf %200, %23 : vector<8x8xf32>
    %cst_66 = arith.constant dense<0xFF800000> : vector<8xf32>
    %202 = vector.multi_reduction <maximumf>, %201, %cst_66 [1] : vector<8x8xf32> to vector<8xf32>
    %203 = vector.shape_cast %202 : vector<8xf32> to vector<8x1xf32>
    %204 = vector.broadcast %203 : vector<8x1xf32> to vector<8x8xf32>
    %205 = arith.subf %201, %204 : vector<8x8xf32>
    %206 = math.exp %205 : vector<8x8xf32>
    %cst_67 = arith.constant dense<0.000000e+00> : vector<8xf32>
    %207 = vector.multi_reduction <add>, %206, %cst_67 [1] : vector<8x8xf32> to vector<8xf32>
    %208 = vector.shape_cast %207 : vector<8xf32> to vector<8x1xf32>
    %209 = vector.broadcast %208 : vector<8x1xf32> to vector<8x8xf32>
    %210 = arith.divf %206, %209 : vector<8x8xf32>
    %211 = vector.extract_strided_slice %195 {offsets = [0, 0], sizes = [8, 16], strides = [1, 1]} : vector<8x32xf32> to vector<8x16xf32>
    %cst_68 = arith.constant dense<0.000000e+00> : vector<8x16xf32>
    %212 = tpu.matmul %210, %211, %cst_68 {dimension_numbers = #tpu.dot_dimension_numbers<[1], [0], [0], [1], [0, 0, 1, 1], [], []>} : vector<8x8xf32>, vector<8x16xf32>, vector<8x16xf32> -> vector<8x16xf32>
    %213 = vector.extract_strided_slice %193 {offsets = [0, 16], sizes = [8, 16], strides = [1, 1]} : vector<8x32xf32> to vector<8x16xf32>
    %214 = vector.extract_strided_slice %194 {offsets = [0, 16], sizes = [8, 16], strides = [1, 1]} : vector<8x32xf32> to vector<8x16xf32>
    %cst_69 = arith.constant dense<0.000000e+00> : vector<8x8xf32>
    %215 = tpu.matmul %213, %214, %cst_69 {dimension_numbers = #tpu.dot_dimension_numbers<[1], [1], [0], [0], [0, 0, 1, 0], [], []>} : vector<8x16xf32>, vector<8x16xf32>, vector<8x8xf32> -> vector<8x8xf32>
    %cst_70 = arith.constant 2.500000e-01 : f32
    %216 = vector.broadcast %cst_70 : f32 to vector<8x8xf32>
    %217 = arith.mulf %215, %216 : vector<8x8xf32>
    %218 = arith.addf %217, %23 : vector<8x8xf32>
    %cst_71 = arith.constant dense<0xFF800000> : vector<8xf32>
    %219 = vector.multi_reduction <maximumf>, %218, %cst_71 [1] : vector<8x8xf32> to vector<8xf32>
    %220 = vector.shape_cast %219 : vector<8xf32> to vector<8x1xf32>
    %221 = vector.broadcast %220 : vector<8x1xf32> to vector<8x8xf32>
    %222 = arith.subf %218, %221 : vector<8x8xf32>
    %223 = math.exp %222 : vector<8x8xf32>
    %cst_72 = arith.constant dense<0.000000e+00> : vector<8xf32>
    %224 = vector.multi_reduction <add>, %223, %cst_72 [1] : vector<8x8xf32> to vector<8xf32>
    %225 = vector.shape_cast %224 : vector<8xf32> to vector<8x1xf32>
    %226 = vector.broadcast %225 : vector<8x1xf32> to vector<8x8xf32>
    %227 = arith.divf %223, %226 : vector<8x8xf32>
    %228 = vector.extract_strided_slice %195 {offsets = [0, 16], sizes = [8, 16], strides = [1, 1]} : vector<8x32xf32> to vector<8x16xf32>
    %cst_73 = arith.constant dense<0.000000e+00> : vector<8x16xf32>
    %229 = tpu.matmul %227, %228, %cst_73 {dimension_numbers = #tpu.dot_dimension_numbers<[1], [0], [0], [1], [0, 0, 1, 1], [], []>} : vector<8x8xf32>, vector<8x16xf32>, vector<8x16xf32> -> vector<8x16xf32>
    %230 = tpu.concatenate %212, %229 in 1 : vector<8x16xf32>, vector<8x16xf32> -> vector<8x32xf32>
    %231 = vector.extract_strided_slice %189 {offsets = [8, 0], sizes = [8, 32], strides = [1, 1]} : vector<16x32xf32> to vector<8x32xf32>
    %232 = vector.extract_strided_slice %190 {offsets = [8, 0], sizes = [8, 32], strides = [1, 1]} : vector<16x32xf32> to vector<8x32xf32>
    %233 = vector.extract_strided_slice %191 {offsets = [8, 0], sizes = [8, 32], strides = [1, 1]} : vector<16x32xf32> to vector<8x32xf32>
    %234 = vector.extract_strided_slice %231 {offsets = [0, 0], sizes = [8, 16], strides = [1, 1]} : vector<8x32xf32> to vector<8x16xf32>
    %235 = vector.extract_strided_slice %232 {offsets = [0, 0], sizes = [8, 16], strides = [1, 1]} : vector<8x32xf32> to vector<8x16xf32>
    %cst_74 = arith.constant dense<0.000000e+00> : vector<8x8xf32>
    %236 = tpu.matmul %234, %235, %cst_74 {dimension_numbers = #tpu.dot_dimension_numbers<[1], [1], [0], [0], [0, 0, 1, 0], [], []>} : vector<8x16xf32>, vector<8x16xf32>, vector<8x8xf32> -> vector<8x8xf32>
    %cst_75 = arith.constant 2.500000e-01 : f32
    %237 = vector.broadcast %cst_75 : f32 to vector<8x8xf32>
    %238 = arith.mulf %236, %237 : vector<8x8xf32>
    %239 = arith.addf %238, %23 : vector<8x8xf32>
    %cst_76 = arith.constant dense<0xFF800000> : vector<8xf32>
    %240 = vector.multi_reduction <maximumf>, %239, %cst_76 [1] : vector<8x8xf32> to vector<8xf32>
    %241 = vector.shape_cast %240 : vector<8xf32> to vector<8x1xf32>
    %242 = vector.broadcast %241 : vector<8x1xf32> to vector<8x8xf32>
    %243 = arith.subf %239, %242 : vector<8x8xf32>
    %244 = math.exp %243 : vector<8x8xf32>
    %cst_77 = arith.constant dense<0.000000e+00> : vector<8xf32>
    %245 = vector.multi_reduction <add>, %244, %cst_77 [1] : vector<8x8xf32> to vector<8xf32>
    %246 = vector.shape_cast %245 : vector<8xf32> to vector<8x1xf32>
    %247 = vector.broadcast %246 : vector<8x1xf32> to vector<8x8xf32>
    %248 = arith.divf %244, %247 : vector<8x8xf32>
    %249 = vector.extract_strided_slice %233 {offsets = [0, 0], sizes = [8, 16], strides = [1, 1]} : vector<8x32xf32> to vector<8x16xf32>
    %cst_78 = arith.constant dense<0.000000e+00> : vector<8x16xf32>
    %250 = tpu.matmul %248, %249, %cst_78 {dimension_numbers = #tpu.dot_dimension_numbers<[1], [0], [0], [1], [0, 0, 1, 1], [], []>} : vector<8x8xf32>, vector<8x16xf32>, vector<8x16xf32> -> vector<8x16xf32>
    %251 = vector.extract_strided_slice %231 {offsets = [0, 16], sizes = [8, 16], strides = [1, 1]} : vector<8x32xf32> to vector<8x16xf32>
    %252 = vector.extract_strided_slice %232 {offsets = [0, 16], sizes = [8, 16], strides = [1, 1]} : vector<8x32xf32> to vector<8x16xf32>
    %cst_79 = arith.constant dense<0.000000e+00> : vector<8x8xf32>
    %253 = tpu.matmul %251, %252, %cst_79 {dimension_numbers = #tpu.dot_dimension_numbers<[1], [1], [0], [0], [0, 0, 1, 0], [], []>} : vector<8x16xf32>, vector<8x16xf32>, vector<8x8xf32> -> vector<8x8xf32>
    %cst_80 = arith.constant 2.500000e-01 : f32
    %254 = vector.broadcast %cst_80 : f32 to vector<8x8xf32>
    %255 = arith.mulf %253, %254 : vector<8x8xf32>
    %256 = arith.addf %255, %23 : vector<8x8xf32>
    %cst_81 = arith.constant dense<0xFF800000> : vector<8xf32>
    %257 = vector.multi_reduction <maximumf>, %256, %cst_81 [1] : vector<8x8xf32> to vector<8xf32>
    %258 = vector.shape_cast %257 : vector<8xf32> to vector<8x1xf32>
    %259 = vector.broadcast %258 : vector<8x1xf32> to vector<8x8xf32>
    %260 = arith.subf %256, %259 : vector<8x8xf32>
    %261 = math.exp %260 : vector<8x8xf32>
    %cst_82 = arith.constant dense<0.000000e+00> : vector<8xf32>
    %262 = vector.multi_reduction <add>, %261, %cst_82 [1] : vector<8x8xf32> to vector<8xf32>
    %263 = vector.shape_cast %262 : vector<8xf32> to vector<8x1xf32>
    %264 = vector.broadcast %263 : vector<8x1xf32> to vector<8x8xf32>
    %265 = arith.divf %261, %264 : vector<8x8xf32>
    %266 = vector.extract_strided_slice %233 {offsets = [0, 16], sizes = [8, 16], strides = [1, 1]} : vector<8x32xf32> to vector<8x16xf32>
    %cst_83 = arith.constant dense<0.000000e+00> : vector<8x16xf32>
    %267 = tpu.matmul %265, %266, %cst_83 {dimension_numbers = #tpu.dot_dimension_numbers<[1], [0], [0], [1], [0, 0, 1, 1], [], []>} : vector<8x8xf32>, vector<8x16xf32>, vector<8x16xf32> -> vector<8x16xf32>
    %268 = tpu.concatenate %250, %267 in 1 : vector<8x16xf32>, vector<8x16xf32> -> vector<8x32xf32>
    %269 = tpu.concatenate %230, %268 in 0 : vector<8x32xf32>, vector<8x32xf32> -> vector<16x32xf32>
    %cst_84 = arith.constant dense<0.000000e+00> : vector<16x32xf32>
    %270 = tpu.matmul %269, %192, %cst_84 {dimension_numbers = #tpu.dot_dimension_numbers<[1], [0], [0], [1], [0, 0, 1, 1], [], []>} : vector<16x32xf32>, vector<32x32xf32>, vector<16x32xf32> -> vector<16x32xf32>
    %271 = arith.addf %49, %270 : vector<16x32xf32>
    %272 = arith.mulf %271, %271 : vector<16x32xf32>
    %cst_85 = arith.constant dense<0.000000e+00> : vector<16xf32>
    %273 = vector.multi_reduction <add>, %272, %cst_85 [1] : vector<16x32xf32> to vector<16xf32>
    %274 = vector.shape_cast %273 : vector<16xf32> to vector<16x1xf32>
    %cst_86 = arith.constant 3.200000e+01 : f32
    %275 = vector.broadcast %cst_86 : f32 to vector<16x1xf32>
    %276 = arith.divf %274, %275 : vector<16x1xf32>
    %cst_87 = arith.constant 9.99999997E-7 : f32
    %277 = vector.broadcast %cst_87 : f32 to vector<16x1xf32>
    %278 = arith.addf %276, %277 : vector<16x1xf32>
    %279 = math.rsqrt %278 : vector<16x1xf32>
    %280 = vector.broadcast %279 : vector<16x1xf32> to vector<16x32xf32>
    %281 = arith.mulf %271, %280 : vector<16x32xf32>
    %c0_88 = arith.constant 0 : index
    %c384 = arith.constant 384 : index
    %282 = vector.load %arg4[%c0_88, %c384] : memref<32x640xf32, #tpu.memory_space<vmem>>, vector<32x32xf32>
    %cst_89 = arith.constant dense<0.000000e+00> : vector<16x32xf32>
    %283 = tpu.matmul %281, %282, %cst_89 {dimension_numbers = #tpu.dot_dimension_numbers<[1], [0], [0], [1], [0, 0, 1, 1], [], []>} : vector<16x32xf32>, vector<32x32xf32>, vector<16x32xf32> -> vector<16x32xf32>
    %c0_90 = arith.constant 0 : index
    %c416 = arith.constant 416 : index
    %284 = vector.load %arg4[%c0_90, %c416] : memref<32x640xf32, #tpu.memory_space<vmem>>, vector<32x64xf32>
    %cst_91 = arith.constant dense<0.000000e+00> : vector<32x64xf32>
    %285 = tpu.matmul %176, %284, %cst_91 {dimension_numbers = #tpu.dot_dimension_numbers<[1], [0], [0], [1], [0, 0, 1, 1], [], []>} : vector<32x32xf32>, vector<32x64xf32>, vector<32x64xf32> -> vector<32x64xf32>
    %286 = vector.extract_strided_slice %285 {offsets = [0, 0], sizes = [32, 32], strides = [1, 1]} : vector<32x64xf32> to vector<32x32xf32>
    %287 = vector.extract_strided_slice %285 {offsets = [0, 32], sizes = [32, 32], strides = [1, 1]} : vector<32x64xf32> to vector<32x32xf32>
    %c0_92 = arith.constant 0 : index
    %c480 = arith.constant 480 : index
    %288 = vector.load %arg4[%c0_92, %c480] : memref<32x640xf32, #tpu.memory_space<vmem>>, vector<32x32xf32>
    %289 = vector.extract_strided_slice %283 {offsets = [0, 0], sizes = [8, 32], strides = [1, 1]} : vector<16x32xf32> to vector<8x32xf32>
    %290 = vector.extract_strided_slice %286 {offsets = [0, 0], sizes = [16, 32], strides = [1, 1]} : vector<32x32xf32> to vector<16x32xf32>
    %291 = vector.extract_strided_slice %287 {offsets = [0, 0], sizes = [16, 32], strides = [1, 1]} : vector<32x32xf32> to vector<16x32xf32>
    %292 = vector.extract_strided_slice %289 {offsets = [0, 0], sizes = [8, 16], strides = [1, 1]} : vector<8x32xf32> to vector<8x16xf32>
    %293 = vector.extract_strided_slice %290 {offsets = [0, 0], sizes = [16, 16], strides = [1, 1]} : vector<16x32xf32> to vector<16x16xf32>
    %cst_93 = arith.constant dense<0.000000e+00> : vector<8x16xf32>
    %294 = tpu.matmul %292, %293, %cst_93 {dimension_numbers = #tpu.dot_dimension_numbers<[1], [1], [0], [0], [0, 0, 1, 0], [], []>} : vector<8x16xf32>, vector<16x16xf32>, vector<8x16xf32> -> vector<8x16xf32>
    %cst_94 = arith.constant 2.500000e-01 : f32
    %295 = vector.broadcast %cst_94 : f32 to vector<8x16xf32>
    %296 = arith.mulf %294, %295 : vector<8x16xf32>
    %297 = vector.broadcast %9 : vector<1x16xf32> to vector<8x16xf32>
    %298 = arith.addf %296, %297 : vector<8x16xf32>
    %cst_95 = arith.constant dense<0xFF800000> : vector<8xf32>
    %299 = vector.multi_reduction <maximumf>, %298, %cst_95 [1] : vector<8x16xf32> to vector<8xf32>
    %300 = vector.shape_cast %299 : vector<8xf32> to vector<8x1xf32>
    %301 = vector.broadcast %300 : vector<8x1xf32> to vector<8x16xf32>
    %302 = arith.subf %298, %301 : vector<8x16xf32>
    %303 = math.exp %302 : vector<8x16xf32>
    %cst_96 = arith.constant dense<0.000000e+00> : vector<8xf32>
    %304 = vector.multi_reduction <add>, %303, %cst_96 [1] : vector<8x16xf32> to vector<8xf32>
    %305 = vector.shape_cast %304 : vector<8xf32> to vector<8x1xf32>
    %306 = vector.broadcast %305 : vector<8x1xf32> to vector<8x16xf32>
    %307 = arith.divf %303, %306 : vector<8x16xf32>
    %308 = vector.extract_strided_slice %291 {offsets = [0, 0], sizes = [16, 16], strides = [1, 1]} : vector<16x32xf32> to vector<16x16xf32>
    %cst_97 = arith.constant dense<0.000000e+00> : vector<8x16xf32>
    %309 = tpu.matmul %307, %308, %cst_97 {dimension_numbers = #tpu.dot_dimension_numbers<[1], [0], [0], [1], [0, 0, 1, 1], [], []>} : vector<8x16xf32>, vector<16x16xf32>, vector<8x16xf32> -> vector<8x16xf32>
    %310 = vector.extract_strided_slice %289 {offsets = [0, 16], sizes = [8, 16], strides = [1, 1]} : vector<8x32xf32> to vector<8x16xf32>
    %311 = vector.extract_strided_slice %290 {offsets = [0, 16], sizes = [16, 16], strides = [1, 1]} : vector<16x32xf32> to vector<16x16xf32>
    %cst_98 = arith.constant dense<0.000000e+00> : vector<8x16xf32>
    %312 = tpu.matmul %310, %311, %cst_98 {dimension_numbers = #tpu.dot_dimension_numbers<[1], [1], [0], [0], [0, 0, 1, 0], [], []>} : vector<8x16xf32>, vector<16x16xf32>, vector<8x16xf32> -> vector<8x16xf32>
    %cst_99 = arith.constant 2.500000e-01 : f32
    %313 = vector.broadcast %cst_99 : f32 to vector<8x16xf32>
    %314 = arith.mulf %312, %313 : vector<8x16xf32>
    %315 = vector.broadcast %9 : vector<1x16xf32> to vector<8x16xf32>
    %316 = arith.addf %314, %315 : vector<8x16xf32>
    %cst_100 = arith.constant dense<0xFF800000> : vector<8xf32>
    %317 = vector.multi_reduction <maximumf>, %316, %cst_100 [1] : vector<8x16xf32> to vector<8xf32>
    %318 = vector.shape_cast %317 : vector<8xf32> to vector<8x1xf32>
    %319 = vector.broadcast %318 : vector<8x1xf32> to vector<8x16xf32>
    %320 = arith.subf %316, %319 : vector<8x16xf32>
    %321 = math.exp %320 : vector<8x16xf32>
    %cst_101 = arith.constant dense<0.000000e+00> : vector<8xf32>
    %322 = vector.multi_reduction <add>, %321, %cst_101 [1] : vector<8x16xf32> to vector<8xf32>
    %323 = vector.shape_cast %322 : vector<8xf32> to vector<8x1xf32>
    %324 = vector.broadcast %323 : vector<8x1xf32> to vector<8x16xf32>
    %325 = arith.divf %321, %324 : vector<8x16xf32>
    %326 = vector.extract_strided_slice %291 {offsets = [0, 16], sizes = [16, 16], strides = [1, 1]} : vector<16x32xf32> to vector<16x16xf32>
    %cst_102 = arith.constant dense<0.000000e+00> : vector<8x16xf32>
    %327 = tpu.matmul %325, %326, %cst_102 {dimension_numbers = #tpu.dot_dimension_numbers<[1], [0], [0], [1], [0, 0, 1, 1], [], []>} : vector<8x16xf32>, vector<16x16xf32>, vector<8x16xf32> -> vector<8x16xf32>
    %328 = tpu.concatenate %309, %327 in 1 : vector<8x16xf32>, vector<8x16xf32> -> vector<8x32xf32>
    %329 = vector.extract_strided_slice %283 {offsets = [8, 0], sizes = [8, 32], strides = [1, 1]} : vector<16x32xf32> to vector<8x32xf32>
    %330 = vector.extract_strided_slice %286 {offsets = [16, 0], sizes = [16, 32], strides = [1, 1]} : vector<32x32xf32> to vector<16x32xf32>
    %331 = vector.extract_strided_slice %287 {offsets = [16, 0], sizes = [16, 32], strides = [1, 1]} : vector<32x32xf32> to vector<16x32xf32>
    %332 = vector.extract_strided_slice %329 {offsets = [0, 0], sizes = [8, 16], strides = [1, 1]} : vector<8x32xf32> to vector<8x16xf32>
    %333 = vector.extract_strided_slice %330 {offsets = [0, 0], sizes = [16, 16], strides = [1, 1]} : vector<16x32xf32> to vector<16x16xf32>
    %cst_103 = arith.constant dense<0.000000e+00> : vector<8x16xf32>
    %334 = tpu.matmul %332, %333, %cst_103 {dimension_numbers = #tpu.dot_dimension_numbers<[1], [1], [0], [0], [0, 0, 1, 0], [], []>} : vector<8x16xf32>, vector<16x16xf32>, vector<8x16xf32> -> vector<8x16xf32>
    %cst_104 = arith.constant 2.500000e-01 : f32
    %335 = vector.broadcast %cst_104 : f32 to vector<8x16xf32>
    %336 = arith.mulf %334, %335 : vector<8x16xf32>
    %337 = vector.broadcast %17 : vector<1x16xf32> to vector<8x16xf32>
    %338 = arith.addf %336, %337 : vector<8x16xf32>
    %cst_105 = arith.constant dense<0xFF800000> : vector<8xf32>
    %339 = vector.multi_reduction <maximumf>, %338, %cst_105 [1] : vector<8x16xf32> to vector<8xf32>
    %340 = vector.shape_cast %339 : vector<8xf32> to vector<8x1xf32>
    %341 = vector.broadcast %340 : vector<8x1xf32> to vector<8x16xf32>
    %342 = arith.subf %338, %341 : vector<8x16xf32>
    %343 = math.exp %342 : vector<8x16xf32>
    %cst_106 = arith.constant dense<0.000000e+00> : vector<8xf32>
    %344 = vector.multi_reduction <add>, %343, %cst_106 [1] : vector<8x16xf32> to vector<8xf32>
    %345 = vector.shape_cast %344 : vector<8xf32> to vector<8x1xf32>
    %346 = vector.broadcast %345 : vector<8x1xf32> to vector<8x16xf32>
    %347 = arith.divf %343, %346 : vector<8x16xf32>
    %348 = vector.extract_strided_slice %331 {offsets = [0, 0], sizes = [16, 16], strides = [1, 1]} : vector<16x32xf32> to vector<16x16xf32>
    %cst_107 = arith.constant dense<0.000000e+00> : vector<8x16xf32>
    %349 = tpu.matmul %347, %348, %cst_107 {dimension_numbers = #tpu.dot_dimension_numbers<[1], [0], [0], [1], [0, 0, 1, 1], [], []>} : vector<8x16xf32>, vector<16x16xf32>, vector<8x16xf32> -> vector<8x16xf32>
    %350 = vector.extract_strided_slice %329 {offsets = [0, 16], sizes = [8, 16], strides = [1, 1]} : vector<8x32xf32> to vector<8x16xf32>
    %351 = vector.extract_strided_slice %330 {offsets = [0, 16], sizes = [16, 16], strides = [1, 1]} : vector<16x32xf32> to vector<16x16xf32>
    %cst_108 = arith.constant dense<0.000000e+00> : vector<8x16xf32>
    %352 = tpu.matmul %350, %351, %cst_108 {dimension_numbers = #tpu.dot_dimension_numbers<[1], [1], [0], [0], [0, 0, 1, 0], [], []>} : vector<8x16xf32>, vector<16x16xf32>, vector<8x16xf32> -> vector<8x16xf32>
    %cst_109 = arith.constant 2.500000e-01 : f32
    %353 = vector.broadcast %cst_109 : f32 to vector<8x16xf32>
    %354 = arith.mulf %352, %353 : vector<8x16xf32>
    %355 = vector.broadcast %17 : vector<1x16xf32> to vector<8x16xf32>
    %356 = arith.addf %354, %355 : vector<8x16xf32>
    %cst_110 = arith.constant dense<0xFF800000> : vector<8xf32>
    %357 = vector.multi_reduction <maximumf>, %356, %cst_110 [1] : vector<8x16xf32> to vector<8xf32>
    %358 = vector.shape_cast %357 : vector<8xf32> to vector<8x1xf32>
    %359 = vector.broadcast %358 : vector<8x1xf32> to vector<8x16xf32>
    %360 = arith.subf %356, %359 : vector<8x16xf32>
    %361 = math.exp %360 : vector<8x16xf32>
    %cst_111 = arith.constant dense<0.000000e+00> : vector<8xf32>
    %362 = vector.multi_reduction <add>, %361, %cst_111 [1] : vector<8x16xf32> to vector<8xf32>
    %363 = vector.shape_cast %362 : vector<8xf32> to vector<8x1xf32>
    %364 = vector.broadcast %363 : vector<8x1xf32> to vector<8x16xf32>
    %365 = arith.divf %361, %364 : vector<8x16xf32>
    %366 = vector.extract_strided_slice %331 {offsets = [0, 16], sizes = [16, 16], strides = [1, 1]} : vector<16x32xf32> to vector<16x16xf32>
    %cst_112 = arith.constant dense<0.000000e+00> : vector<8x16xf32>
    %367 = tpu.matmul %365, %366, %cst_112 {dimension_numbers = #tpu.dot_dimension_numbers<[1], [0], [0], [1], [0, 0, 1, 1], [], []>} : vector<8x16xf32>, vector<16x16xf32>, vector<8x16xf32> -> vector<8x16xf32>
    %368 = tpu.concatenate %349, %367 in 1 : vector<8x16xf32>, vector<8x16xf32> -> vector<8x32xf32>
    %369 = tpu.concatenate %328, %368 in 0 : vector<8x32xf32>, vector<8x32xf32> -> vector<16x32xf32>
    %cst_113 = arith.constant dense<0.000000e+00> : vector<16x32xf32>
    %370 = tpu.matmul %369, %288, %cst_113 {dimension_numbers = #tpu.dot_dimension_numbers<[1], [0], [0], [1], [0, 0, 1, 1], [], []>} : vector<16x32xf32>, vector<32x32xf32>, vector<16x32xf32> -> vector<16x32xf32>
    %371 = arith.addf %271, %370 : vector<16x32xf32>
    %372 = arith.mulf %371, %371 : vector<16x32xf32>
    %cst_114 = arith.constant dense<0.000000e+00> : vector<16xf32>
    %373 = vector.multi_reduction <add>, %372, %cst_114 [1] : vector<16x32xf32> to vector<16xf32>
    %374 = vector.shape_cast %373 : vector<16xf32> to vector<16x1xf32>
    %cst_115 = arith.constant 3.200000e+01 : f32
    %375 = vector.broadcast %cst_115 : f32 to vector<16x1xf32>
    %376 = arith.divf %374, %375 : vector<16x1xf32>
    %cst_116 = arith.constant 9.99999997E-7 : f32
    %377 = vector.broadcast %cst_116 : f32 to vector<16x1xf32>
    %378 = arith.addf %376, %377 : vector<16x1xf32>
    %379 = math.rsqrt %378 : vector<16x1xf32>
    %380 = vector.broadcast %379 : vector<16x1xf32> to vector<16x32xf32>
    %381 = arith.mulf %371, %380 : vector<16x32xf32>
    %c0_117 = arith.constant 0 : index
    %c512 = arith.constant 512 : index
    %382 = vector.load %arg4[%c0_117, %c512] : memref<32x640xf32, #tpu.memory_space<vmem>>, vector<32x64xf32>
    %cst_118 = arith.constant dense<0.000000e+00> : vector<16x64xf32>
    %383 = tpu.matmul %381, %382, %cst_118 {dimension_numbers = #tpu.dot_dimension_numbers<[1], [0], [0], [1], [0, 0, 1, 1], [], []>} : vector<16x32xf32>, vector<32x64xf32>, vector<16x64xf32> -> vector<16x64xf32>
    %384 = arith.mulf %383, %383 : vector<16x64xf32>
    %385 = arith.mulf %383, %384 : vector<16x64xf32>
    %cst_119 = arith.constant 4.471500e-02 : f32
    %386 = vector.broadcast %cst_119 : f32 to vector<16x64xf32>
    %387 = arith.mulf %386, %385 : vector<16x64xf32>
    %388 = arith.addf %383, %387 : vector<16x64xf32>
    %cst_120 = arith.constant 0.797884583 : f32
    %389 = vector.broadcast %cst_120 : f32 to vector<16x64xf32>
    %390 = arith.mulf %389, %388 : vector<16x64xf32>
    %391 = math.tanh %390 : vector<16x64xf32>
    %cst_121 = arith.constant 1.000000e+00 : f32
    %392 = vector.broadcast %cst_121 : f32 to vector<16x64xf32>
    %393 = arith.addf %392, %391 : vector<16x64xf32>
    %cst_122 = arith.constant 5.000000e-01 : f32
    %394 = vector.broadcast %cst_122 : f32 to vector<16x64xf32>
    %395 = arith.mulf %394, %393 : vector<16x64xf32>
    %396 = arith.mulf %383, %395 : vector<16x64xf32>
    %c0_123 = arith.constant 0 : index
    %c32_124 = arith.constant 32 : index
    %397 = vector.load %arg5[%c0_123, %c32_124] : memref<64x64xf32, #tpu.memory_space<vmem>>, vector<64x32xf32>
    %cst_125 = arith.constant dense<0.000000e+00> : vector<16x32xf32>
    %398 = tpu.matmul %396, %397, %cst_125 {dimension_numbers = #tpu.dot_dimension_numbers<[1], [0], [0], [1], [0, 0, 1, 1], [], []>} : vector<16x64xf32>, vector<64x32xf32>, vector<16x32xf32> -> vector<16x32xf32>
    %399 = arith.addf %371, %398 : vector<16x32xf32>
    %c0_126 = arith.constant 0 : index
    %c576 = arith.constant 576 : index
    %400 = vector.load %arg4[%c0_126, %c576] : memref<32x640xf32, #tpu.memory_space<vmem>>, vector<32x64xf32>
    %cst_127 = arith.constant dense<0.000000e+00> : vector<16x64xf32>
    %401 = tpu.matmul %399, %400, %cst_127 {dimension_numbers = #tpu.dot_dimension_numbers<[1], [0], [0], [1], [0, 0, 1, 1], [], []>} : vector<16x32xf32>, vector<32x64xf32>, vector<16x64xf32> -> vector<16x64xf32>
    %c0_128 = arith.constant 0 : index
    %c0_129 = arith.constant 0 : index
    %402 = vector.load %arg6[%c0_128, %c0_129] : memref<16x64xf32, #tpu.memory_space<vmem>>, vector<16x64xf32>
    tpu.vector_store %arg6[%c0_128, %c0_129], %401 {strides = array<i32>} : memref<16x64xf32, #tpu.memory_space<vmem>>, vector<16x64xf32>,
    return
  }
  func.func @transform_0(%arg0: i32, %arg1: memref<4xi32, #tpu.memory_space<smem>>) -> (i32, i32) {
    %c0_i32 = arith.constant 0 : i32
    %c0_i32_0 = arith.constant 0 : i32
    return %arg0, %c0_i32 : i32, i32
  }
  func.func @transform_1(%arg0: i32, %arg1: memref<4xi32, #tpu.memory_space<smem>>) -> (i32, i32) {
    %c0_i32 = arith.constant 0 : i32
    %c0_i32_0 = arith.constant 0 : i32
    return %arg0, %c0_i32 : i32, i32
  }
  func.func @transform_2(%arg0: i32, %arg1: memref<4xi32, #tpu.memory_space<smem>>) -> (i32, i32) {
    %c0_i32 = arith.constant 0 : i32
    %c0_i32_0 = arith.constant 0 : i32
    %c0_i32_1 = arith.constant 0 : i32
    return %c0_i32, %c0_i32_0 : i32, i32
  }
  func.func @transform_3(%arg0: i32, %arg1: memref<4xi32, #tpu.memory_space<smem>>) -> (i32, i32) {
    %c0_i32 = arith.constant 0 : i32
    %c0_i32_0 = arith.constant 0 : i32
    %c0_i32_1 = arith.constant 0 : i32
    return %c0_i32, %c0_i32_0 : i32, i32
  }
  func.func @transform_4(%arg0: i32, %arg1: memref<4xi32, #tpu.memory_space<smem>>) -> (i32, i32) {
    %c0_i32 = arith.constant 0 : i32
    %c0_i32_0 = arith.constant 0 : i32
    return %arg0, %c0_i32 : i32, i32
  }
}

</mosaic_0001>

<bundles_post_ra>
// kernel: forward.1
= control target key start
LH: loop header
LB: loop body
LE: loop exit
PB: predicated region body
PF: predicated region fallthrough
CT: control target
= control target key end

     0   :  { %s3013_s21 = smov [#allocation3]   ;;  %s3837_s0 = inlined_call_operand.vmem [shape: s32[4], index: 0, kind: input, shape index: {}]   ;;  %s3838_s1 = inlined_call_operand.vmem [shape: f32[64,32], index: 1, kind: input, shape index: {}]   ;;  %s3839_s2 = inlined_call_operand.vmem [shape: f32[32,32], index: 2, kind: input, shape index: {}]   ;;  %s3840_s3 = inlined_call_operand.vmem [shape: f32[32,640], index: 3, kind: input, shape index: {}]   ;;  %s3841_s4 = inlined_call_operand.vmem [shape: f32[64,64], index: 4, kind: input, shape index: {}]   ;;  %s3842_s5 = inlined_call_operand.vmem [shape: f32[32,64], index: 5, kind: output, shape index: {}]  }
   0x1   :  { %s11_s20 = sshll.u32 %s3837_s0, 4  ;;  %s12_s20 = int_to_ptr.vmem [resolvable:$true] %s11_s20 }
   0x2   :  { %14 = dma.vmem_to_smem %s12_s20, 16, %s3013_s21, [#allocation2] }
   0x3   :  { %3007 = dma.done.wait [#allocation2], 16 }
   0x4   :  { %3008 = vsyncadd [#allocation2], 4294967280 }
   0x5   :  { %17 = sfence }
   0x6   :  { %s3056_s22 = smov 0  }
   0x7 LB: > { %s2609_s23 = sadd.s32 4294967295, %s3011_s22   ;;  %p2613_p0 = scmp.ge.s32.totalorder %s3011_s22, 1  ;;  %s3011_s22 = sphi %s3056_s22, %s23_s22  }
   0x8   : > { %p183_p1 = scmp.lt.s32.totalorder %s3011_s22, 3 }
   0xa   : > { %p184_p2 = pnand %p2613_p0, %p183_p1 }
   0xb   : > { %s2614_s0 = sshll.u32 (!%p184_p2), %s2609_s23, 2  ;;  %s3015_s7 = smov (!%p184_p2), 64  }
   0xc   : > { %187 = sbr.rel (%p184_p2) target bundleno = 4872 (0x1308), region = 36  ;;  %p215_p3 = scmp.lt.s32.totalorder (!%p184_p2), %s2614_s0, 7 }
   0xd   : > { %s3016_s20 = smov (!%p184_p2), 80   ;;  %s3017_s21 = smov (!%p184_p2), 96  }
   0xe   : > { %s3020_s30 = smov (!%p184_p2), 48   ;;  %s3021_s9 = smov (!%p184_p2), 16  }
   0xf   : > { %s3022_s17 = smov (!%p184_p2), 32  }
  0x11   : > { %s3844_s0 = smov (!%p215_p3, %s2614_s0), 7  ;;  %vm258_vm0 = vcmask 261120   ;;  %v3014_v6 = vmov 32.0   ;;  %v3082_v8 = vld [vmem:[%s3840_s3 + $0x78] sm:$0xff]  ;;  %v3087_v9 = vld [vmem:[%s3840_s3 + $0x80] sm:$0xff]  ;;  %v3101_v14 = vld [vmem:[%s3840_s3 + $0x50] sm:$0xff] }
  0x12   : > { %s2615_s24 = sshll.u32 %s3844_s0, 3  ;;  %2873 = vrcp.f32 %v3014_v6  ;;  %v2733_v10 = vpack.i.bf16 %v3087_v9, %v3082_v8  ;;  %358 = vmatpush.msra.mxu0 %v3082_v8  ;;  %v3096_v13 = vld [vmem:[%s3840_s3 + $0x58] sm:$0xff]  ;;  %v3109_v16 = vld [vmem:[%s3840_s3 + $0x28] sm:$0xff]  ;;  %v3116_v18 = vld [vmem:[%s3840_s3] sm:$0xff]  ;;  %v2753_v21 = vpack.i.bf16 %v3101_v14, %v3082_v8  ;;  %vm554_vm8 = vcmask 523264   ;;  %s3018_s0 = smov 112  }
  0x13   : > { %s3069_s27 = scalar_lea.vmem %s3838_s1, %s2615_s24  ;;  %v2738_v15 = vpack.i.bf16 %v3096_v13, %v3101_v14  ;;  %v2783_v20 = vpack.i.bf16 %v3096_v13, %v3087_v9  ;;  %v3126_v22 = vld [vmem:[%s3840_s3 + $0x30] sm:$0xff]  ;;  %s3239_s24 = sshll.u32 %s2609_s23, 1 }
  0x14   : > { %v248_v0 = vld [vmem:[%s3069_s27] sm:$0xff]  ;;  %v3073_v2 = vld [vmem:[%s3069_s27 + $0x8] sm:$0xff]  ;;  %2734 = vrot.lane.b32.xlu2 %v2733_v10, %s3015_s7  ;;  %359 = vmatpush.msra.mxu0 %v3101_v14  ;;  %v2743_v23 = vpack.i.bf16 %v3126_v22, %v3109_v16  ;;  %v250_v39 = vld [vmem:[%s3069_s27 + $0x10] sm:$0xff]  ;;  %p221_p4 = scmp.lt.s32.totalorder %s3239_s24, 3  ;;  %s235_s29 = sld [smem:[#allocation3 + %s3239_s24]] }
  0x15   : > { %v254_v1 = vmul.f32 %v248_v0, %v248_v0  ;;  %v255_v4 = vmul.f32 %v3073_v2, %v3073_v2  ;;  %v256_v44 = vmul.f32 %v250_v39, %v250_v39  ;;  %v251_v48 = vld [vmem:[%s3069_s27 + $0x18] sm:$0xff]  ;;  %s239_s6 = sadd.s32 1, %s3239_s24 }
  0x16   : > { %360 = vmatpush.msra.mxu0 %v3109_v16  ;;  %v257_v51 = vmul.f32 %v251_v48, %v251_v48  ;;  %s3243_s25 = scalar_select %p221_p4, %s3239_s24, 3 }
  0x17   : > { %v259_v3 = vsel %vm258_vm0, %v254_v1, 0.0  ;;  %v262_v5 = vsel %vm258_vm0, %v255_v4, 0.0  ;;  %v265_v47 = vsel %vm258_vm0, %v256_v44, 0.0  ;;  %s240_s8 = sld [smem:[#allocation3 + %s239_s6]] }
  0x18   : > { %260 = vadd.xlane.f32.xlu0 %v259_v3  ;;  %v2874_v7 = vpop.eup %2873  ;;  %361 = vmatpush.msra.mxu0 %v3116_v18  ;;  %v268_v52 = vsel %vm258_vm0, %v257_v51, 0.0  ;;  %s2617_s26 = sshll.u32 %s3243_s25, 3 }
  0x19   : > { %v272_v11 = vmul.f32 32.0, %v2874_v7  ;;  %vm276_vm1 = vweird.f32 %v2874_v7  ;;  %s3252_s28 = scalar_lea.vmem %s3839_s2, %s2617_s26  ;;  %s230_s13 = scalar_lea.vmem %s3842_s5, %s2617_s26 }
  0x1b   : > { %v273_v12 = vsub.f32 1.0, %v272_v11 }
  0x1c   : > { %2739 = vrot.lane.b32.xlu2 %v2738_v15, %s3015_s7 }
  0x1d   : > { %v274_v17 = vmul.f32 %v2874_v7, %v273_v12 }
  0x1f   : > { %v275_v19 = vadd.f32 %v2874_v7, %v274_v17 }
  0x20   : > { %263 = vadd.xlane.f32.xlu0 %v262_v5 }
  0x21   : > { %v3131_v24 = vsel %vm276_vm1, %v2874_v7, %v275_v19 }
  0x34   : > { %2744 = vrot.lane.b32.xlu0 %v2743_v23, %s3015_s7 }
  0x45   : > { %266 = vadd.xlane.f32.xlu2 %v265_v47 }
  0x5e   : > { %269 = vadd.xlane.f32.xlu0 %v268_v52 }
  0x6e   : > { %v3142_v53 = vpop.permute.xlu2 %2734 }
  0x6f   : > { %v2737_v61 = vunpack.i.h.bf16 %v3142_v53  ;;  %v2736_v62 = vunpack.i.l.bf16 %v3142_v53 }
  0x76   : > { %v3144_v54 = vpop.permute.xlu2 %2739 }
  0x8b   : > { %v261_v25 = vpop.xlane.xlu0 %260 }
  0x8c   : > { %v278_v26 = vmul.f32 %v3131_v24, %v261_v25 }
  0x8e   : > { %v282_v27 = vadd.f32 1e-06, %v278_v26 }
  0x90   : > { %2875 = vrsqrt.f32 %v282_v27  ;;  %vm292_vm3 = vweird.f32 %v282_v27 }
  0x93   : > { %v264_v28 = vpop.xlane.xlu0 %263 }
  0x94   : > { %v279_v29 = vmul.f32 %v3131_v24, %v264_v28 }
  0x96   : > { %v2876_v30 = vpop.eup %2875  ;;  %v283_v31 = vadd.f32 1e-06, %v279_v29 }
  0x97   : > { %v287_v32 = vmul.f32 %v2876_v30, %v282_v27  ;;  %vm293_vm2 = vweird.f32 %v2876_v30 }
  0x98   : > { %2877 = vrsqrt.f32 %v283_v31  ;;  %vm294_vm4 = vmor %vm292_vm3, %vm293_vm2  ;;  %vm302_vm6 = vweird.f32 %v283_v31 }
  0x99   : > { %v288_v33 = vmul.f32 %v2876_v30, %v287_v32 }
  0x9b   : > { %v289_v34 = vmul.f32 0.5, %v288_v33  ;;  %v3170_v33 = vld [vmem:[%s3840_s3 + $0x8] sm:$0xff] }
  0x9d   : > { %v290_v35 = vsub.f32 1.5, %v289_v34  ;;  %v2748_v34 = vpack.i.bf16 %v3170_v33, %v3116_v18 }
  0x9e   : > { %v2878_v36 = vpop.eup %2877 }
  0x9f   : > { %v297_v37 = vmul.f32 %v2878_v36, %v283_v31  ;;  %v291_v38 = vmul.f32 %v2876_v30, %v290_v35  ;;  %vm303_vm5 = vweird.f32 %v2878_v36  ;;  %v2742_v35 = vunpack.i.h.bf16 %v3144_v54 }
  0xa0   : > { %vm304_vm7 = vmor %vm302_vm6, %vm303_vm5  ;;  %vm610_vm6 = vcmask 130048  }
  0xa1   : > { %v298_v40 = vmul.f32 %v2878_v36, %v297_v37  ;;  %v295_v41 = vsel %vm294_vm4, %v2876_v30, %v291_v38 }
  0xa2   : > { %v326_v42 = vmul.f32 %v295_v41, %v248_v0 }
  0xa3   : > { %v299_v43 = vmul.f32 0.5, %v298_v40 }
  0xa4   : > { %2621 = vmatmul.msk.f32.vlgmr.msra.gmra.mxu0 %vm258_vm0, %v326_v42 }
  0xa5   : > { %v300_v45 = vsub.f32 1.5, %v299_v43 }
  0xa6   : > { %v3146_v55 = vpop.permute.xlu0 %2744 }
  0xa7   : > { %v301_v46 = vmul.f32 %v2878_v36, %v300_v45  ;;  %v2747_v38 = vunpack.i.h.bf16 %v3146_v55 }
  0xa9   : > { %v305_v49 = vsel %vm304_vm7, %v2878_v36, %v301_v46  ;;  %v2741_v36 = vunpack.i.l.bf16 %v3144_v54 }
  0xaa   : > { %v327_v50 = vmul.f32 %v305_v49, %v3073_v2  ;;  %v558_v2 = vsel %vm554_vm8, %v2736_v62, %v2737_v61 }
  0xab   : > { %587 = vmatpush.msra.mxu2 %v558_v2  ;;  %v557_v37 = vsel %vm554_vm8, %v2741_v36, %v2742_v35 }
  0xac   : > { %2622 = vmatmul.msk.f32.gmra.mxu0 %vm258_vm0, %v327_v50 }
  0xad   : > { %588 = vmatpush.msra.mxu2 %v557_v37 }
  0xb8   : > { %v267_v56 = vpop.xlane.xlu2 %266 }
  0xb9   : > { %v280_v57 = vmul.f32 %v3131_v24, %v267_v56 }
  0xbb   : > { %v284_v58 = vadd.f32 1e-06, %v280_v57 }
  0xbd   : > { %2879 = vrsqrt.f32 %v284_v58  ;;  %vm312_vm9 = vweird.f32 %v284_v58 }
  0xc3   : > { %v2880_v3 = vpop.eup %2879 }
  0xc4   : > { %v307_v6 = vmul.f32 %v2880_v3, %v284_v58  ;;  %vm313_vm10 = vweird.f32 %v2880_v3 }
  0xc5   : > { %vm314_vm11 = vmor %vm312_vm9, %vm313_vm10 }
  0xc6   : > { %v308_v10 = vmul.f32 %v2880_v3, %v307_v6 }
  0xc8   : > { %v309_v12 = vmul.f32 0.5, %v308_v10 }
  0xca   : > { %v310_v15 = vsub.f32 1.5, %v309_v12 }
  0xcc   : > { %v311_v23 = vmul.f32 %v2880_v3, %v310_v15 }
  0xce   : > { %v315_v26 = vsel %vm314_vm11, %v2880_v3, %v311_v23 }
  0xcf   : > { %v328_v27 = vmul.f32 %v315_v26, %v250_v39  ;;  %v2746_v39 = vunpack.i.l.bf16 %v3146_v55 }
  0xd1   : > { %v270_v0 = vpop.xlane.xlu0 %269  ;;  %2623 = vmatmul.msk.f32.gmra.mxu0 %vm258_vm0, %v328_v27  ;;  %v556_v42 = vsel %vm554_vm8, %v2746_v39, %v2747_v38  ;;  %v3255_v39 = vld [vmem:[%s3252_s28 + $0x8] sm:$0xff] }
  0xd2   : > { %v281_v1 = vmul.f32 %v3131_v24, %v270_v0  ;;  %589 = vmatpush.msra.mxu2 %v556_v42 }
  0xd4   : > { %v285_v4 = vadd.f32 1e-06, %v281_v1 }
  0xd6   : > { %2881 = vrsqrt.f32 %v285_v4  ;;  %vm322_vm12 = vweird.f32 %v285_v4 }
  0xdc   : > { %v2882_v17 = vpop.eup %2881 }
  0xdd   : > { %v317_v19 = vmul.f32 %v2882_v17, %v285_v4  ;;  %vm323_vm13 = vweird.f32 %v2882_v17 }
  0xde   : > { %vm324_vm14 = vmor %vm322_vm12, %vm323_vm13 }
  0xdf   : > { %v318_v25 = vmul.f32 %v2882_v17, %v317_v19 }
  0xe1   : > { %v319_v28 = vmul.f32 0.5, %v318_v25 }
  0xe3   : > { %v320_v29 = vsub.f32 1.5, %v319_v28 }
  0xe5   : > { %v321_v30 = vmul.f32 %v2882_v17, %v320_v29 }
  0xe7   : > { %v325_v31 = vsel %vm324_vm14, %v2882_v17, %v321_v30 }
  0xe8   : > { %v329_v32 = vmul.f32 %v325_v31, %v251_v48 }
  0xea   : > { %2624 = vmatmul.msk.f32.gmra.mxu0 %vm258_vm0, %v329_v32 }
 0x121   : > { %v3149_v59 = vpop.f32.mrf.mxu0 }
 0x122   : > { %v454_v60 = vmul.f32 %v3149_v59, %v3149_v59 }
 0x124   : > { %v458_v63 = vsel %vm258_vm0, %v454_v60, 0.0 }
 0x125   : > { %459 = vadd.xlane.f32.xlu1 %v458_v63 }
 0x129   : > { %v3160_v5 = vpop.f32.mrf.mxu0 }
 0x12a   : > { %v455_v7 = vmul.f32 %v3160_v5, %v3160_v5 }
 0x12c   : > { %v461_v11 = vsel %vm258_vm0, %v455_v7, 0.0 }
 0x12d   : > { %462 = vadd.xlane.f32.xlu1 %v461_v11 }
 0x146   : > { %2749 = vrot.lane.b32.xlu1 %v2748_v34, %s3015_s7 }
 0x14e   : > { %v3187_v58 = vpop.f32.mrf.mxu0 }
 0x14f   : > { %v456_v25 = vmul.f32 %v3187_v58, %v3187_v58 }
 0x151   : > { %v464_v26 = vsel %vm258_vm0, %v456_v25, 0.0 }
 0x167   : > { %v3197_v7 = vpop.f32.mrf.mxu0 }
 0x168   : > { %v457_v11 = vmul.f32 %v3197_v7, %v3197_v7 }
 0x16a   : > { %v467_v12 = vsel %vm258_vm0, %v457_v11, 0.0 }
 0x16b   : > { %468 = vadd.xlane.f32.xlu2 %v467_v12  ;;  %v236_v12 = vstv %s235_s29 }
 0x198   : > { %v460_v40 = vpop.xlane.xlu1 %459 }
 0x199   : > { %v470_v41 = vmul.f32 %v460_v40, %v3131_v24  ;;  %v376_v40 = vmul.f32 %v3255_v39, %v3255_v39 }
 0x19b   : > { %v474_v43 = vadd.f32 1e-06, %v470_v41 }
 0x19d   : > { %2883 = vrsqrt.f32 %v474_v43  ;;  %vm484_vm1 = vweird.f32 %v474_v43 }
 0x1a0   : > { %v463_v44 = vpop.xlane.xlu1 %462 }
 0x1a1   : > { %v471_v45 = vmul.f32 %v463_v44, %v3131_v24  ;;  %v380_v44 = vsel %vm258_vm0, %v376_v40, 0.0 }
 0x1a3   : > { %v2884_v46 = vpop.eup %2883  ;;  %v475_v47 = vadd.f32 1e-06, %v471_v45 }
 0x1a4   : > { %v479_v48 = vmul.f32 %v2884_v46, %v474_v43  ;;  %vm485_vm15 = vweird.f32 %v2884_v46 }
 0x1a5   : > { %2885 = vrsqrt.f32 %v475_v47  ;;  %vm486_vm2 = vmor %vm484_vm1, %vm485_vm15  ;;  %vm494_vm4 = vweird.f32 %v475_v47 }
 0x1a6   : > { %v480_v49 = vmul.f32 %v2884_v46, %v479_v48 }
 0x1a8   : > { %v481_v51 = vmul.f32 0.5, %v480_v49 }
 0x1aa   : > { %v482_v56 = vsub.f32 1.5, %v481_v51 }
 0x1ab   : > { %v2886_v50 = vpop.eup %2885 }
 0x1ac   : > { %v489_v52 = vmul.f32 %v2886_v50, %v475_v47  ;;  %v483_v62 = vmul.f32 %v2884_v46, %v482_v56  ;;  %vm495_vm3 = vweird.f32 %v2886_v50 }
 0x1ad   : > { %vm496_vm5 = vmor %vm494_vm4, %vm495_vm3 }
 0x1ae   : > { %v490_v57 = vmul.f32 %v2886_v50, %v489_v52  ;;  %v487_v1 = vsel %vm486_vm2, %v2884_v46, %v483_v62 }
 0x1af   : > { %v518_v6 = vmul.f32 %v487_v1, %v3149_v59 }
 0x1b0   : > { %v491_v60 = vmul.f32 0.5, %v490_v57 }
 0x1b2   : > { %v492_v63 = vsub.f32 1.5, %v491_v60 }
 0x1b4   : > { %v493_v10 = vmul.f32 %v2886_v50, %v492_v63 }
 0x1b6   : > { %v497_v15 = vsel %vm496_vm5, %v2886_v50, %v493_v10  ;;  %v233_v10 = vlaneseq }
 0x1b7   : > { %v519_v17 = vmul.f32 %v497_v15, %v3160_v5 }
 0x1b8   : > { %v3189_v0 = vpop.permute.xlu1 %2749  ;;  %v3274_v11 = vand.u32 127, %v233_v10 }
 0x1b9   : > { %v2752_v2 = vunpack.i.h.bf16 %v3189_v0  ;;  %v2751_v3 = vunpack.i.l.bf16 %v3189_v0 }
 0x1ba   : > { %vm237_vm14 = vcmp.lt.s32.totalorder %v3274_v11, %v236_v12 }
 0x1bb   : > { %v555_v4 = vsel %vm554_vm8, %v2751_v3, %v2752_v2  ;;  %v3267_v3 = vld [vmem:[%s3252_s28] sm:$0xff] }
 0x1bc   : > { %590 = vmatpush.msra.mxu2 %v555_v4  ;;  %v375_v4 = vmul.f32 %v3267_v3, %v3267_v3 }
 0x1bd   : > { %2627 = vmatmul.msk.f32.vlgmr.msra.gmra.mxu2 %vm258_vm0, %v518_v6 }
 0x1be   : > { %v377_v6 = vsel %vm258_vm0, %v375_v4, 0.0 }
 0x1c5   : > { %2628 = vmatmul.msk.f32.gmra.mxu2 %vm258_vm0, %v519_v17  ;;  %v3019_v17 = vmov -1e+30  }
 0x1c6   : > { %v3278_v25 = vsel %vm237_vm14, 0.0, %v3019_v17 }
 0x1de   : > { %v469_v29 = vpop.xlane.xlu2 %468 }
 0x1df   : > { %v473_v14 = vmul.f32 %v469_v29, %v3131_v24 }
 0x240   : > { %v3205_v19 = vpop.f32.mrf.mxu2 }
 0x241   : > { %733 = vrot.lane.b32.xlu2 %v3205_v19, %s3016_s20  ;;  %606 = vrot.lane.b32.xlu1 %v3205_v19, %s3017_s21 }
 0x248   : > { %v3211_v23 = vpop.f32.mrf.mxu2 }
 0x249   : > { %735 = vrot.lane.b32.xlu0 %v3211_v23, %s3016_s20  ;;  %608 = vrot.lane.b32.xlu1 %v3211_v23, %s3017_s21 }
 0x26a   : > { %381 = vadd.xlane.f32.xlu2 %v380_v44 }
 0x273   : > { %465 = vadd.xlane.f32.xlu1 %v464_v26  ;;  %378 = vadd.xlane.f32.xlu0 %v377_v6 }
 0x28c   : > { %729 = vrot.lane.b32.xlu1 %v3205_v19, %s3018_s0 }
 0x294   : > { %2754 = vrot.lane.b32.xlu1 %v2753_v21, %s3017_s21  ;;  %v477_v21 = vadd.f32 1e-06, %v473_v14 }
 0x296   : > { %2887 = vrsqrt.f32 %v477_v21  ;;  %vm514_vm11 = vweird.f32 %v477_v21 }
 0x29b   : > { %v734_v8 = vpop.permute.xlu2 %733 }
 0x29c   : > { %731 = vrot.lane.b32.xlu1 %v3211_v23, %s3018_s0  ;;  %v2888_v36 = vpop.eup %2887 }
 0x29d   : > { %v509_v37 = vmul.f32 %v2888_v36, %v477_v21  ;;  %vm515_vm12 = vweird.f32 %v2888_v36 }
 0x29e   : > { %vm516_vm13 = vmor %vm514_vm11, %vm515_vm12 }
 0x29f   : > { %v510_v42 = vmul.f32 %v2888_v36, %v509_v37 }
 0x2a1   : > { %v511_v46 = vmul.f32 0.5, %v510_v42 }
 0x2a3   : > { %v512_v49 = vsub.f32 1.5, %v511_v46 }
 0x2a5   : > { %v513_v57 = vmul.f32 %v2888_v36, %v512_v49 }
 0x2a7   : > { %v517_v60 = vsel %vm516_vm13, %v2888_v36, %v513_v57 }
 0x2a8   : > { %v521_v62 = vmul.f32 %v517_v60, %v3197_v7 }
 0x2b3   : > { %v607_v27 = vpop.permute.xlu1 %606 }
 0x2bb   : > { %v609_v28 = vpop.permute.xlu1 %608  ;;  %v736_v30 = vpop.permute.xlu0 %735 }
 0x2bc   : > { %2631 = vmatpush.xpose.msk.msra.mxu3 %vm610_vm6, %v609_v28 }
 0x2c0   : > { %2632 = vmatpush.xpose.msk.msra.mxu3 %vm610_vm6, %v607_v27 }
 0x2c3   : > { %2633 = vmatmul.msk.f32.vlgmr.msra.gmra.mxu3 %vm610_vm6, %v3205_v19 }
 0x2c4   : > { %2637 = vmatpush.xpose.msk.msrb.mxu3 %vm610_vm6, %v736_v30 }
 0x2c8   : > { %2638 = vmatpush.xpose.msk.msrb.mxu3 %vm610_vm6, %v734_v8 }
 0x2cb   : > { %2634 = vmatmul.msk.f32.gmra.mxu3 %vm610_vm6, %v3211_v23 }
 0x2e6   : > { %v466_v31 = vpop.xlane.xlu1 %465 }
 0x2e7   : > { %v472_v32 = vmul.f32 %v466_v31, %v3131_v24  ;;  %v2758_v31 = vpack.i.bf16 %v3116_v18, %v3109_v16  ;;  %v382_v16 = vpop.xlane.xlu2 %381 }
 0x2e9   : > { %v476_v34 = vadd.f32 1e-06, %v472_v32 }
 0x2eb   : > { %2889 = vrsqrt.f32 %v476_v34  ;;  %vm504_vm9 = vweird.f32 %v476_v34 }
 0x2f1   : > { %v2890_v41 = vpop.eup %2889 }
 0x2f2   : > { %v499_v43 = vmul.f32 %v2890_v41, %v476_v34  ;;  %vm505_vm7 = vweird.f32 %v2890_v41  ;;  %v3301_v34 = vpack.i.bf16 %v3205_v19, %v3211_v23 }
 0x2f3   : > { %vm506_vm10 = vmor %vm504_vm9, %vm505_vm7 }
 0x2f4   : > { %v500_v45 = vmul.f32 %v2890_v41, %v499_v43 }
 0x2f6   : > { %v501_v47 = vmul.f32 0.5, %v500_v45 }
 0x2f8   : > { %v502_v48 = vsub.f32 1.5, %v501_v47 }
 0x2fa   : > { %v503_v50 = vmul.f32 %v2890_v41, %v502_v48 }
 0x2fc   : > { %v507_v51 = vsel %vm506_vm10, %v2890_v41, %v503_v50 }
 0x2fd   : > { %v520_v52 = vmul.f32 %v507_v51, %v3187_v58 }
 0x2fe   : > { %v730_v56 = vpop.permute.xlu1 %729 }
 0x2ff   : > { %2629 = vmatmul.msk.f32.gmra.mxu2 %vm258_vm0, %v520_v52  ;;  %2639 = vmatmul.msk.f32.vlgmr.msrb.gmra.mxu3 %vm610_vm6, %v730_v56  ;;  %v379_v56 = vpop.xlane.xlu0 %378 }
 0x300   : > { %v383_v60 = vmul.f32 %v379_v56, %v3131_v24 }
 0x306   : > { %v2755_v63 = vpop.permute.xlu1 %2754 }
 0x307   : > { %2630 = vmatmul.msk.f32.gmra.mxu2 %vm258_vm0, %v521_v62  ;;  %v2756_v42 = vunpack.i.l.bf16 %v2755_v63  ;;  %v2757_v43 = vunpack.i.h.bf16 %v2755_v63  ;;  %v385_v63 = vadd.f32 1e-06, %v383_v60 }
 0x309   : > { %443 = vmatpush.msra.mxu1 %v2756_v42  ;;  %vm393_vm15 = vweird.f32 %v385_v63 }
 0x30b   : > { %444 = vmatpush.msra.mxu1 %v2757_v43 }
 0x30e   : > { %v732_v1 = vpop.permute.xlu1 %731 }
 0x30f   : > { %2640 = vmatmul.msk.f32.gmra.mxu3 %vm610_vm6, %v732_v1  ;;  %v384_v1 = vmul.f32 %v382_v16, %v3131_v24 }
 0x311   : > { %v386_v4 = vadd.f32 1e-06, %v384_v1 }
 0x313   : > { %vm403_vm3 = vweird.f32 %v386_v4 }
 0x346   : > { %v636_v15 = vpop.f32.mrf.mxu3 }
 0x347   : > { %v642_v26 = vmul.f32 0.25, %v636_v15 }
 0x349   : > { %v644_v27 = vadd.f32 %v642_v26, %v3278_v25 }
 0x34b   : > { %v646_v28 = vsel %vm610_vm6, %v644_v27, -inf }
 0x34c   : > { %647 = vmax.xlane.f32.xlu2 %v646_v28 }
 0x34e   : > { %v639_v29 = vpop.f32.mrf.mxu3 }
 0x34f   : > { %v643_v30 = vmul.f32 0.25, %v639_v29 }
 0x351   : > { %v645_v8 = vadd.f32 %v643_v30, %v3278_v25 }
 0x353   : > { %v649_v14 = vsel %vm610_vm6, %v645_v8, -inf }
 0x354   : > { %650 = vmax.xlane.f32.xlu2 %v649_v14 }
 0x382   : > { %v3284_v21 = vpop.f32.mrf.mxu2  ;;  %v762_v37 = vpop.f32.mrf.mxu3 }
 0x383   : > { %989 = vrot.lane.b32.xlu2 %v3284_v21, %s3018_s0  ;;  %993 = vrot.lane.b32.xlu0 %v3284_v21, %s3016_s20  ;;  %v768_v41 = vmul.f32 0.25, %v762_v37 }
 0x385   : > { %v3308_v19 = vadd.f32 %v768_v41, %v3278_v25 }
 0x387   : > { %v772_v48 = vsel %vm610_vm6, %v3308_v19, -inf }
 0x38a   : > { %v3292_v32 = vpop.f32.mrf.mxu2 }
 0x38b   : > { %2759 = vrot.lane.b32.xlu0 %v2758_v31, %s3017_s21  ;;  %995 = vrot.lane.b32.xlu1 %v3292_v32, %s3016_s20 }
 0x392   : > { %v765_v49 = vpop.f32.mrf.mxu3 }
 0x393   : > { %991 = vrot.lane.b32.xlu0 %v3292_v32, %s3018_s0  ;;  %v769_v51 = vmul.f32 0.25, %v765_v49 }
 0x395   : > { %v3321_v57 = vadd.f32 %v769_v51, %v3278_v25 }
 0x397   : > { %v775_v62 = vsel %vm610_vm6, %v3321_v57, -inf }
 0x39b   : > { %2764 = vrot.lane.b32.xlu0 %v3301_v34, %s3015_s7 }
 0x3a3   : > { %869 = vrot.lane.b32.xlu0 %v3292_v32, %s3017_s21 }
 0x3bf   : > { %v648_v18 = vpop.xlane.xlu2 %647 }
 0x3c0   : > { %v652_v36 = vsub.f32 %v644_v27, %v648_v18 }
 0x3c2   : > { %v654_v40 = vmul.f32 1.442695, %v652_v36 }
 0x3c4   : > { %2891 = vpow2.f32 %v654_v40 }
 0x3c7   : > { %v651_v44 = vpop.xlane.xlu2 %650 }
 0x3c8   : > { %v653_v45 = vsub.f32 %v645_v8, %v651_v44 }
 0x3ca   : > { %v3310_v23 = vpop.eup %2891  ;;  %v656_v46 = vmul.f32 1.442695, %v653_v45 }
 0x3cb   : > { %v658_v47 = vsel %vm610_vm6, %v3310_v23, 0.0 }
 0x3cc   : > { %2893 = vpow2.f32 %v656_v46  ;;  %659 = vadd.xlane.f32.xlu1 %v658_v47 }
 0x3cd   : > { %773 = vmax.xlane.f32.xlu0 %v772_v48  ;;  %2895 = vrsqrt.f32 %v385_v63 }
 0x3ce   : > { %2897 = vrsqrt.f32 %v386_v4 }
 0x3d2   : > { %v3316_v50 = vpop.eup %2893 }
 0x3d3   : > { %v661_v52 = vsel %vm610_vm6, %v3316_v50, 0.0  ;;  %v2896_v6 = vpop.eup %2895 }
 0x3d4   : > { %662 = vadd.xlane.f32.xlu2 %v661_v52  ;;  %v388_v12 = vmul.f32 %v2896_v6, %v385_v63  ;;  %v2898_v26 = vpop.eup %2897  ;;  %vm394_vm1 = vweird.f32 %v2896_v6 }
 0x3d5   : > { %v398_v27 = vmul.f32 %v2898_v26, %v386_v4  ;;  %vm395_vm2 = vmor %vm393_vm15, %vm394_vm1  ;;  %vm404_vm4 = vweird.f32 %v2898_v26 }
 0x3d6   : > { %v389_v15 = vmul.f32 %v2896_v6, %v388_v12  ;;  %vm405_vm5 = vmor %vm403_vm3, %vm404_vm4 }
 0x3d7   : > { %v399_v30 = vmul.f32 %v2898_v26, %v398_v27 }
 0x3d8   : > { %v390_v28 = vmul.f32 0.5, %v389_v15 }
 0x3d9   : > { %v400_v14 = vmul.f32 0.5, %v399_v30 }
 0x3da   : > { %v391_v8 = vsub.f32 1.5, %v390_v28 }
 0x3db   : > { %v401_v36 = vsub.f32 1.5, %v400_v14 }
 0x3dc   : > { %776 = vmax.xlane.f32.xlu2 %v775_v62  ;;  %v392_v31 = vmul.f32 %v2896_v6, %v391_v8 }
 0x3dd   : > { %v402_v43 = vmul.f32 %v2898_v26, %v401_v36  ;;  %v990_v44 = vpop.permute.xlu2 %989 }
 0x3de   : > { %v396_v41 = vsel %vm395_vm2, %v2896_v6, %v392_v31 }
 0x3df   : > { %v407_v42 = vmul.f32 %v396_v41, %v3267_v3  ;;  %v406_v46 = vsel %vm405_vm5, %v2898_v26, %v402_v43 }
 0x3e0   : > { %v408_v47 = vmul.f32 %v406_v46, %v3255_v39 }
 0x3e5   : > { %867 = vrot.lane.b32.xlu1 %v3284_v21, %s3017_s21 }
 0x3f5   : > { %v994_v29 = vpop.permute.xlu0 %993 }
 0x3fd   : > { %v2760_v16 = vpop.permute.xlu0 %2759  ;;  %v996_v18 = vpop.permute.xlu1 %995 }
 0x3fe   : > { %2649 = vmatpush.xpose.msk.msra.mxu3 %vm610_vm6, %v996_v18  ;;  %v2761_v37 = vunpack.i.l.bf16 %v2760_v16  ;;  %v2762_v40 = vunpack.i.h.bf16 %v2760_v16 }
 0x400   : > { %445 = vmatpush.msra.mxu1 %v2761_v37 }
 0x402   : > { %446 = vmatpush.msra.mxu1 %v2762_v40  ;;  %2650 = vmatpush.xpose.msk.msra.mxu3 %vm610_vm6, %v994_v29 }
 0x403   : > { %2625 = vmatmul.msk.f32.vlgmr.msra.gmra.mxu1 %vm258_vm0, %v407_v42 }
 0x405   : > { %v992_v45 = vpop.permute.xlu0 %991  ;;  %2651 = vmatmul.msk.f32.vlgmr.msra.gmra.mxu3 %vm610_vm6, %v990_v44 }
 0x40b   : > { %2626 = vmatmul.msk.f32.gmra.mxu1 %vm258_vm0, %v408_v47 }
 0x40d   : > { %v2765_v48 = vpop.permute.xlu0 %2764  ;;  %2652 = vmatmul.msk.f32.gmra.mxu3 %vm610_vm6, %v992_v45 }
 0x40e   : > { %v2766_v3 = vunpack.i.l.bf16 %v2765_v48  ;;  %v2767_v49 = vunpack.i.h.bf16 %v2765_v48 }
 0x410   : > { %720 = vmatpush.msrb.mxu1 %v2766_v3  ;;  %v241_v3 = vstv %s240_s8 }
 0x411   : > { %vm242_vm1 = vcmp.lt.s32.totalorder %v3274_v11, %v241_v3 }
 0x412   : > { %721 = vmatpush.msrb.mxu1 %v2767_v49 }
 0x415   : > { %v870_v51 = vpop.permute.xlu0 %869 }
 0x416   : > { %2643 = vmatpush.xpose.msk.msra.mxu1 %vm610_vm6, %v870_v51  ;;  %v3365_v51 = vsel %vm242_vm1, 0.0, %v3019_v17 }
 0x43f   : > { %v660_v52 = vpop.xlane.xlu1 %659 }
 0x440   : > { %2899 = vrcp.f32 %v660_v52  ;;  %v774_v56 = vpop.xlane.xlu0 %773  ;;  %v675_v6 = vand.u32 2147483648, %v660_v52  ;;  %v673_v26 = vand.u32 2147483647, %v660_v52  ;;  %vm669_vm9 = vweird.f32 %v660_v52 }
 0x441   : > { %v778_v60 = vsub.f32 %v3308_v19, %v774_v56 }
 0x442   : > { %v676_v29 = vor.u32 1.1754944e-38, %v675_v6  ;;  %vm674_vm11 = vcmp.eq.f32.partialorder %v673_v26, 8.507059e+37 }
 0x443   : > { %v780_v62 = vmul.f32 1.442695, %v778_v60 }
 0x445   : > { %2901 = vpow2.f32 %v780_v62 }
 0x446   : > { %v2900_v39 = vpop.eup %2899 }
 0x447   : > { %v665_v63 = vmul.f32 %v2900_v39, %v660_v52  ;;  %v663_v1 = vpop.xlane.xlu2 %662  ;;  %vm670_vm7 = vweird.f32 %v2900_v39 }
 0x448   : > { %2903 = vrcp.f32 %v663_v1  ;;  %vm671_vm10 = vmor %vm669_vm9, %vm670_vm7  ;;  %v690_v37 = vand.u32 2147483648, %v663_v1  ;;  %v688_v42 = vand.u32 2147483647, %v663_v1  ;;  %vm684_vm13 = vweird.f32 %v663_v1 }
 0x449   : > { %v666_v4 = vsub.f32 1.0, %v665_v63 }
 0x44a   : > { %v691_v44 = vor.u32 1.1754944e-38, %v690_v37  ;;  %vm689_vm15 = vcmp.eq.f32.partialorder %v688_v42, 8.507059e+37 }
 0x44b   : > { %v3339_v12 = vpop.eup %2901  ;;  %v667_v15 = vmul.f32 %v2900_v39, %v666_v4 }
 0x44c   : > { %v784_v27 = vsel %vm610_vm6, %v3339_v12, 0.0 }
 0x44d   : > { %v668_v28 = vadd.f32 %v2900_v39, %v667_v15  ;;  %785 = vadd.xlane.f32.xlu0 %v784_v27 }
 0x44e   : > { %v2904_v19 = vpop.eup %2903 }
 0x44f   : > { %v680_v30 = vmul.f32 %v2904_v19, %v663_v1  ;;  %v777_v8 = vpop.xlane.xlu2 %776  ;;  %v672_v14 = vsel %vm671_vm10, %v2900_v39, %v668_v28  ;;  %vm685_vm12 = vweird.f32 %v2904_v19 }
 0x450   : > { %v779_v31 = vsub.f32 %v3321_v57, %v777_v8  ;;  %v677_v16 = vsel %vm674_vm11, %v676_v29, %v672_v14  ;;  %vm686_vm14 = vmor %vm684_vm13, %vm685_vm12 }
 0x451   : > { %v681_v18 = vsub.f32 1.0, %v680_v30  ;;  %v678_v36 = vmul.f32 %v3310_v23, %v677_v16 }
 0x452   : > { %v782_v40 = vmul.f32 1.442695, %v779_v31 }
 0x453   : > { %v682_v41 = vmul.f32 %v2904_v19, %v681_v18  ;;  %2635 = vmatmul.msk.f32.vlgmr.msrb.gmra.mxu1 %vm610_vm6, %v678_v36 }
 0x454   : > { %2905 = vpow2.f32 %v782_v40 }
 0x455   : > { %v683_v43 = vadd.f32 %v2904_v19, %v682_v41 }
 0x457   : > { %v868_v45 = vpop.permute.xlu1 %867  ;;  %v687_v46 = vsel %vm686_vm14, %v2904_v19, %v683_v43 }
 0x458   : > { %2644 = vmatpush.xpose.msk.msra.mxu1 %vm610_vm6, %v868_v45  ;;  %v692_v57 = vsel %vm689_vm15, %v691_v44, %v687_v46 }
 0x459   : > { %v693_v23 = vmul.f32 %v3316_v50, %v692_v57  ;;  %v2778_v50 = vpack.i.bf16 %v3284_v21, %v3292_v32 }
 0x45a   : > { %v3348_v47 = vpop.eup %2905 }
 0x45b   : > { %2636 = vmatmul.msk.f32.gmra.mxu1 %vm610_vm6, %v693_v23  ;;  %v787_v48 = vsel %vm610_vm6, %v3348_v47, 0.0 }
 0x45c   : > { %788 = vadd.xlane.f32.xlu0 %v787_v48 }
 0x463   : > { %2645 = vmatmul.msk.f32.vlgmr.msra.gmra.mxu1 %vm610_vm6, %v3284_v21 }
 0x46b   : > { %2646 = vmatmul.msk.f32.gmra.mxu1 %vm610_vm6, %v3292_v32 }
 0x470   : > { %2769 = vrot.lane.b32.xlu0 %v3301_v34, %s3020_s30 }
 0x478   : > { %2779 = vrot.lane.b32.xlu0 %v2778_v50, %s3015_s7 }
 0x480   : > { %v3378_v39 = vpop.f32.mrf.mxu1 }
 0x488   : > { %v1022_v49 = vpop.f32.mrf.mxu3  ;;  %v3380_v1 = vpop.f32.mrf.mxu1 }
 0x489   : > { %v1028_v52 = vmul.f32 0.25, %v1022_v49 }
 0x48b   : > { %v3368_v56 = vadd.f32 %v1028_v52, %v3365_v51 }
 0x48d   : > { %v1032_v34 = vsel %vm610_vm6, %v3368_v56, -inf }
 0x48e   : > { %1033 = vmax.xlane.f32.xlu1 %v1032_v34 }
 0x490   : > { %v1025_v21 = vpop.f32.mrf.mxu3 }
 0x491   : > { %v1029_v32 = vmul.f32 0.25, %v1025_v21 }
 0x493   : > { %v3373_v60 = vadd.f32 %v1029_v32, %v3365_v51 }
 0x495   : > { %v1035_v62 = vsel %vm610_vm6, %v3373_v60, -inf }
 0x496   : > { %1036 = vmax.xlane.f32.xlu2 %v1035_v62 }
 0x4a7   : > { %2774 = vrot.lane.b32.xlu1 %v2778_v50, %s3020_s30 }
 0x4c0   : > { %v786_v63 = vpop.xlane.xlu0 %785 }
 0x4c1   : > { %2907 = vrcp.f32 %v786_v63  ;;  %v801_v31 = vand.u32 2147483648, %v786_v63  ;;  %vm795_vm3 = vweird.f32 %v786_v63  ;;  %v799_v16 = vand.u32 2147483647, %v786_v63 }
 0x4c3   : > { %v802_v40 = vor.u32 1.1754944e-38, %v801_v31  ;;  %vm800_vm5 = vcmp.eq.f32.partialorder %v799_v16, 8.507059e+37 }
 0x4c7   : > { %v2908_v4 = vpop.eup %2907 }
 0x4c8   : > { %v791_v15 = vmul.f32 %v2908_v4, %v786_v63  ;;  %vm796_vm2 = vweird.f32 %v2908_v4 }
 0x4c9   : > { %vm797_vm4 = vmor %vm795_vm3, %vm796_vm2 }
 0x4ca   : > { %v792_v27 = vsub.f32 1.0, %v791_v15 }
 0x4cc   : > { %v793_v19 = vmul.f32 %v2908_v4, %v792_v27 }
 0x4ce   : > { %v794_v8 = vadd.f32 %v2908_v4, %v793_v19 }
 0x4cf   : > { %v789_v6 = vpop.xlane.xlu0 %788 }
 0x4d0   : > { %2909 = vrcp.f32 %v789_v6  ;;  %v3382_v26 = vpop.f32.mrf.mxu1  ;;  %v798_v37 = vsel %vm797_vm4, %v2908_v4, %v794_v8  ;;  %v816_v57 = vand.u32 2147483648, %v789_v6  ;;  %vm810_vm9 = vweird.f32 %v789_v6 }
 0x4d1   : > { %v803_v45 = vsel %vm800_vm5, %v802_v40, %v798_v37  ;;  %v814_v3 = vand.u32 2147483647, %v789_v6 }
 0x4d2   : > { %v804_v50 = vmul.f32 %v3339_v12, %v803_v45  ;;  %v817_v34 = vor.u32 1.1754944e-38, %v816_v57 }
 0x4d3   : > { %vm815_vm11 = vcmp.eq.f32.partialorder %v814_v3, 8.507059e+37 }
 0x4d6   : > { %v2910_v28 = vpop.eup %2909 }
 0x4d7   : > { %v806_v29 = vmul.f32 %v2910_v28, %v789_v6  ;;  %vm811_vm7 = vweird.f32 %v2910_v28 }
 0x4d8   : > { %v3384_v30 = vpop.f32.mrf.mxu1  ;;  %vm812_vm10 = vmor %vm810_vm9, %vm811_vm7 }
 0x4d9   : > { %v807_v14 = vsub.f32 1.0, %v806_v29 }
 0x4db   : > { %v808_v18 = vmul.f32 %v2910_v28, %v807_v14 }
 0x4dd   : > { %v809_v46 = vadd.f32 %v2910_v28, %v808_v18 }
 0x4df   : > { %v813_v52 = vsel %vm812_vm10, %v2910_v28, %v809_v46 }
 0x4e0   : > { %v896_v36 = vpop.f32.mrf.mxu1  ;;  %v818_v4 = vsel %vm815_vm11, %v817_v34, %v813_v52 }
 0x4e1   : > { %v902_v41 = vmul.f32 0.25, %v896_v36  ;;  %v819_v12 = vmul.f32 %v3348_v47, %v818_v4 }
 0x4e2   : > { %v2770_v42 = vpop.permute.xlu0 %2769 }
 0x4e3   : > { %v2771_v43 = vunpack.i.l.bf16 %v2770_v42  ;;  %v904_v44 = vadd.f32 %v902_v41, %v3365_v51  ;;  %v2772_v48 = vunpack.i.h.bf16 %v2770_v42 }
 0x4e5   : > { %846 = vmatpush.msrb.mxu0 %v2771_v43  ;;  %v906_v23 = vsel %vm610_vm6, %v904_v44, -inf }
 0x4e6   : > { %907 = vmax.xlane.f32.xlu2 %v906_v23 }
 0x4e7   : > { %847 = vmatpush.msrb.mxu0 %v2772_v48 }
 0x4e8   : > { %2641 = vmatmul.msk.f32.vlgmr.msrb.gmra.mxu0 %vm610_vm6, %v804_v50  ;;  %v899_v49 = vpop.f32.mrf.mxu1 }
 0x4e9   : > { %v903_v21 = vmul.f32 0.25, %v899_v49 }
 0x4ea   : > { %v2780_v32 = vpop.permute.xlu0 %2779 }
 0x4eb   : > { %v2781_v62 = vunpack.i.l.bf16 %v2780_v32  ;;  %v905_v63 = vadd.f32 %v903_v21, %v3365_v51  ;;  %v2782_v27 = vunpack.i.h.bf16 %v2780_v32 }
 0x4ed   : > { %980 = vmatpush.msrb.mxu2 %v2781_v62  ;;  %v909_v15 = vsel %vm610_vm6, %v905_v63, -inf }
 0x4ee   : > { %910 = vmax.xlane.f32.xlu2 %v909_v15 }
 0x4ef   : > { %981 = vmatpush.msrb.mxu2 %v2782_v27 }
 0x4f0   : > { %2642 = vmatmul.msk.f32.gmra.mxu0 %vm610_vm6, %v819_v12 }
 0x4f1   : > { %1278 = vmatpush.msra.mxu2 %v2737_v61 }
 0x4f3   : > { %1279 = vmatpush.msra.mxu2 %v2742_v35 }
 0x4f5   : > { %1280 = vmatpush.msra.mxu2 %v2747_v38 }
 0x4f7   : > { %1281 = vmatpush.msra.mxu2 %v2752_v2  ;;  %v2788_v2 = vpack.i.bf16 %v3170_v33, %v3126_v22 }
 0x4f9   : > { %2789 = vrot.lane.b32.xlu0 %v2788_v2, %s3017_s21 }
 0x501   : > { %v1034_v6 = vpop.xlane.xlu1 %1033 }
 0x502   : > { %v1038_v28 = vsub.f32 %v3368_v56, %v1034_v6 }
 0x504   : > { %v1040_v19 = vmul.f32 1.442695, %v1038_v28 }
 0x506   : > { %2911 = vpow2.f32 %v1040_v19 }
 0x509   : > { %v1037_v47 = vpop.xlane.xlu2 %1036 }
 0x50a   : > { %v1039_v29 = vsub.f32 %v3373_v60, %v1037_v47 }
 0x50c   : > { %v2912_v8 = vpop.eup %2911  ;;  %v1042_v53 = vmul.f32 1.442695, %v1039_v29 }
 0x50d   : > { %v1044_v61 = vsel %vm610_vm6, %v2912_v8, 0.0 }
 0x50e   : > { %2913 = vpow2.f32 %v1042_v53  ;;  %1045 = vadd.xlane.f32.xlu2 %v1044_v61 }
 0x514   : > { %v3405_v54 = vpop.eup %2913 }
 0x515   : > { %v1047_v55 = vsel %vm610_vm6, %v3405_v54, 0.0 }
 0x516   : > { %1048 = vadd.xlane.f32.xlu2 %v1047_v55 }
 0x519   : > { %v2775_v35 = vpop.permute.xlu1 %2774 }
 0x51a   : > { %v2776_v38 = vunpack.i.l.bf16 %v2775_v35  ;;  %v2777_v0 = vunpack.i.h.bf16 %v2775_v35 }
 0x51c   : > { %1106 = vmatpush.msra.mxu0 %v2776_v38 }
 0x51e   : > { %1107 = vmatpush.msra.mxu0 %v2777_v0 }
 0x559   : > { %v908_v56 = vpop.xlane.xlu2 %907 }
 0x55a   : > { %v912_v60 = vsub.f32 %v904_v44, %v908_v56 }
 0x55c   : > { %v914_v14 = vmul.f32 1.442695, %v912_v60 }
 0x55e   : > { %2915 = vpow2.f32 %v914_v14 }
 0x561   : > { %v911_v31 = vpop.xlane.xlu2 %910 }
 0x562   : > { %v913_v16 = vsub.f32 %v905_v63, %v911_v31 }
 0x564   : > { %v3412_v18 = vpop.eup %2915  ;;  %v916_v36 = vmul.f32 1.442695, %v913_v16 }
 0x565   : > { %v849_v37 = vpop.f32.mrf.mxu0  ;;  %v918_v40 = vsel %vm610_vm6, %v3412_v18, 0.0 }
 0x566   : > { %2917 = vpow2.f32 %v916_v36  ;;  %857 = vrot.lane.b32.xlu1 %v849_v37, %s3021_s9  ;;  %919 = vadd.xlane.f32.xlu2 %v918_v40 }
 0x56b   : > { %v2790_v31 = vpop.permute.xlu0 %2789 }
 0x56c   : > { %v3417_v22 = vpop.eup %2917  ;;  %v2791_v37 = vunpack.i.l.bf16 %v2790_v31 }
 0x56d   : > { %v852_v33 = vpop.f32.mrf.mxu0  ;;  %v921_v41 = vsel %vm610_vm6, %v3417_v22, 0.0 }
 0x56e   : > { %859 = vrot.lane.b32.xlu0 %v852_v33, %s3021_s9  ;;  %922 = vadd.xlane.f32.xlu2 %v921_v41 }
 0x581   : > { %v1046_v42 = vpop.xlane.xlu2 %1045 }
 0x582   : > { %2919 = vrcp.f32 %v1046_v42  ;;  %v1061_v57 = vand.u32 2147483648, %v1046_v42  ;;  %v1059_v48 = vand.u32 2147483647, %v1046_v42  ;;  %vm1055_vm13 = vweird.f32 %v1046_v42 }
 0x584   : > { %v1062_v49 = vor.u32 1.1754944e-38, %v1061_v57  ;;  %vm1060_vm15 = vcmp.eq.f32.partialorder %v1059_v48, 8.507059e+37 }
 0x586   : > { %2784 = vrot.lane.b32.xlu2 %v2783_v20, %s3017_s21 }
 0x588   : > { %v2920_v43 = vpop.eup %2919 }
 0x589   : > { %v1051_v44 = vmul.f32 %v2920_v43, %v1046_v42  ;;  %v1049_v45 = vpop.xlane.xlu2 %1048  ;;  %vm1056_vm12 = vweird.f32 %v2920_v43  ;;  %v2792_v42 = vunpack.i.h.bf16 %v2790_v31 }
 0x58a   : > { %2921 = vrcp.f32 %v1049_v45  ;;  %vm1057_vm14 = vmor %vm1055_vm13, %vm1056_vm12  ;;  %v1076_v20 = vand.u32 2147483648, %v1049_v45  ;;  %v1074_v62 = vand.u32 2147483647, %v1049_v45  ;;  %vm1070_vm2 = vweird.f32 %v1049_v45 }
 0x58b   : > { %v1052_v46 = vsub.f32 1.0, %v1051_v44 }
 0x58c   : > { %v1077_v4 = vor.u32 1.1754944e-38, %v1076_v20  ;;  %vm1075_vm4 = vcmp.eq.f32.partialorder %v1074_v62, 8.507059e+37 }
 0x58d   : > { %v1053_v23 = vmul.f32 %v2920_v43, %v1052_v46 }
 0x58f   : > { %v1054_v50 = vadd.f32 %v2920_v43, %v1053_v23 }
 0x590   : > { %v2922_v3 = vpop.eup %2921 }
 0x591   : > { %v1058_v52 = vsel %vm1057_vm14, %v2920_v43, %v1054_v50  ;;  %v1066_v34 = vmul.f32 %v2922_v3, %v1049_v45  ;;  %vm1071_vm1 = vweird.f32 %v2922_v3 }
 0x592   : > { %v1063_v21 = vsel %vm1060_vm15, %v1062_v49, %v1058_v52  ;;  %vm1072_vm3 = vmor %vm1070_vm2, %vm1071_vm1 }
 0x593   : > { %v1067_v9 = vsub.f32 1.0, %v1066_v34  ;;  %v1064_v13 = vmul.f32 %v2912_v8, %v1063_v21 }
 0x595   : > { %v1068_v32 = vmul.f32 %v2922_v3, %v1067_v9  ;;  %2653 = vmatmul.msk.f32.vlgmr.msra.gmra.mxu0 %vm610_vm6, %v1064_v13 }
 0x597   : > { %v1069_v63 = vadd.f32 %v2922_v3, %v1068_v32 }
 0x599   : > { %v1073_v15 = vsel %vm1072_vm3, %v2922_v3, %v1069_v63 }
 0x59a   : > { %v1078_v27 = vsel %vm1075_vm4, %v1077_v4, %v1073_v15 }
 0x59b   : > { %v1079_v12 = vmul.f32 %v3405_v54, %v1078_v27 }
 0x59d   : > { %2654 = vmatmul.msk.f32.gmra.mxu0 %vm610_vm6, %v1079_v12  ;;  %v3469_v12 = vld [vmem:[%s3840_s3 + $0x60] sm:$0xff] }
 0x5d8   : > { %v858_v43 = vpop.permute.xlu1 %857 }
 0x5d9   : > { %v920_v6 = vpop.xlane.xlu2 %919 }
 0x5da   : > { %2923 = vrcp.f32 %v920_v6  ;;  %v935_v8 = vand.u32 2147483648, %v920_v6  ;;  %v933_v61 = vand.u32 2147483647, %v920_v6  ;;  %vm929_vm7 = vweird.f32 %v920_v6 }
 0x5dc   : > { %v936_v38 = vor.u32 1.1754944e-38, %v935_v8  ;;  %vm934_vm10 = vcmp.eq.f32.partialorder %v933_v61, 8.507059e+37 }
 0x5e0   : > { %v2924_v28 = vpop.eup %2923  ;;  %v860_v48 = vpop.permute.xlu0 %859 }
 0x5e1   : > { %v925_v19 = vmul.f32 %v2924_v28, %v920_v6  ;;  %v923_v47 = vpop.xlane.xlu2 %922  ;;  %vm930_vm5 = vweird.f32 %v2924_v28  ;;  %v864_v50 = vsel %vm610_vm6, %v3384_v30, %v860_v48  ;;  %v3475_v6 = vld [vmem:[%s3840_s3 + $0x38] sm:$0xff] }
 0x5e2   : > { %2925 = vrcp.f32 %v923_v47  ;;  %vm931_vm9 = vmor %vm929_vm7, %vm930_vm5  ;;  %v950_v40 = vand.u32 2147483648, %v923_v47  ;;  %v948_v41 = vand.u32 2147483647, %v923_v47  ;;  %vm944_vm12 = vweird.f32 %v923_v47 }
 0x5e3   : > { %v926_v29 = vsub.f32 1.0, %v925_v19  ;;  %v3483_v19 = vld [vmem:[%s3840_s3 + $0x10] sm:$0xff] }
 0x5e4   : > { %v951_v45 = vor.u32 1.1754944e-38, %v950_v40  ;;  %vm949_vm14 = vcmp.eq.f32.partialorder %v948_v41, 8.507059e+37 }
 0x5e5   : > { %v927_v53 = vmul.f32 %v2924_v28, %v926_v29 }
 0x5e7   : > { %v928_v55 = vadd.f32 %v2924_v28, %v927_v53 }
 0x5e8   : > { %v2926_v35 = vpop.eup %2925 }
 0x5e9   : > { %v940_v54 = vmul.f32 %v2926_v35, %v923_v47  ;;  %v2785_v0 = vpop.permute.xlu2 %2784  ;;  %v932_v2 = vsel %vm931_vm9, %v2924_v28, %v928_v55  ;;  %vm945_vm11 = vweird.f32 %v2926_v35  ;;  %v2798_v47 = vpack.i.bf16 %v3483_v19, %v3475_v6 }
 0x5ea   : > { %v2787_v56 = vunpack.i.h.bf16 %v2785_v0  ;;  %v2786_v60 = vunpack.i.l.bf16 %v2785_v0  ;;  %v937_v14 = vsel %vm934_vm10, %v936_v38, %v932_v2  ;;  %vm946_vm13 = vmor %vm944_vm12, %vm945_vm11 }
 0x5eb   : > { %v941_v16 = vsub.f32 1.0, %v940_v54  ;;  %v938_v36 = vmul.f32 %v3412_v18, %v937_v14  ;;  %v863_v18 = vsel %vm610_vm6, %v3382_v26, %v858_v43  ;;  %v1384_v26 = vmul.f32 %v3378_v39, %v3378_v39 }
 0x5ec   : > { %1161 = vmatpush.msrb.mxu1 %v2786_v60 }
 0x5ed   : > { %v942_v33 = vmul.f32 %v2926_v35, %v941_v16  ;;  %2647 = vmatmul.msk.f32.vlgmr.msrb.gmra.mxu2 %vm610_vm6, %v938_v36  ;;  %v1386_v52 = vsel %vm258_vm0, %v1384_v26, 0.0 }
 0x5ee   : > { %1162 = vmatpush.msrb.mxu1 %v2787_v56 }
 0x5ef   : > { %v943_v44 = vadd.f32 %v2926_v35, %v942_v33 }
 0x5f0   : > { %1163 = vmatpush.msrb.mxu1 %v2791_v37 }
 0x5f1   : > { %v947_v46 = vsel %vm946_vm13, %v2926_v35, %v943_v44 }
 0x5f2   : > { %1164 = vmatpush.msrb.mxu1 %v2792_v42  ;;  %v952_v57 = vsel %vm949_vm14, %v951_v45, %v947_v46 }
 0x5f3   : > { %2655 = vmatmul.msk.f32.vlgmr.msrb.gmra.mxu1 %vm258_vm0, %v863_v18  ;;  %v953_v23 = vmul.f32 %v3417_v22, %v952_v57 }
 0x5f5   : > { %2648 = vmatmul.msk.f32.gmra.mxu2 %vm610_vm6, %v953_v23 }
 0x5fb   : > { %2656 = vmatmul.msk.f32.gmra.mxu1 %vm258_vm0, %v864_v50 }
 0x612   : > { %v1109_v3 = vpop.f32.mrf.mxu0 }
 0x613   : > { %1117 = vrot.lane.b32.xlu1 %v1109_v3, %s3021_s9 }
 0x61a   : > { %v1112_v49 = vpop.f32.mrf.mxu0 }
 0x61b   : > { %1119 = vrot.lane.b32.xlu0 %v1112_v49, %s3021_s9 }
 0x63d   : > { %1387 = vadd.xlane.f32.xlu1 %v1386_v52 }
 0x670   : > { %v1166_v22 = vpop.f32.mrf.mxu1  ;;  %v983_v62 = vpop.f32.mrf.mxu2 }
 0x671   : > { %v3445_v34 = vadd.f32 %v1166_v22, %v3149_v59 }
 0x673   : > { %v1182_v30 = vmul.f32 %v3445_v34, %v3445_v34 }
 0x675   : > { %v1186_v21 = vsel %vm258_vm0, %v1182_v30, 0.0 }
 0x676   : > { %1187 = vadd.xlane.f32.xlu2 %v1186_v21 }
 0x678   : > { %v1169_v9 = vpop.f32.mrf.mxu1  ;;  %v986_v4 = vpop.f32.mrf.mxu2 }
 0x679   : > { %v3451_v13 = vadd.f32 %v1169_v9, %v3160_v5  ;;  %v3463_v5 = vld [vmem:[%s3840_s3 + $0x88] sm:$0xff] }
 0x67a   : > { %1440 = vmatpush.msrb.mxu0 %v3463_v5  ;;  %v2793_v28 = vpack.i.bf16 %v3469_v12, %v3463_v5 }
 0x67b   : > { %v1183_v20 = vmul.f32 %v3451_v13, %v3451_v13 }
 0x67c   : > { %1441 = vmatpush.msrb.mxu0 %v3469_v12 }
 0x67d   : > { %v1189_v32 = vsel %vm258_vm0, %v1183_v20, 0.0 }
 0x67e   : > { %1190 = vadd.xlane.f32.xlu0 %v1189_v32  ;;  %1442 = vmatpush.msrb.mxu0 %v3475_v6 }
 0x680   : > { %1443 = vmatpush.msrb.mxu0 %v3483_v19 }
 0x685   : > { %v1118_v63 = vpop.permute.xlu1 %1117 }
 0x686   : > { %v1123_v59 = vsel %vm610_vm6, %v983_v62, %v1118_v63  ;;  %v1385_v62 = vmul.f32 %v3380_v1, %v3380_v1 }
 0x687   : > { %2657 = vmatmul.msk.f32.gmra.mxu1 %vm258_vm0, %v1123_v59 }
 0x688   : > { %v1389_v63 = vsel %vm258_vm0, %v1385_v62, 0.0 }
 0x68d   : > { %v1120_v15 = vpop.permute.xlu0 %1119 }
 0x68e   : > { %v1124_v27 = vsel %vm610_vm6, %v986_v4, %v1120_v15  ;;  %v3529_v4 = vld [vmem:[%s3841_s4 + $0x30] sm:$0xff]  ;;  %v3535_v15 = vld [vmem:[%s3841_s4 + $0x28] sm:$0xff] }
 0x68f   : > { %2658 = vmatmul.msk.f32.gmra.mxu1 %vm258_vm0, %v1124_v27  ;;  %v3541_v27 = vld [vmem:[%s3841_s4 + $0x20] sm:$0xff] }
 0x6b0   : > { %v1388_v29 = vpop.xlane.xlu1 %1387 }
 0x6b1   : > { %v1392_v8 = vmul.f32 %v1388_v29, %v3131_v24  ;;  %v3547_v29 = vld [vmem:[%s3841_s4 + $0x18] sm:$0xff] }
 0x6b3   : > { %v1394_v53 = vadd.f32 1e-06, %v1392_v8  ;;  %v3553_v8 = vld [vmem:[%s3841_s4 + $0x10] sm:$0xff] }
 0x6b5   : > { %2927 = vrsqrt.f32 %v1394_v53  ;;  %vm1402_vm1 = vweird.f32 %v1394_v53 }
 0x6bb   : > { %v2928_v61 = vpop.eup %2927 }
 0x6bc   : > { %v1397_v55 = vmul.f32 %v2928_v61, %v1394_v53  ;;  %vm1403_vm15 = vweird.f32 %v2928_v61  ;;  %v3559_v53 = vld [vmem:[%s3841_s4 + $0x8] sm:$0xff] }
 0x6bd   : > { %vm1404_vm2 = vmor %vm1402_vm1, %vm1403_vm15 }
 0x6be   : > { %v1398_v35 = vmul.f32 %v2928_v61, %v1397_v55 }
 0x6c0   : > { %v1399_v38 = vmul.f32 0.5, %v1398_v35 }
 0x6c2   : > { %v1400_v54 = vsub.f32 1.5, %v1399_v38 }
 0x6c4   : > { %v1401_v0 = vmul.f32 %v2928_v61, %v1400_v54  ;;  %v2848_v54 = vpack.i.bf16 %v3541_v27, %v3535_v15 }
 0x6c6   : > { %v1405_v2 = vsel %vm1404_vm2, %v2928_v61, %v1401_v0  ;;  %v3565_v61 = vld [vmem:[%s3841_s4] sm:$0xff]  ;;  %v2853_v0 = vpack.i.bf16 %v3553_v8, %v3547_v29 }
 0x6c7   : > { %v1416_v56 = vmul.f32 %v1405_v2, %v3378_v39  ;;  %v2858_v2 = vpack.i.bf16 %v3565_v61, %v3559_v53 }
 0x6c9   : > { %2667 = vmatmul.msk.f32.vlgmr.msrb.gmra.mxu0 %vm258_vm0, %v1416_v56 }
 0x6e9   : > { %v1188_v60 = vpop.xlane.xlu2 %1187 }
 0x6ea   : > { %v1198_v14 = vmul.f32 %v1188_v60, %v3131_v24 }
 0x6ec   : > { %v1202_v31 = vadd.f32 1e-06, %v1198_v14 }
 0x6ee   : > { %2929 = vrsqrt.f32 %v1202_v31  ;;  %vm1212_vm4 = vweird.f32 %v1202_v31 }
 0x6f1   : > { %v1191_v16 = vpop.xlane.xlu0 %1190 }
 0x6f2   : > { %v1199_v36 = vmul.f32 %v1191_v16, %v3131_v24 }
 0x6f4   : > { %v2930_v37 = vpop.eup %2929  ;;  %v1203_v40 = vadd.f32 1e-06, %v1199_v36 }
 0x6f5   : > { %v1207_v33 = vmul.f32 %v2930_v37, %v1202_v31  ;;  %vm1213_vm3 = vweird.f32 %v2930_v37 }
 0x6f6   : > { %2931 = vrsqrt.f32 %v1203_v40  ;;  %vm1214_vm5 = vmor %vm1212_vm4, %vm1213_vm3  ;;  %vm1222_vm9 = vweird.f32 %v1203_v40 }
 0x6f7   : > { %v1208_v41 = vmul.f32 %v2930_v37, %v1207_v33 }
 0x6f9   : > { %v1209_v42 = vmul.f32 0.5, %v1208_v41 }
 0x6fb   : > { %v1210_v43 = vsub.f32 1.5, %v1209_v42 }
 0x6fc   : > { %v2932_v44 = vpop.eup %2931 }
 0x6fd   : > { %v1211_v45 = vmul.f32 %v2930_v37, %v1210_v43  ;;  %v1217_v46 = vmul.f32 %v2932_v44, %v1203_v40  ;;  %vm1223_vm7 = vweird.f32 %v2932_v44 }
 0x6fe   : > { %vm1224_vm10 = vmor %vm1222_vm9, %vm1223_vm7  ;;  %vm1480_vm7 = vcmask 64512  }
 0x6ff   : > { %v1215_v18 = vsel %vm1214_vm5, %v2930_v37, %v1211_v45  ;;  %v1218_v57 = vmul.f32 %v2932_v44, %v1217_v46 }
 0x700   : > { %v1246_v23 = vmul.f32 %v1215_v18, %v3445_v34 }
 0x701   : > { %v1219_v48 = vmul.f32 0.5, %v1218_v57 }
 0x702   : > { %2659 = vmatmul.msk.f32.vlgmr.msra.gmra.mxu2 %vm258_vm0, %v1246_v23 }
 0x703   : > { %v1220_v50 = vsub.f32 1.5, %v1219_v48 }
 0x704   : > { %v1172_v3 = vpop.f32.mrf.mxu1 }
 0x705   : > { %v3496_v49 = vadd.f32 %v1172_v3, %v3187_v58  ;;  %v1221_v26 = vmul.f32 %v2932_v44, %v1220_v50 }
 0x707   : > { %v1225_v52 = vsel %vm1224_vm10, %v2932_v44, %v1221_v26  ;;  %v1184_v22 = vmul.f32 %v3496_v49, %v3496_v49 }
 0x708   : > { %v1247_v30 = vmul.f32 %v1225_v52, %v3451_v13 }
 0x709   : > { %v1192_v21 = vsel %vm258_vm0, %v1184_v22, 0.0 }
 0x70a   : > { %2660 = vmatmul.msk.f32.gmra.mxu2 %vm258_vm0, %v1247_v30  ;;  %1193 = vadd.xlane.f32.xlu1 %v1192_v21 }
 0x70c   : > { %v1175_v9 = vpop.f32.mrf.mxu1 }
 0x70d   : > { %v3504_v20 = vadd.f32 %v1175_v9, %v3197_v7  ;;  %v3523_v7 = vld [vmem:[%s3841_s4 + $0x38] sm:$0xff] }
 0x70e   : > { %1359 = vmatpush.msrb.mxu3 %v3523_v7  ;;  %v2843_v38 = vpack.i.bf16 %v3529_v4, %v3523_v7 }
 0x70f   : > { %v1185_v58 = vmul.f32 %v3504_v20, %v3504_v20 }
 0x710   : > { %1360 = vmatpush.msrb.mxu3 %v3529_v4 }
 0x711   : > { %v1195_v32 = vsel %vm258_vm0, %v1185_v58, 0.0 }
 0x712   : > { %1196 = vadd.xlane.f32.xlu2 %v1195_v32  ;;  %1361 = vmatpush.msrb.mxu3 %v3535_v15 }
 0x714   : > { %1362 = vmatpush.msrb.mxu3 %v3541_v27 }
 0x716   : > { %1363 = vmatpush.msrb.mxu3 %v3547_v29 }
 0x718   : > { %1364 = vmatpush.msrb.mxu3 %v3553_v8  ;;  %v2383_v8 = vld [vmem:[%s3840_s3 + $0x98] sm:$0xff] }
 0x71a   : > { %1390 = vadd.xlane.f32.xlu2 %v1389_v63  ;;  %1365 = vmatpush.msrb.mxu3 %v3559_v53  ;;  %v2382_v53 = vld [vmem:[%s3840_s3 + $0x70] sm:$0xff] }
 0x71c   : > { %1366 = vmatpush.msrb.mxu3 %v3565_v61  ;;  %v2381_v61 = vld [vmem:[%s3840_s3 + $0x48] sm:$0xff] }
 0x746   : > { %v3512_v59 = vpop.f32.mrf.mxu0 }
 0x747   : > { %1533 = vrot.lane.b32.xlu0 %v3512_v59, %s3016_s20  ;;  %1531 = vrot.lane.b32.xlu1 %v3512_v59, %s3018_s0 }
 0x748   : > { %1452 = vrot.lane.b32.xlu2 %v3512_v59, %s3017_s21 }
 0x77d   : > { %v1194_v55 = vpop.xlane.xlu1 %1193 }
 0x77e   : > { %v1200_v35 = vmul.f32 %v1194_v55, %v3131_v24 }
 0x780   : > { %v1204_v56 = vadd.f32 1e-06, %v1200_v35 }
 0x782   : > { %2933 = vrsqrt.f32 %v1204_v56  ;;  %vm1232_vm12 = vweird.f32 %v1204_v56 }
 0x785   : > { %v1283_v60 = vpop.f32.mrf.mxu2  ;;  %v1197_v14 = vpop.xlane.xlu2 %1196 }
 0x786   : > { %v1295_v31 = vmul.f32 %v1283_v60, %v1283_v60  ;;  %v1201_v16 = vmul.f32 %v1197_v14, %v3131_v24 }
 0x788   : > { %v2934_v36 = vpop.eup %2933  ;;  %v1299_v37 = vmul.f32 %v1295_v31, %v1283_v60  ;;  %v1205_v40 = vadd.f32 1e-06, %v1201_v16 }
 0x789   : > { %v1227_v33 = vmul.f32 %v2934_v36, %v1204_v56  ;;  %vm1233_vm11 = vweird.f32 %v2934_v36 }
 0x78a   : > { %v1303_v41 = vmul.f32 0.044715, %v1299_v37  ;;  %2935 = vrsqrt.f32 %v1205_v40  ;;  %vm1234_vm13 = vmor %vm1232_vm12, %vm1233_vm11  ;;  %vm1242_vm15 = vweird.f32 %v1205_v40 }
 0x78b   : > { %v1228_v42 = vmul.f32 %v2934_v36, %v1227_v33 }
 0x78c   : > { %v1307_v43 = vadd.f32 %v1303_v41, %v1283_v60 }
 0x78d   : > { %v1229_v44 = vmul.f32 0.5, %v1228_v42  ;;  %v1286_v45 = vpop.f32.mrf.mxu2  ;;  %v1391_v46 = vpop.xlane.xlu2 %1390 }
 0x78e   : > { %v1311_v18 = vmul.f32 0.7978846, %v1307_v43  ;;  %v1296_v57 = vmul.f32 %v1286_v45, %v1286_v45  ;;  %v1393_v23 = vmul.f32 %v1391_v46, %v3131_v24 }
 0x78f   : > { %v1230_v48 = vsub.f32 1.5, %v1229_v44 }
 0x790   : > { %v2936_v50 = vpop.eup %2935  ;;  %2937 = vtanh.f32 %v1311_v18  ;;  %v1300_v3 = vmul.f32 %v1296_v57, %v1286_v45  ;;  %v1395_v26 = vadd.f32 1e-06, %v1393_v23 }
 0x791   : > { %v1237_v52 = vmul.f32 %v2936_v50, %v1205_v40  ;;  %v1231_v22 = vmul.f32 %v2934_v36, %v1230_v48  ;;  %vm1243_vm14 = vweird.f32 %v2936_v50 }
 0x792   : > { %v1304_v30 = vmul.f32 0.044715, %v1300_v3  ;;  %2939 = vrsqrt.f32 %v1395_v26  ;;  %vm1244_vm1 = vmor %vm1242_vm15, %vm1243_vm14  ;;  %vm1412_vm3 = vweird.f32 %v1395_v26 }
 0x793   : > { %v1238_v21 = vmul.f32 %v2936_v50, %v1237_v52  ;;  %v1235_v9 = vsel %vm1234_vm13, %v2934_v36, %v1231_v22 }
 0x794   : > { %v1308_v58 = vadd.f32 %v1304_v30, %v1286_v45  ;;  %v1248_v32 = vmul.f32 %v1235_v9, %v3496_v49 }
 0x795   : > { %v1239_v62 = vmul.f32 0.5, %v1238_v21 }
 0x796   : > { %v2938_v63 = vpop.eup %2937  ;;  %v1312_v55 = vmul.f32 0.7978846, %v1308_v58  ;;  %2661 = vmatmul.msk.f32.gmra.mxu2 %vm258_vm0, %v1248_v32 }
 0x797   : > { %v1319_v35 = vadd.f32 1.0, %v2938_v63  ;;  %v1240_v14 = vsub.f32 1.5, %v1239_v62 }
 0x798   : > { %v2940_v31 = vpop.eup %2939  ;;  %2941 = vtanh.f32 %v1312_v55  ;;  %v245_v55 = vshrl.u32 %v233_v10, 7 }
 0x799   : > { %v1323_v56 = vmul.f32 0.5, %v1319_v35  ;;  %v1407_v16 = vmul.f32 %v2940_v31, %v1395_v26  ;;  %v1241_v37 = vmul.f32 %v2936_v50, %v1240_v14  ;;  %vm1413_vm2 = vweird.f32 %v2940_v31 }
 0x79a   : > { %vm1414_vm4 = vmor %vm1412_vm3, %vm1413_vm2  ;;  %vm246_vm5 = vcmp.ge.s32.totalorder %v245_v55, %v3274_v11 }
 0x79b   : > { %v1327_v33 = vmul.f32 %v1323_v56, %v1283_v60  ;;  %v1408_v36 = vmul.f32 %v2940_v31, %v1407_v16  ;;  %v1245_v41 = vsel %vm1244_vm1, %v2936_v50, %v1241_v37 }
 0x79c   : > { %v1249_v42 = vmul.f32 %v1245_v41, %v3504_v20 }
 0x79d   : > { %v1409_v43 = vmul.f32 0.5, %v1408_v36  ;;  %2663 = vmatmul.msk.f32.vlgmr.msrb.gmra.mxu3 %vm554_vm8, %v1327_v33  ;;  %v3597_v33 = vsel %vm246_vm5, 0.0, %v3019_v17 }
 0x79e   : > { %v2942_v44 = vpop.eup %2941  ;;  %2662 = vmatmul.msk.f32.gmra.mxu2 %vm258_vm0, %v1249_v42 }
 0x79f   : > { %v1410_v46 = vsub.f32 1.5, %v1409_v43  ;;  %v1320_v18 = vadd.f32 1.0, %v2942_v44 }
 0x7a1   : > { %v1324_v57 = vmul.f32 0.5, %v1320_v18  ;;  %v1411_v40 = vmul.f32 %v2940_v31, %v1410_v46 }
 0x7a2   : > { %v1453_v23 = vpop.permute.xlu2 %1452 }
 0x7a3   : > { %2669 = vmatpush.xpose.msk.msra.mxu0 %vm610_vm6, %v1453_v23  ;;  %v1328_v60 = vmul.f32 %v1324_v57, %v1286_v45  ;;  %v1415_v48 = vsel %vm1414_vm4, %v2940_v31, %v1411_v40 }
 0x7a4   : > { %v1417_v50 = vmul.f32 %v1415_v48, %v3380_v1 }
 0x7a5   : > { %2664 = vmatmul.msk.f32.gmra.mxu3 %vm554_vm8, %v1328_v60 }
 0x7a6   : > { %2668 = vmatmul.msk.f32.gmra.mxu0 %vm258_vm0, %v1417_v50 }
 0x7ae   : > { %2670 = vmatmul.msk.f32.vlgmr.msra.gmra.mxu0 %vm610_vm6, %v3512_v59 }
 0x7b9   : > { %v1534_v3 = vpop.permute.xlu0 %1533  ;;  %v1532_v26 = vpop.permute.xlu1 %1531 }
 0x7ba   : > { %2672 = vmatpush.xpose.msk.msrb.mxu2 %vm610_vm6, %v1534_v3 }
 0x7bd   : > { %2673 = vmatmul.msk.f32.vlgmr.msrb.gmra.mxu2 %vm610_vm6, %v1532_v26 }
 0x819   : > { %v1289_v52 = vpop.f32.mrf.mxu2 }
 0x81a   : > { %v1297_v22 = vmul.f32 %v1289_v52, %v1289_v52 }
 0x81c   : > { %v1301_v30 = vmul.f32 %v1297_v22, %v1289_v52 }
 0x81e   : > { %v1305_v45 = vmul.f32 0.044715, %v1301_v30 }
 0x820   : > { %v1309_v21 = vadd.f32 %v1305_v45, %v1289_v52 }
 0x821   : > { %v1292_v9 = vpop.f32.mrf.mxu2 }
 0x822   : > { %v1313_v58 = vmul.f32 0.7978846, %v1309_v21  ;;  %v1298_v32 = vmul.f32 %v1292_v9, %v1292_v9 }
 0x823   : > { %v3592_v62 = vpop.f32.mrf.mxu0 }
 0x824   : > { %2943 = vtanh.f32 %v1313_v58  ;;  %v1302_v63 = vmul.f32 %v1298_v32, %v1292_v9 }
 0x826   : > { %v1306_v35 = vmul.f32 0.044715, %v1302_v63 }
 0x828   : > { %v1310_v14 = vadd.f32 %v1306_v35, %v1292_v9 }
 0x82a   : > { %v2944_v31 = vpop.eup %2943  ;;  %v1314_v56 = vmul.f32 0.7978846, %v1310_v14 }
 0x82b   : > { %v1475_v16 = vpop.f32.mrf.mxu0  ;;  %v1321_v37 = vadd.f32 1.0, %v2944_v31 }
 0x82c   : > { %2945 = vtanh.f32 %v1314_v56  ;;  %v1478_v36 = vmul.f32 0.25, %v1475_v16 }
 0x82d   : > { %v1325_v41 = vmul.f32 0.5, %v1321_v37 }
 0x82e   : > { %v1479_v42 = vadd.f32 %v1478_v36, %v3597_v33 }
 0x82f   : > { %v1329_v43 = vmul.f32 %v1325_v41, %v1289_v52 }
 0x830   : > { %v1481_v10 = vsel %vm1480_vm7, %v1479_v42, -inf }
 0x831   : > { %2665 = vmatmul.msk.f32.gmra.mxu3 %vm554_vm8, %v1329_v43  ;;  %1482 = vmax.xlane.f32.xlu1 %v1481_v10 }
 0x832   : > { %v2946_v11 = vpop.eup %2945 }
 0x833   : > { %v1322_v44 = vadd.f32 1.0, %v2946_v11 }
 0x835   : > { %v1326_v46 = vmul.f32 0.5, %v1322_v44 }
 0x837   : > { %v1330_v18 = vmul.f32 %v1326_v46, %v1292_v9 }
 0x839   : > { %2666 = vmatmul.msk.f32.gmra.mxu3 %vm554_vm8, %v1330_v18 }
 0x840   : > { %v1556_v17 = vpop.f32.mrf.mxu2 }
 0x841   : > { %v1559_v57 = vmul.f32 0.25, %v1556_v17 }
 0x843   : > { %v1560_v40 = vadd.f32 %v1559_v57, %v3597_v33 }
 0x845   : > { %v1561_v23 = vsel %vm1480_vm7, %v1560_v40, -inf }
 0x846   : > { %1562 = vmax.xlane.f32.xlu0 %v1561_v23 }
 0x84a   : > { %1697 = vrot.lane.b32.xlu1 %v3592_v62, %s3016_s20 }
 0x852   : > { %1505 = vrot.lane.b32.xlu1 %v3512_v59, %s3015_s7 }
 0x85a   : > { %1585 = vrot.lane.b32.xlu0 %v3512_v59, %s3020_s30  ;;  %2794 = vrot.lane.b32.xlu1 %v2793_v28, %s3022_s17 }
 0x8a4   : > { %v1483_v60 = vpop.xlane.xlu1 %1482 }
 0x8a5   : > { %v1484_v48 = vsub.f32 %v1479_v42, %v1483_v60 }
 0x8a7   : > { %v1485_v50 = vmul.f32 1.442695, %v1484_v48 }
 0x8a9   : > { %2947 = vpow2.f32 %v1485_v50 }
 0x8af   : > { %v2948_v3 = vpop.eup %2947 }
 0x8b0   : > { %v1487_v26 = vsel %vm1480_vm7, %v2948_v3, 0.0 }
 0x8b1   : > { %1488 = vadd.xlane.f32.xlu0 %v1487_v26 }
 0x8b9   : > { %v1563_v52 = vpop.xlane.xlu0 %1562 }
 0x8ba   : > { %v1564_v22 = vsub.f32 %v1560_v40, %v1563_v52  ;;  %v3632_v40 = vpop.f32.mrf.mxu3 }
 0x8bc   : > { %v1565_v30 = vmul.f32 1.442695, %v1564_v22  ;;  %v1698_v45 = vpop.permute.xlu1 %1697 }
 0x8bd   : > { %2678 = vmatpush.xpose.msk.msra.mxu2 %vm610_vm6, %v1698_v45 }
 0x8be   : > { %2949 = vpow2.f32 %v1565_v30 }
 0x8c2   : > { %v3634_v23 = vpop.f32.mrf.mxu3 }
 0x8c4   : > { %v2950_v21 = vpop.eup %2949  ;;  %v1506_v9 = vpop.permute.xlu1 %1505 }
 0x8c5   : > { %1526 = vmatpush.msra.mxu1 %v1506_v9  ;;  %v1567_v59 = vsel %vm1480_vm7, %v2950_v21, 0.0 }
 0x8c6   : > { %1568 = vadd.xlane.f32.xlu2 %v1567_v59 }
 0x8ca   : > { %v3636_v60 = vpop.f32.mrf.mxu3 }
 0x8cc   : > { %v1586_v58 = vpop.permute.xlu0 %1585  ;;  %v2795_v59 = vpop.permute.xlu1 %2794 }
 0x8cd   : > { %1606 = vmatpush.msra.mxu3 %v1586_v58  ;;  %v2797_v58 = vunpack.i.h.bf16 %v2795_v59 }
 0x8de   : > { %1695 = vrot.lane.b32.xlu2 %v3592_v62, %s3018_s0 }
 0x8e6   : > { %1617 = vrot.lane.b32.xlu2 %v3592_v62, %s3017_s21 }
 0x8ee   : > { %2799 = vrot.lane.b32.xlu2 %v2798_v47, %s3022_s17 }
 0x924   : > { %v1489_v32 = vpop.xlane.xlu0 %1488 }
 0x925   : > { %2951 = vrcp.f32 %v1489_v32  ;;  %v1501_v14 = vand.u32 2147483648, %v1489_v32  ;;  %v1499_v5 = vand.u32 2147483647, %v1489_v32  ;;  %vm1495_vm10 = vweird.f32 %v1489_v32 }
 0x927   : > { %v1502_v28 = vor.u32 1.1754944e-38, %v1501_v14  ;;  %vm1500_vm12 = vcmp.eq.f32.partialorder %v1499_v5, 8.507059e+37  ;;  %v1863_v14 = vld [vmem:[%s3840_s3 + $0x68] sm:$0xff]  ;;  %v1861_v5 = vld [vmem:[%s3840_s3 + $0x18] sm:$0xff] }
 0x92b   : > { %v2952_v63 = vpop.eup %2951 }
 0x92c   : > { %v1491_v55 = vmul.f32 %v2952_v63, %v1489_v32  ;;  %vm1496_vm9 = vweird.f32 %v2952_v63  ;;  %v2796_v32 = vunpack.i.l.bf16 %v2795_v59 }
 0x92d   : > { %vm1497_vm11 = vmor %vm1495_vm10, %vm1496_vm9 }
 0x92e   : > { %v1492_v35 = vsub.f32 1.0, %v1491_v55 }
 0x930   : > { %v1493_v31 = vmul.f32 %v2952_v63, %v1492_v35 }
 0x932   : > { %v1494_v12 = vadd.f32 %v2952_v63, %v1493_v31 }
 0x934   : > { %v1498_v56 = vsel %vm1497_vm11, %v2952_v63, %v1494_v12  ;;  %v1862_v12 = vld [vmem:[%s3840_s3 + $0x40] sm:$0xff] }
 0x935   : > { %v1503_v16 = vsel %vm1500_vm12, %v1502_v28, %v1498_v56  ;;  %v3663_v28 = vpack.i.bf16 %v1861_v5, %v1862_v12 }
 0x936   : > { %v1504_v37 = vmul.f32 %v2948_v3, %v1503_v16  ;;  %v3638_v3 = vpop.f32.mrf.mxu3 }
 0x938   : > { %2671 = vmatmul.msk.f32.vlgmr.msra.gmra.mxu1 %vm1480_vm7, %v1504_v37 }
 0x939   : > { %v1569_v6 = vpop.xlane.xlu2 %1568 }
 0x93a   : > { %2953 = vrcp.f32 %v1569_v6  ;;  %v1581_v42 = vand.u32 2147483648, %v1569_v6  ;;  %v1579_v10 = vand.u32 2147483647, %v1569_v6  ;;  %vm1575_vm14 = vweird.f32 %v1569_v6 }
 0x93c   : > { %v1582_v44 = vor.u32 1.1754944e-38, %v1581_v42  ;;  %vm1580_vm1 = vcmp.eq.f32.partialorder %v1579_v10, 8.507059e+37 }
 0x940   : > { %v2954_v19 = vpop.eup %2953 }
 0x941   : > { %v1571_v47 = vmul.f32 %v2954_v19, %v1569_v6  ;;  %v1696_v36 = vpop.permute.xlu2 %1695  ;;  %vm1576_vm13 = vweird.f32 %v2954_v19 }
 0x942   : > { %2679 = vmatmul.msk.f32.vlgmr.msra.gmra.mxu2 %vm610_vm6, %v1696_v36  ;;  %vm1577_vm15 = vmor %vm1575_vm14, %vm1576_vm13 }
 0x943   : > { %v1572_v41 = vsub.f32 1.0, %v1571_v47 }
 0x945   : > { %v1573_v43 = vmul.f32 %v2954_v19, %v1572_v41 }
 0x947   : > { %v1574_v11 = vadd.f32 %v2954_v19, %v1573_v43 }
 0x949   : > { %v1578_v46 = vsel %vm1577_vm15, %v2954_v19, %v1574_v11  ;;  %v1618_v18 = vpop.permute.xlu2 %1617 }
 0x94a   : > { %v1583_v17 = vsel %vm1580_vm1, %v1582_v44, %v1578_v46  ;;  %2675 = vmatpush.xpose.msk.msrb.mxu0 %vm610_vm6, %v1618_v18 }
 0x94b   : > { %v1584_v57 = vmul.f32 %v2950_v21, %v1583_v17 }
 0x94d   : > { %2674 = vmatmul.msk.f32.vlgmr.msra.gmra.mxu3 %vm1480_vm7, %v1584_v57  ;;  %2676 = vmatmul.msk.f32.vlgmr.msrb.gmra.mxu0 %vm610_vm6, %v3592_v62 }
 0x94e   : > { %1814 = vmatpush.msra.mxu0 %v2796_v32 }
 0x950   : > { %1815 = vmatpush.msra.mxu0 %v2797_v58 }
 0x951   : > { %v2800_v63 = vpop.permute.xlu2 %2799 }
 0x952   : > { %v2801_v55 = vunpack.i.l.bf16 %v2800_v63  ;;  %v2802_v35 = vunpack.i.h.bf16 %v2800_v63 }
 0x954   : > { %1816 = vmatpush.msra.mxu0 %v2801_v55 }
 0x956   : > { %1817 = vmatpush.msra.mxu0 %v2802_v35 }
 0x9b5   : > { %v1528_v6 = vpop.f32.mrf.mxu1 }
 0x9c5   : > { %v1720_v48 = vpop.f32.mrf.mxu2 }
 0x9c6   : > { %v1723_v50 = vmul.f32 0.25, %v1720_v48 }
 0x9c8   : > { %v1724_v26 = vadd.f32 %v1723_v50, %v3597_v33 }
 0x9ca   : > { %v1725_v52 = vsel %vm1480_vm7, %v1724_v26, -inf  ;;  %v1640_v30 = vpop.f32.mrf.mxu0 }
 0x9cb   : > { %1726 = vmax.xlane.f32.xlu2 %v1725_v52  ;;  %v1643_v45 = vmul.f32 0.25, %v1640_v30  ;;  %v1381_v52 = vadd.f32 %v3634_v23, %v3451_v13  ;;  %v1383_v30 = vadd.f32 %v3638_v3, %v3504_v20 }
 0x9cd   : > { %v1644_v21 = vadd.f32 %v1643_v45, %v3597_v33  ;;  %v1864_v33 = vld [vmem:[%s3840_s3 + $0x90] sm:$0xff] }
 0x9ce   : > { %v3653_v31 = vpack.i.bf16 %v1863_v14, %v1864_v33 }
 0x9cf   : > { %v1645_v9 = vsel %vm1480_vm7, %v1644_v21, -inf }
 0x9d0   : > { %v1608_v22 = vpop.f32.mrf.mxu3 }
 0x9d1   : > { %1612 = vrot.lane.b32.xlu1 %v1608_v22, %s3021_s9  ;;  %v1382_v22 = vadd.f32 %v3636_v60, %v3496_v49 }
 0x9e3   : > { %1669 = vrot.lane.b32.xlu2 %v3592_v62, %s3015_s7 }
 0x9fb   : > { %1646 = vmax.xlane.f32.xlu1 %v1645_v9 }
 0xa14   : > { %2804 = vrot.lane.b32.xlu1 %v3653_v31, %s3017_s21 }
 0xa1c   : > { %2809 = vrot.lane.b32.xlu1 %v3663_v28, %s3017_s21 }
 0xa3e   : > { %v1727_v56 = vpop.xlane.xlu2 %1726 }
 0xa3f   : > { %v1728_v16 = vsub.f32 %v1724_v26, %v1727_v56 }
 0xa41   : > { %v1729_v37 = vmul.f32 1.442695, %v1728_v16 }
 0xa43   : > { %2955 = vpow2.f32 %v1729_v37  ;;  %v1613_v19 = vpop.permute.xlu1 %1612 }
 0xa44   : > { %v1615_v47 = vsel %vm610_vm6, %v1528_v6, %v1613_v19 }
 0xa45   : > { %2681 = vmatmul.msk.f32.vlgmr.msra.gmra.mxu0 %vm258_vm0, %v1615_v47 }
 0xa46   : > { %v1670_v36 = vpop.permute.xlu2 %1669 }
 0xa47   : > { %1690 = vmatpush.msrb.mxu1 %v1670_v36 }
 0xa49   : > { %1883 = vmatpush.msra.mxu1 %v1864_v33  ;;  %v2956_v41 = vpop.eup %2955 }
 0xa4a   : > { %v1731_v42 = vsel %vm1480_vm7, %v2956_v41, 0.0 }
 0xa4b   : > { %1884 = vmatpush.msra.mxu1 %v1863_v14  ;;  %1732 = vadd.xlane.f32.xlu0 %v1731_v42 }
 0xa4d   : > { %1885 = vmatpush.msra.mxu1 %v1862_v12 }
 0xa4f   : > { %1886 = vmatpush.msra.mxu1 %v1861_v5 }
 0xa5f   : > { %1749 = vrot.lane.b32.xlu0 %v3592_v62, %s3020_s30  ;;  %v1380_v62 = vadd.f32 %v3632_v40, %v3445_v34 }
 0xa6e   : > { %v1647_v43 = vpop.xlane.xlu1 %1646 }
 0xa6f   : > { %v1648_v10 = vsub.f32 %v1644_v21, %v1647_v43 }
 0xa71   : > { %v1649_v11 = vmul.f32 1.442695, %v1648_v10 }
 0xa73   : > { %2957 = vpow2.f32 %v1649_v11 }
 0xa79   : > { %v3672_v44 = vpop.eup %2957 }
 0xa7a   : > { %v1651_v57 = vsel %vm1480_vm7, %v3672_v44, 0.0 }
 0xa86   : > { %v2805_v46 = vpop.permute.xlu1 %2804 }
 0xa87   : > { %v2807_v18 = vunpack.i.h.bf16 %v2805_v46  ;;  %v2806_v17 = vunpack.i.l.bf16 %v2805_v46 }
 0xa89   : > { %1652 = vadd.xlane.f32.xlu0 %v1651_v57  ;;  %1934 = vmatpush.msrb.mxu2 %v2806_v17 }
 0xa8b   : > { %1935 = vmatpush.msrb.mxu2 %v2807_v18 }
 0xa8e   : > { %v2810_v48 = vpop.permute.xlu1 %2809 }
 0xa8f   : > { %v2812_v50 = vunpack.i.h.bf16 %v2810_v48  ;;  %v2811_v26 = vunpack.i.l.bf16 %v2810_v48 }
 0xa91   : > { %1936 = vmatpush.msrb.mxu2 %v2811_v26 }
 0xa93   : > { %1937 = vmatpush.msrb.mxu2 %v2812_v50 }
 0xa94   : > { %2685 = vmatmul.msk.f32.vlgmr.msrb.gmra.mxu2 %vm258_vm0, %v1380_v62 }
 0xa9c   : > { %2686 = vmatmul.msk.f32.gmra.mxu2 %vm258_vm0, %v1381_v52 }
 0xaa4   : > { %2687 = vmatmul.msk.f32.gmra.mxu2 %vm258_vm0, %v1382_v22 }
 0xaac   : > { %2688 = vmatmul.msk.f32.gmra.mxu2 %vm258_vm0, %v1383_v30 }
 0xabe   : > { %v1733_v45 = vpop.xlane.xlu0 %1732 }
 0xabf   : > { %2959 = vrcp.f32 %v1733_v45  ;;  %v1745_v9 = vand.u32 2147483648, %v1733_v45  ;;  %v1743_v20 = vand.u32 2147483647, %v1733_v45  ;;  %vm1739_vm3 = vweird.f32 %v1733_v45 }
 0xac1   : > { %v1746_v58 = vor.u32 1.1754944e-38, %v1745_v9  ;;  %vm1744_vm5 = vcmp.eq.f32.partialorder %v1743_v20, 8.507059e+37 }
 0xac2   : > { %v1819_v34 = vpop.f32.mrf.mxu0 }
 0xac3   : > { %v3689_v40 = vadd.f32 %v1819_v34, %v3378_v39 }
 0xac5   : > { %v2960_v21 = vpop.eup %2959  ;;  %v1827_v13 = vmul.f32 %v3689_v40, %v3689_v40 }
 0xac6   : > { %v1735_v23 = vmul.f32 %v2960_v21, %v1733_v45  ;;  %vm1740_vm2 = vweird.f32 %v2960_v21 }
 0xac7   : > { %v1829_v49 = vsel %vm258_vm0, %v1827_v13, 0.0  ;;  %vm1741_vm4 = vmor %vm1739_vm3, %vm1740_vm2 }
 0xac8   : > { %v1736_v60 = vsub.f32 1.0, %v1735_v23  ;;  %1830 = vadd.xlane.f32.xlu2 %v1829_v49 }
 0xaca   : > { %v1737_v59 = vmul.f32 %v2960_v21, %v1736_v60 }
 0xacc   : > { %v1738_v3 = vadd.f32 %v2960_v21, %v1737_v59 }
 0xace   : > { %v1742_v32 = vsel %vm1741_vm4, %v2960_v21, %v1738_v3 }
 0xacf   : > { %v1747_v39 = vsel %vm1744_vm5, %v1746_v58, %v1742_v32 }
 0xad0   : > { %v1748_v63 = vmul.f32 %v2956_v41, %v1747_v39 }
 0xad1   : > { %v1750_v55 = vpop.permute.xlu0 %1749 }
 0xad2   : > { %1770 = vmatpush.msrb.mxu3 %v1750_v55 }
 0xad3   : > { %2680 = vmatmul.msk.f32.vlgmr.msrb.gmra.mxu3 %vm1480_vm7, %v1748_v63 }
 0xafc   : > { %v1653_v35 = vpop.xlane.xlu0 %1652 }
 0xafd   : > { %2961 = vrcp.f32 %v1653_v35  ;;  %v1665_v12 = vand.u32 2147483648, %v1653_v35  ;;  %v1663_v16 = vand.u32 2147483647, %v1653_v35  ;;  %vm1659_vm10 = vweird.f32 %v1653_v35 }
 0xaff   : > { %v1666_v6 = vor.u32 1.1754944e-38, %v1665_v12  ;;  %vm1664_vm12 = vcmp.eq.f32.partialorder %v1663_v16, 8.507059e+37 }
 0xb03   : > { %v2962_v14 = vpop.eup %2961 }
 0xb04   : > { %v1655_v33 = vmul.f32 %v2962_v14, %v1653_v35  ;;  %vm1660_vm9 = vweird.f32 %v2962_v14 }
 0xb05   : > { %vm1661_vm11 = vmor %vm1659_vm10, %vm1660_vm9 }
 0xb06   : > { %v1656_v5 = vsub.f32 1.0, %v1655_v33 }
 0xb08   : > { %v1657_v56 = vmul.f32 %v2962_v14, %v1656_v5 }
 0xb0a   : > { %v1658_v37 = vadd.f32 %v2962_v14, %v1657_v56 }
 0xb0c   : > { %v1662_v19 = vsel %vm1661_vm11, %v2962_v14, %v1658_v37 }
 0xb0d   : > { %v1667_v47 = vsel %vm1664_vm12, %v1666_v6, %v1662_v19 }
 0xb0e   : > { %v1668_v36 = vmul.f32 %v3672_v44, %v1667_v47 }
 0xb10   : > { %2677 = vmatmul.msk.f32.vlgmr.msrb.gmra.mxu1 %vm1480_vm7, %v1668_v36 }
 0xb17   : > { %v1939_v41 = vpop.f32.mrf.mxu2 }
 0xb1f   : > { %v1942_v42 = vpop.f32.mrf.mxu2 }
 0xb20   : > { %2039 = vrot.lane.b32.xlu1 %v1942_v42, %s3018_s0  ;;  %2689 = vmatpush.xpose.msk.msra.mxu3 %vm610_vm6, %v1942_v42  ;;  %v2818_v43 = vpack.i.bf16 %v1939_v41, %v1942_v42 }
 0xb24   : > { %2690 = vmatpush.xpose.msk.msra.mxu3 %vm610_vm6, %v1939_v41 }
 0xb27   : > { %v3718_v58 = vpop.f32.mrf.mxu2 }
 0xb28   : > { %2037 = vrot.lane.b32.xlu1 %v1939_v41, %s3018_s0 }
 0xb2f   : > { %v3722_v63 = vpop.f32.mrf.mxu2 }
 0xb3b   : > { %v1831_v10 = vpop.xlane.xlu2 %1830 }
 0xb3c   : > { %v1835_v11 = vmul.f32 %v1831_v10, %v3131_v24 }
 0xb3e   : > { %v1837_v46 = vadd.f32 1e-06, %v1835_v11 }
 0xb40   : > { %2963 = vrsqrt.f32 %v1837_v46  ;;  %vm1845_vm13 = vweird.f32 %v1837_v46 }
 0xb46   : > { %v2964_v18 = vpop.eup %2963 }
 0xb47   : > { %v1840_v44 = vmul.f32 %v2964_v18, %v1837_v46  ;;  %vm1846_vm7 = vweird.f32 %v2964_v18 }
 0xb48   : > { %vm1847_vm14 = vmor %vm1845_vm13, %vm1846_vm7 }
 0xb49   : > { %v1841_v17 = vmul.f32 %v2964_v18, %v1840_v44 }
 0xb4b   : > { %v1842_v57 = vmul.f32 0.5, %v1841_v17 }
 0xb4d   : > { %v1843_v48 = vsub.f32 1.5, %v1842_v57 }
 0xb4f   : > { %v1844_v50 = vmul.f32 %v2964_v18, %v1843_v48 }
 0xb51   : > { %v1848_v26 = vsel %vm1847_vm14, %v2964_v18, %v1844_v50 }
 0xb52   : > { %v1859_v62 = vmul.f32 %v1848_v26, %v3689_v40 }
 0xb54   : > { %2683 = vmatmul.msk.f32.vlgmr.msra.gmra.mxu1 %vm258_vm0, %v1859_v62 }
 0xb56   : > { %v1772_v52 = vpop.f32.mrf.mxu3 }
 0xb57   : > { %1776 = vrot.lane.b32.xlu0 %v1772_v52, %s3021_s9 }
 0xb8d   : > { %v1692_v45 = vpop.f32.mrf.mxu1 }
 0xb92   : > { %v2040_v22 = vpop.permute.xlu1 %2039 }
 0xb93   : > { %2693 = vmatpush.xpose.msk.msrb.mxu0 %vm610_vm6, %v2040_v22 }
 0xb9a   : > { %v2038_v30 = vpop.permute.xlu1 %2037 }
 0xb9b   : > { %2694 = vmatpush.xpose.msk.msrb.mxu0 %vm610_vm6, %v2038_v30 }
 0xbc9   : > { %v1777_v34 = vpop.permute.xlu0 %1776 }
 0xbca   : > { %v1779_v21 = vsel %vm610_vm6, %v1692_v45, %v1777_v34 }
 0xbcb   : > { %2682 = vmatmul.msk.f32.gmra.mxu0 %vm258_vm0, %v1779_v21 }
 0xbd1   : > { %v1888_v13 = vpop.f32.mrf.mxu1 }
 0xbd2   : > { %2035 = vrot.lane.b32.xlu1 %v1888_v13, %s3018_s0  ;;  %2691 = vmatmul.msk.f32.vlgmr.msra.gmra.mxu3 %vm610_vm6, %v1888_v13 }
 0xc44   : > { %v2036_v23 = vpop.permute.xlu1 %2035 }
 0xc45   : > { %2695 = vmatmul.msk.f32.vlgmr.msrb.gmra.mxu0 %vm610_vm6, %v2036_v23 }
 0xc48   : > { %v1822_v49 = vpop.f32.mrf.mxu0 }
 0xc49   : > { %v3713_v60 = vadd.f32 %v1822_v49, %v3380_v1 }
 0xc4b   : > { %v1828_v9 = vmul.f32 %v3713_v60, %v3713_v60 }
 0xc4d   : > { %v1832_v59 = vsel %vm258_vm0, %v1828_v9, 0.0 }
 0xc4e   : > { %1833 = vadd.xlane.f32.xlu0 %v1832_v59 }
 0xc55   : > { %v1977_v20 = vpop.f32.mrf.mxu3 }
 0xc56   : > { %v1980_v3 = vmul.f32 0.25, %v1977_v20 }
 0xc58   : > { %v1981_v32 = vadd.f32 %v1980_v3, %v3278_v25 }
 0xc5a   : > { %v1982_v39 = vsel %vm610_vm6, %v1981_v32, -inf }
 0xc5b   : > { %1983 = vmax.xlane.f32.xlu2 %v1982_v39 }
 0xc62   : > { %2215 = vrot.lane.b32.xlu0 %v3722_v63, %s3018_s0 }
 0xc6a   : > { %2819 = vrot.lane.b32.xlu0 %v2818_v43, %s3017_s21 }
 0xc73   : > { %2814 = vrot.lane.b32.xlu2 %v2818_v43, %s3016_s20 }
 0xcc1   : > { %v1834_v1 = vpop.xlane.xlu0 %1833 }
 0xcc2   : > { %v1836_v55 = vmul.f32 %v1834_v1, %v3131_v24  ;;  %v2064_v35 = vpop.f32.mrf.mxu0 }
 0xcc3   : > { %v2067_v14 = vmul.f32 0.25, %v2064_v35 }
 0xcc4   : > { %v1838_v33 = vadd.f32 1e-06, %v1836_v55 }
 0xcc5   : > { %v2068_v5 = vadd.f32 %v2067_v14, %v3278_v25 }
 0xcc6   : > { %2965 = vrsqrt.f32 %v1838_v33  ;;  %vm1855_vm1 = vweird.f32 %v1838_v33 }
 0xcc7   : > { %v2069_v12 = vsel %vm610_vm6, %v2068_v5, -inf }
 0xcc8   : > { %2070 = vmax.xlane.f32.xlu1 %v2069_v12 }
 0xccc   : > { %v2966_v56 = vpop.eup %2965 }
 0xccd   : > { %v1850_v16 = vmul.f32 %v2966_v56, %v1838_v33  ;;  %vm1856_vm15 = vweird.f32 %v2966_v56 }
 0xcce   : > { %v1984_v37 = vpop.xlane.xlu2 %1983  ;;  %vm1857_vm2 = vmor %vm1855_vm1, %vm1856_vm15 }
 0xccf   : > { %v1851_v6 = vmul.f32 %v2966_v56, %v1850_v16  ;;  %v1985_v22 = vsub.f32 %v1981_v32, %v1984_v37 }
 0xcd1   : > { %v1852_v19 = vmul.f32 0.5, %v1851_v6  ;;  %v1986_v30 = vmul.f32 1.442695, %v1985_v22 }
 0xcd3   : > { %v1853_v47 = vsub.f32 1.5, %v1852_v19 }
 0xcd4   : > { %v2216_v36 = vpop.permute.xlu0 %2215 }
 0xcd5   : > { %v1854_v41 = vmul.f32 %v2966_v56, %v1853_v47 }
 0xcd6   : > { %v2815_v42 = vpop.permute.xlu2 %2814 }
 0xcd7   : > { %v2816_v43 = vunpack.i.l.bf16 %v2815_v42  ;;  %v1858_v10 = vsel %vm1857_vm2, %v2966_v56, %v1854_v41  ;;  %v2817_v11 = vunpack.i.h.bf16 %v2815_v42 }
 0xcd8   : > { %v1860_v25 = vmul.f32 %v1858_v10, %v3713_v60 }
 0xcd9   : > { %2116 = vmatpush.msrb.mxu1 %v2816_v43 }
 0xcda   : > { %2684 = vmatmul.msk.f32.gmra.mxu1 %vm258_vm0, %v1860_v25 }
 0xcdb   : > { %2117 = vmatpush.msrb.mxu1 %v2817_v11 }
 0xcdc   : > { %v2820_v46 = vpop.permute.xlu0 %2819 }
 0xcdd   : > { %2701 = vmatpush.xpose.msk.msra.mxu1 %vm610_vm6, %v2216_v36  ;;  %v2821_v18 = vunpack.i.l.bf16 %v2820_v46  ;;  %v2822_v44 = vunpack.i.h.bf16 %v2820_v46 }
 0xcdf   : > { %2029 = vmatpush.msrb.mxu3 %v2821_v18 }
 0xce1   : > { %2213 = vrot.lane.b32.xlu1 %v3718_v58, %s3018_s0  ;;  %2030 = vmatpush.msrb.mxu3 %v2822_v44 }
 0xce3   : > { %2697 = vmatpush.xpose.msk.msra.mxu3 %vm610_vm6, %v3722_v63 }
 0xce7   : > { %2698 = vmatpush.xpose.msk.msra.mxu3 %vm610_vm6, %v3718_v58 }
 0xd3b   : > { %v2071_v17 = vpop.xlane.xlu1 %2070 }
 0xd3c   : > { %v2072_v57 = vsub.f32 %v2068_v5, %v2071_v17 }
 0xd3e   : > { %v2073_v48 = vmul.f32 1.442695, %v2072_v57 }
 0xd40   : > { %2967 = vpow2.f32 %v2073_v48  ;;  %v2828_v48 = vpack.i.bf16 %v3718_v58, %v3722_v63 }
 0xd41   : > { %2969 = vpow2.f32 %v1986_v30 }
 0xd46   : > { %v2968_v50 = vpop.eup %2967 }
 0xd47   : > { %v2075_v26 = vsel %vm610_vm6, %v2968_v50, 0.0  ;;  %v2970_v45 = vpop.eup %2969 }
 0xd48   : > { %2076 = vadd.xlane.f32.xlu2 %v2075_v26  ;;  %v1988_v34 = vsel %vm610_vm6, %v2970_v45, 0.0 }
 0xd53   : > { %v2214_v62 = vpop.permute.xlu1 %2213 }
 0xd54   : > { %2702 = vmatpush.xpose.msk.msra.mxu1 %vm610_vm6, %v2214_v62 }
 0xd57   : > { %v1891_v52 = vpop.f32.mrf.mxu1 }
 0xd60   : > { %2211 = vrot.lane.b32.xlu2 %v1891_v52, %s3018_s0 }
 0xd89   : > { %1989 = vadd.xlane.f32.xlu2 %v1988_v34 }
 0xdbb   : > { %v2077_v21 = vpop.xlane.xlu2 %2076 }
 0xdbc   : > { %2971 = vrcp.f32 %v2077_v21  ;;  %v2089_v9 = vand.u32 2147483648, %v2077_v21  ;;  %v2087_v20 = vand.u32 2147483647, %v2077_v21  ;;  %vm2083_vm4 = vweird.f32 %v2077_v21 }
 0xdbe   : > { %v2090_v39 = vor.u32 1.1754944e-38, %v2089_v9  ;;  %vm2088_vm9 = vcmp.eq.f32.partialorder %v2087_v20, 8.507059e+37 }
 0xdc2   : > { %v2972_v13 = vpop.eup %2971 }
 0xdc3   : > { %v2079_v23 = vmul.f32 %v2972_v13, %v2077_v21  ;;  %vm2084_vm3 = vweird.f32 %v2972_v13  ;;  %v2212_v35 = vpop.permute.xlu2 %2211 }
 0xdc4   : > { %vm2085_vm5 = vmor %vm2083_vm4, %vm2084_vm3 }
 0xdc5   : > { %v2080_v49 = vsub.f32 1.0, %v2079_v23 }
 0xdc7   : > { %v2081_v59 = vmul.f32 %v2972_v13, %v2080_v49 }
 0xdc9   : > { %v2082_v3 = vadd.f32 %v2972_v13, %v2081_v59 }
 0xdcb   : > { %v2086_v32 = vsel %vm2085_vm5, %v2972_v13, %v2082_v3 }
 0xdcc   : > { %v2091_v1 = vsel %vm2088_vm9, %v2090_v39, %v2086_v32 }
 0xdcd   : > { %v2092_v55 = vmul.f32 %v2968_v50, %v2091_v1 }
 0xdcf   : > { %2696 = vmatmul.msk.f32.vlgmr.msrb.gmra.mxu1 %vm610_vm6, %v2092_v55 }
 0xdd0   : > { %2402 = vmatpush.msrb.mxu1 %v2383_v8 }
 0xdd2   : > { %2403 = vmatpush.msrb.mxu1 %v2382_v53 }
 0xdd4   : > { %2404 = vmatpush.msrb.mxu1 %v2381_v61 }
 0xdd7   : > { %2703 = vmatmul.msk.f32.vlgmr.msra.gmra.mxu1 %vm610_vm6, %v2212_v35 }
 0xdfc   : > { %v1990_v14 = vpop.xlane.xlu2 %1989 }
 0xdfd   : > { %2973 = vrcp.f32 %v1990_v14  ;;  %v2002_v56 = vand.u32 2147483648, %v1990_v14  ;;  %v2000_v37 = vand.u32 2147483647, %v1990_v14  ;;  %vm1996_vm11 = vweird.f32 %v1990_v14 }
 0xdff   : > { %v2003_v19 = vor.u32 1.1754944e-38, %v2002_v56  ;;  %vm2001_vm7 = vcmp.eq.f32.partialorder %v2000_v37, 8.507059e+37 }
 0xe03   : > { %v2974_v33 = vpop.eup %2973 }
 0xe04   : > { %v1992_v5 = vmul.f32 %v2974_v33, %v1990_v14  ;;  %vm1997_vm10 = vweird.f32 %v2974_v33 }
 0xe05   : > { %vm1998_vm12 = vmor %vm1996_vm11, %vm1997_vm10 }
 0xe06   : > { %v1993_v12 = vsub.f32 1.0, %v1992_v5 }
 0xe08   : > { %v1994_v16 = vmul.f32 %v2974_v33, %v1993_v12 }
 0xe0a   : > { %v1995_v6 = vadd.f32 %v2974_v33, %v1994_v16 }
 0xe0c   : > { %v1999_v47 = vsel %vm1998_vm12, %v2974_v33, %v1995_v6 }
 0xe0d   : > { %v2004_v36 = vsel %vm2001_vm7, %v2003_v19, %v1999_v47 }
 0xe0e   : > { %v2005_v41 = vmul.f32 %v2970_v45, %v2004_v36 }
 0xe10   : > { %2692 = vmatmul.msk.f32.vlgmr.msrb.gmra.mxu3 %vm610_vm6, %v2005_v41 }
 0xe18   : > { %2699 = vmatmul.msk.f32.vlgmr.msra.gmra.mxu3 %vm610_vm6, %v1891_v52 }
 0xe4c   : > { %v2119_v42 = vpop.f32.mrf.mxu1 }
 0xe54   : > { %v2240_v43 = vpop.f32.mrf.mxu1 }
 0xe55   : > { %v2243_v10 = vmul.f32 0.25, %v2240_v43 }
 0xe57   : > { %v2244_v25 = vadd.f32 %v2243_v10, %v3365_v51 }
 0xe59   : > { %v2245_v11 = vsel %vm610_vm6, %v2244_v25, -inf }
 0xe5a   : > { %2246 = vmax.xlane.f32.xlu0 %v2245_v11 }
 0xe93   : > { %v3750_v46 = vpop.f32.mrf.mxu3 }
 0xe9b   : > { %v2153_v18 = vpop.f32.mrf.mxu3 }
 0xe9c   : > { %v2156_v44 = vmul.f32 0.25, %v2153_v18 }
 0xe9e   : > { %v2157_v17 = vadd.f32 %v2156_v44, %v3365_v51 }
 0xea0   : > { %v2158_v57 = vsel %vm610_vm6, %v2157_v17, -inf }
 0xea1   : > { %2159 = vmax.xlane.f32.xlu1 %v2158_v57 }
 0xeba   : > { %2829 = vrot.lane.b32.xlu1 %v2828_v48, %s3017_s21 }
 0xecd   : > { %v2247_v50 = vpop.xlane.xlu0 %2246 }
 0xece   : > { %v2248_v26 = vsub.f32 %v2244_v25, %v2247_v50 }
 0xed0   : > { %v2249_v62 = vmul.f32 1.442695, %v2248_v26 }
 0xed2   : > { %2975 = vpow2.f32 %v2249_v62 }
 0xed8   : > { %v2976_v52 = vpop.eup %2975 }
 0xed9   : > { %v2251_v22 = vsel %vm610_vm6, %v2976_v52, 0.0 }
 0xeda   : > { %2252 = vadd.xlane.f32.xlu2 %v2251_v22 }
 0xef2   : > { %2824 = vrot.lane.b32.xlu2 %v2828_v48, %s3016_s20 }
 0xefa   : > { %2839 = vrot.lane.b32.xlu2 %v3663_v28, %s3022_s17 }
 0xf02   : > { %2123 = vrot.lane.b32.xlu2 %v2119_v42, %s3021_s9 }
 0xf14   : > { %v2160_v51 = vpop.xlane.xlu1 %2159 }
 0xf15   : > { %v2161_v30 = vsub.f32 %v2157_v17, %v2160_v51 }
 0xf17   : > { %v2162_v58 = vmul.f32 1.442695, %v2161_v30 }
 0xf19   : > { %2977 = vpow2.f32 %v2162_v58 }
 0xf1f   : > { %v2978_v63 = vpop.eup %2977 }
 0xf20   : > { %v2164_v45 = vsel %vm610_vm6, %v2978_v63, 0.0 }
 0xf21   : > { %2165 = vadd.xlane.f32.xlu0 %v2164_v45 }
 0xf2c   : > { %v2830_v34 = vpop.permute.xlu1 %2829 }
 0xf2d   : > { %v2831_v21 = vunpack.i.l.bf16 %v2830_v34  ;;  %v2832_v13 = vunpack.i.h.bf16 %v2830_v34 }
 0xf2f   : > { %2205 = vmatpush.msra.mxu0 %v2831_v21 }
 0xf31   : > { %2206 = vmatpush.msra.mxu0 %v2832_v13 }
 0xf35   : > { %2834 = vrot.lane.b32.xlu0 %v3653_v31, %s3022_s17 }
 0xf4d   : > { %v2253_v23 = vpop.xlane.xlu2 %2252 }
 0xf4e   : > { %2979 = vrcp.f32 %v2253_v23  ;;  %v2265_v3 = vand.u32 2147483648, %v2253_v23  ;;  %v2263_v1 = vand.u32 2147483647, %v2253_v23  ;;  %vm2259_vm14 = vweird.f32 %v2253_v23 }
 0xf50   : > { %v2266_v35 = vor.u32 1.1754944e-38, %v2265_v3  ;;  %vm2264_vm1 = vcmp.eq.f32.partialorder %v2263_v1, 8.507059e+37 }
 0xf54   : > { %v2980_v28 = vpop.eup %2979 }
 0xf55   : > { %v2255_v49 = vmul.f32 %v2980_v28, %v2253_v23  ;;  %v2825_v9 = vpop.permute.xlu2 %2824  ;;  %vm2260_vm13 = vweird.f32 %v2980_v28 }
 0xf56   : > { %v2826_v59 = vunpack.i.l.bf16 %v2825_v9  ;;  %v2827_v39 = vunpack.i.h.bf16 %v2825_v9  ;;  %vm2261_vm15 = vmor %vm2259_vm14, %vm2260_vm13 }
 0xf57   : > { %v2256_v20 = vsub.f32 1.0, %v2255_v49 }
 0xf58   : > { %2292 = vmatpush.msrb.mxu3 %v2826_v59 }
 0xf59   : > { %v2257_v32 = vmul.f32 %v2980_v28, %v2256_v20 }
 0xf5a   : > { %2293 = vmatpush.msrb.mxu3 %v2827_v39 }
 0xf5b   : > { %v2258_v55 = vadd.f32 %v2980_v28, %v2257_v32 }
 0xf5d   : > { %v2262_v14 = vsel %vm2261_vm15, %v2980_v28, %v2258_v55  ;;  %v2840_v36 = vpop.permute.xlu2 %2839 }
 0xf5e   : > { %v2267_v31 = vsel %vm2264_vm1, %v2266_v35, %v2262_v14  ;;  %v2841_v44 = vunpack.i.l.bf16 %v2840_v36  ;;  %v2842_v17 = vunpack.i.h.bf16 %v2840_v36 }
 0xf5f   : > { %v2268_v33 = vmul.f32 %v2976_v52, %v2267_v31 }
 0xf61   : > { %2704 = vmatmul.msk.f32.vlgmr.msrb.gmra.mxu3 %vm610_vm6, %v2268_v33 }
 0xf65   : > { %v2124_v57 = vpop.permute.xlu2 %2123 }
 0xf66   : > { %v2126_v48 = vsel %vm610_vm6, %v3750_v46, %v2124_v57 }
 0xf94   : > { %v2166_v5 = vpop.xlane.xlu0 %2165 }
 0xf95   : > { %2981 = vrcp.f32 %v2166_v5  ;;  %v2178_v37 = vand.u32 2147483648, %v2166_v5  ;;  %v2176_v19 = vand.u32 2147483647, %v2166_v5  ;;  %vm2172_vm3 = vweird.f32 %v2166_v5 }
 0xf97   : > { %v2179_v41 = vor.u32 1.1754944e-38, %v2178_v37  ;;  %vm2177_vm5 = vcmp.eq.f32.partialorder %v2176_v19, 8.507059e+37 }
 0xf9b   : > { %v2982_v12 = vpop.eup %2981 }
 0xf9c   : > { %v2168_v56 = vmul.f32 %v2982_v12, %v2166_v5  ;;  %vm2173_vm2 = vweird.f32 %v2982_v12 }
 0xf9d   : > { %vm2174_vm4 = vmor %vm2172_vm3, %vm2173_vm2 }
 0xf9e   : > { %v2169_v16 = vsub.f32 1.0, %v2168_v56 }
 0xfa0   : > { %v2170_v6 = vmul.f32 %v2982_v12, %v2169_v16 }
 0xfa2   : > { %v2171_v47 = vadd.f32 %v2982_v12, %v2170_v6 }
 0xfa4   : > { %v2175_v42 = vsel %vm2174_vm4, %v2982_v12, %v2171_v47 }
 0xfa5   : > { %v2180_v43 = vsel %vm2177_vm5, %v2179_v41, %v2175_v42 }
 0xfa6   : > { %v2181_v10 = vmul.f32 %v2978_v63, %v2180_v43 }
 0xfa7   : > { %v2835_v25 = vpop.permute.xlu0 %2834 }
 0xfa8   : > { %v2837_v11 = vunpack.i.h.bf16 %v2835_v25  ;;  %v2836_v18 = vunpack.i.l.bf16 %v2835_v25  ;;  %2700 = vmatmul.msk.f32.vlgmr.msra.gmra.mxu0 %vm610_vm6, %v2181_v10 }
 0xfaa   : > { %2333 = vmatpush.msrb.mxu0 %v2836_v18 }
 0xfac   : > { %2334 = vmatpush.msrb.mxu0 %v2837_v11 }
 0xfae   : > { %2335 = vmatpush.msrb.mxu0 %v2841_v44 }
 0xfb0   : > { %2336 = vmatpush.msrb.mxu0 %v2842_v17 }
 0xfb1   : > { %2705 = vmatmul.msk.f32.vlgmr.msrb.gmra.mxu0 %vm258_vm0, %v2126_v48 }
 0xfe4   : > { %v2295_v50 = vpop.f32.mrf.mxu3 }
 0xfe5   : > { %2299 = vrot.lane.b32.xlu1 %v2295_v50, %s3021_s9 }
 0xfed   : > { %2844 = vrot.lane.b32.xlu1 %v2843_v38, %s3017_s21  ;;  %v2863_v38 = vpack.i.bf16 %v2382_v53, %v2383_v8 }
 0xff5   : > { %2849 = vrot.lane.b32.xlu1 %v2848_v54, %s3017_s21  ;;  %v2380_v54 = vld [vmem:[%s3840_s3 + $0x20] sm:$0xff] }
 0xff6   : > { %2405 = vmatpush.msrb.mxu1 %v2380_v54 }
 0xffd   : > { %2854 = vrot.lane.b32.xlu1 %v2853_v0, %s3017_s21  ;;  %v2868_v0 = vpack.i.bf16 %v2380_v54, %v2381_v61 }
0x1005   : > { %2859 = vrot.lane.b32.xlu1 %v2858_v2, %s3017_s21 }
0x100d   : > { %2864 = vrot.lane.b32.xlu1 %v2863_v38, %s3015_s7 }
0x1025   : > { %v2208_v46 = vpop.f32.mrf.mxu0 }
0x102e   : > { %v2338_v26 = vpop.f32.mrf.mxu0 }
0x102f   : > { %v3788_v7 = vadd.f32 %v2338_v26, %v3689_v40 }
0x1031   : > { %v2346_v4 = vmul.f32 %v3788_v7, %v3788_v7 }
0x1033   : > { %v2348_v15 = vsel %vm258_vm0, %v2346_v4, 0.0 }
0x1034   : > { %2349 = vadd.xlane.f32.xlu0 %v2348_v15 }
0x1048   : > { %2869 = vrot.lane.b32.xlu0 %v2868_v0, %s3015_s7 }
0x1057   : > { %v2300_v27 = vpop.permute.xlu1 %2299 }
0x1058   : > { %v2302_v29 = vsel %vm610_vm6, %v2208_v46, %v2300_v27 }
0x1059   : > { %2706 = vmatmul.msk.f32.gmra.mxu0 %vm258_vm0, %v2302_v29 }
0x105f   : > { %v2845_v45 = vpop.permute.xlu1 %2844 }
0x1060   : > { %v2847_v21 = vunpack.i.h.bf16 %v2845_v45  ;;  %v2846_v13 = vunpack.i.l.bf16 %v2845_v45 }
0x1062   : > { %2477 = vmatpush.msra.mxu2 %v2846_v13 }
0x1064   : > { %2478 = vmatpush.msra.mxu2 %v2847_v21 }
0x1067   : > { %v2850_v20 = vpop.permute.xlu1 %2849 }
0x1068   : > { %v2851_v39 = vunpack.i.l.bf16 %v2850_v20  ;;  %v2852_v32 = vunpack.i.h.bf16 %v2850_v20 }
0x106a   : > { %2479 = vmatpush.msra.mxu2 %v2851_v39 }
0x106c   : > { %2480 = vmatpush.msra.mxu2 %v2852_v32 }
0x106f   : > { %v2855_v3 = vpop.permute.xlu1 %2854 }
0x1070   : > { %v2856_v1 = vunpack.i.l.bf16 %v2855_v3  ;;  %v2857_v55 = vunpack.i.h.bf16 %v2855_v3 }
0x1072   : > { %2481 = vmatpush.msra.mxu2 %v2856_v1 }
0x1074   : > { %2482 = vmatpush.msra.mxu2 %v2857_v55 }
0x1077   : > { %v2860_v35 = vpop.permute.xlu1 %2859 }
0x1078   : > { %v2861_v14 = vunpack.i.l.bf16 %v2860_v35 }
0x107a   : > { %2483 = vmatpush.msra.mxu2 %v2861_v14 }
0x107f   : > { %v2865_v37 = vpop.permute.xlu1 %2864 }
0x1080   : > { %v2867_v19 = vunpack.i.h.bf16 %v2865_v37  ;;  %v2866_v47 = vunpack.i.l.bf16 %v2865_v37 }
0x1082   : > { %2528 = vmatpush.msra.mxu3 %v2866_v47 }
0x1084   : > { %2529 = vmatpush.msra.mxu3 %v2867_v19 }
0x10a7   : > { %v2350_v2 = vpop.xlane.xlu0 %2349 }
0x10a8   : > { %v2354_v40 = vmul.f32 %v2350_v2, %v3131_v24 }
0x10aa   : > { %v2356_v62 = vadd.f32 1e-06, %v2354_v40 }
0x10ac   : > { %2983 = vrsqrt.f32 %v2356_v62  ;;  %vm2364_vm9 = vweird.f32 %v2356_v62 }
0x10b2   : > { %v2984_v52 = vpop.eup %2983 }
0x10b3   : > { %v2359_v22 = vmul.f32 %v2984_v52, %v2356_v62  ;;  %vm2365_vm6 = vweird.f32 %v2984_v52 }
0x10b4   : > { %vm2366_vm10 = vmor %vm2364_vm9, %vm2365_vm6 }
0x10b5   : > { %v2360_v51 = vmul.f32 %v2984_v52, %v2359_v22 }
0x10b7   : > { %v2361_v30 = vmul.f32 0.5, %v2360_v51 }
0x10b9   : > { %v2362_v58 = vsub.f32 1.5, %v2361_v30 }
0x10ba   : > { %v2870_v6 = vpop.permute.xlu0 %2869 }
0x10bb   : > { %v2363_v63 = vmul.f32 %v2984_v52, %v2362_v58  ;;  %v2871_v36 = vunpack.i.l.bf16 %v2870_v6  ;;  %v2872_v41 = vunpack.i.h.bf16 %v2870_v6 }
0x10bd   : > { %v2367_v34 = vsel %vm2366_vm10, %v2984_v52, %v2363_v63  ;;  %2530 = vmatpush.msra.mxu3 %v2871_v36 }
0x10be   : > { %v2378_v23 = vmul.f32 %v2367_v34, %v3788_v7 }
0x10bf   : > { %2531 = vmatpush.msra.mxu3 %v2872_v41 }
0x10c0   : > { %2707 = vmatmul.msk.f32.vlgmr.msrb.gmra.mxu1 %vm258_vm0, %v2378_v23 }
0x10d6   : > { %v2341_v28 = vpop.f32.mrf.mxu0 }
0x10d7   : > { %v3813_v49 = vadd.f32 %v2341_v28, %v3713_v60  ;;  %v2862_v60 = vunpack.i.h.bf16 %v2860_v35 }
0x10d9   : > { %v2347_v9 = vmul.f32 %v3813_v49, %v3813_v49  ;;  %2484 = vmatpush.msra.mxu2 %v2862_v60 }
0x10db   : > { %v2351_v59 = vsel %vm258_vm0, %v2347_v9, 0.0 }
0x10dc   : > { %2352 = vadd.xlane.f32.xlu2 %v2351_v59 }
0x113d   : > { %v2407_v31 = vpop.f32.mrf.mxu1 }
0x113e   : > { %v2413_v33 = vmul.f32 %v2407_v31, %v2407_v31 }
0x1140   : > { %v2415_v5 = vmul.f32 %v2413_v33, %v2407_v31 }
0x1142   : > { %v2417_v12 = vmul.f32 0.044715, %v2415_v5 }
0x1144   : > { %v2419_v56 = vadd.f32 %v2417_v12, %v2407_v31 }
0x1146   : > { %v2421_v16 = vmul.f32 0.7978846, %v2419_v56 }
0x1148   : > { %2985 = vtanh.f32 %v2421_v16 }
0x114e   : > { %v2986_v42 = vpop.eup %2985 }
0x114f   : > { %v2425_v43 = vadd.f32 1.0, %v2986_v42  ;;  %v2353_v10 = vpop.xlane.xlu2 %2352 }
0x1150   : > { %v2355_v25 = vmul.f32 %v2353_v10, %v3131_v24 }
0x1151   : > { %v2427_v11 = vmul.f32 0.5, %v2425_v43 }
0x1152   : > { %v2357_v18 = vadd.f32 1e-06, %v2355_v25 }
0x1153   : > { %v2429_v44 = vmul.f32 %v2427_v11, %v2407_v31 }
0x1154   : > { %2987 = vrsqrt.f32 %v2357_v18  ;;  %vm2374_vm12 = vweird.f32 %v2357_v18 }
0x1155   : > { %2709 = vmatmul.msk.f32.vlgmr.msra.gmra.mxu2 %vm554_vm8, %v2429_v44 }
0x115a   : > { %v2988_v17 = vpop.eup %2987 }
0x115b   : > { %v2369_v57 = vmul.f32 %v2988_v17, %v2357_v18  ;;  %vm2375_vm11 = vweird.f32 %v2988_v17 }
0x115c   : > { %vm2376_vm7 = vmor %vm2374_vm12, %vm2375_vm11 }
0x115d   : > { %v2370_v48 = vmul.f32 %v2988_v17, %v2369_v57 }
0x115f   : > { %v2371_v50 = vmul.f32 0.5, %v2370_v48 }
0x1161   : > { %v2372_v46 = vsub.f32 1.5, %v2371_v50 }
0x1163   : > { %v2373_v26 = vmul.f32 %v2988_v17, %v2372_v46 }
0x1165   : > { %v2377_v4 = vsel %vm2376_vm7, %v2988_v17, %v2373_v26 }
0x1166   : > { %v2379_v15 = vmul.f32 %v2377_v4, %v3813_v49 }
0x1168   : > { %2708 = vmatmul.msk.f32.gmra.mxu1 %vm258_vm0, %v2379_v15 }
0x11d8   : > { %v2486_v24 = vpop.f32.mrf.mxu2 }
0x11d9   : > { %v2492_v27 = vadd.f32 %v2486_v24, %v3788_v7 }
0x11db   : > { %2711 = vmatmul.msk.f32.vlgmr.msra.gmra.mxu3 %vm258_vm0, %v2492_v27 }
0x11e5   : > { %v2410_v29 = vpop.f32.mrf.mxu1 }
0x11e6   : > { %v2414_v8 = vmul.f32 %v2410_v29, %v2410_v29 }
0x11e8   : > { %v2416_v53 = vmul.f32 %v2414_v8, %v2410_v29 }
0x11ea   : > { %v2418_v61 = vmul.f32 0.044715, %v2416_v53 }
0x11ec   : > { %v2420_v38 = vadd.f32 %v2418_v61, %v2410_v29 }
0x11ee   : > { %v2422_v54 = vmul.f32 0.7978846, %v2420_v38 }
0x11f0   : > { %2989 = vtanh.f32 %v2422_v54 }
0x11f6   : > { %v2990_v0 = vpop.eup %2989 }
0x11f7   : > { %v2426_v2 = vadd.f32 1.0, %v2990_v0 }
0x11f9   : > { %v2428_v40 = vmul.f32 0.5, %v2426_v2 }
0x11fb   : > { %v2430_v62 = vmul.f32 %v2428_v40, %v2410_v29 }
0x11fd   : > { %2710 = vmatmul.msk.f32.gmra.mxu2 %vm554_vm8, %v2430_v62 }
0x125e   : > { %v2533_v7 = vpop.f32.mrf.mxu3 }
0x125f   : > { %2539 = vst.msk [vmem:[%s230_s13] sm:$0xff] %vm554_vm8, %v2533_v7 }
0x1280   : > { %v2489_v52 = vpop.f32.mrf.mxu2 }
0x1281   : > { %v2493_v22 = vadd.f32 %v2489_v52, %v3813_v49 }
0x1283   : > { %2712 = vmatmul.msk.f32.gmra.mxu3 %vm258_vm0, %v2493_v22 }
0x1306   : > { %v2536_v51 = vpop.f32.mrf.mxu3 }
0x1307   : > { %2540 = vst.msk [vmem:[%s230_s13 + $0x8] sm:$0xff] %vm554_vm8, %v2536_v51 }
0x1308 PF: > { %s23_s22 = sadd.s32 1, %s3011_s22  }
0x1309   : > { %p20_p5 = scmp.ge.s32.totalorder %s23_s22, 4  }
0x130b   :  { %22 = sbr.rel (!%p20_p5) target bundleno = 7 (0x7), region = 69 }

</bundles_post_ra>
